<compile_context>
chip_gen: v5e
topology: v5e:2x2
jax: 0.10.0
libtpu: 0.0.40
codegen_flags: <defaults>
</compile_context>

<pallas_src>
import functools

import jax
import jax.numpy as jnp
from jax.experimental import pallas as pl
from jax.experimental.pallas import tpu as pltpu

LN_EPS = 1e-5
LOG_STD_MIN = -20.0
LOG_STD_MAX = 2.0
_INV_SQRT2 = 0.7071067811865476


def _gelu_exact(x):
    # torch.nn.GELU default = exact (erf-based) GELU.
    return 0.5 * x * (1.0 + jax.lax.erf(x * _INV_SQRT2))


def _layernorm_no_affine(x):
    # Reuse (x - m) for both variance and normalization.  Note: an all-zero
    # (masked ragged-tail) row hits rsqrt(0 + eps), which is finite and its
    # output is discarded by the masked store.
    m = jnp.mean(x, axis=-1, keepdims=True)
    xm = x - m
    v = jnp.mean(xm * xm, axis=-1, keepdims=True)
    return xm * jax.lax.rsqrt(v + LN_EPS)


def policy_net_kernel(x_ref, w1_ref, b1_ref, w2_ref, b2_ref,
                      w3mu_ref, b3mu_ref, w3ls_ref, b3ls_ref,
                      act_ref, std_ref, *, matmul_dtype):
    # x stays f32 in HBM/VMEM; cast to the MXU dtype on the VPU here.
    x = x_ref[...].astype(matmul_dtype)

    # fc1: Linear(n_x, 256) + LayerNorm(256, no affine), then GELU.
    h1 = jnp.dot(x, w1_ref[...], preferred_element_type=jnp.float32) + b1_ref[...]
    h1 = _gelu_exact(_layernorm_no_affine(h1))

    # fc2: Linear(256, 128) + LayerNorm(128, no affine), then GELU.
    h2 = jnp.dot(h1.astype(matmul_dtype), w2_ref[...],
                 preferred_element_type=jnp.float32) + b2_ref[...]
    h2 = _gelu_exact(_layernorm_no_affine(h2))

    # fc3 split into mu / log_std column blocks (pre-split weights) so the two
    # head outputs are produced directly, lane-exact, with no in-kernel slice.
    h2m = h2.astype(matmul_dtype)
    mu = jnp.dot(h2m, w3mu_ref[...],
                 preferred_element_type=jnp.float32) + b3mu_ref[...]
    log_std = jnp.dot(h2m, w3ls_ref[...],
                      preferred_element_type=jnp.float32) + b3ls_ref[...]

    # SquashedGaussianHead (deterministic part).
    act_ref[...] = jnp.tanh(mu).astype(act_ref.dtype)
    std_ref[...] = jnp.exp(
        jnp.clip(log_std, LOG_STD_MIN, LOG_STD_MAX)).astype(std_ref.dtype)


def prepare_params(params, n_u, matmul_dtype=jnp.bfloat16):
    """One-time weight preparation (call once, outside the hot forward path).

    Casts weights to the MXU dtype (bf16 recommended on v5e/v6e/v7x; the MXU
    is natively bf16 and f32 accumulation + per-layer LayerNorm keep it
    numerically benign) and splits the head weight/bias into mu / log_std
    column blocks.  Biases stay f32 (they are added post-accumulation).
    """
    w1, b1, w2, b2, w3, b3 = params
    return (
        w1.astype(matmul_dtype), b1.astype(jnp.float32),
        w2.astype(matmul_dtype), b2.astype(jnp.float32),
        w3[:, :n_u].astype(matmul_dtype), b3[:, :n_u].astype(jnp.float32),
        w3[:, n_u:].astype(matmul_dtype), b3[:, n_u:].astype(jnp.float32),
    )


def _pick_bm(B, bm):
    if bm is not None:
        return bm
    bm = 512
    # Keep >= 2 grid steps when the batch allows it (v7x has 2 TensorCores and
    # the "parallel" axis shards across them); floor at 128.
    while bm > 128 and pl.cdiv(B, bm) < 2:
        bm //= 2
    return bm


def policy_net_forward(x, prepared_params, *, n_u, bm=None):
    """Fused PolicyNet forward.

    x:                [B, n_x] float32.
    prepared_params:  output of prepare_params (weights pre-cast + head split).
    bm:               batch tile; None -> auto (512 down to 128, grid >= 2
                      when possible).  Ragged tails are handled by Pallas's
                      masked trailing block, so any B works without padding.
    """
    (w1, b1, w2, b2, w3mu, b3mu, w3ls, b3ls) = prepared_params
    matmul_dtype = w1.dtype
    B, n_x = x.shape
    bm = _pick_bm(B, bm)
    assert bm % 8 == 0  # x ref stays f32, so (8,128) sublane rule applies

    kernel = functools.partial(policy_net_kernel, matmul_dtype=matmul_dtype)

    # Weights/biases: full-array blocks with constant index maps; Pallas does
    # not re-copy a block whose index is unchanged across grid steps, so they
    # are effectively VMEM-resident (~0.1 MiB total).
    full = lambda arr: pl.BlockSpec(arr.shape, lambda i: (0,) * arr.ndim)

    act, std = pl.pallas_call(
        kernel,
        out_shape=(jax.ShapeDtypeStruct((B, n_u), jnp.float32),
                   jax.ShapeDtypeStruct((B, n_u), jnp.float32)),
        grid_spec=pltpu.PrefetchScalarGridSpec(
            num_scalar_prefetch=0,
            grid=(pl.cdiv(B, bm),),
            in_specs=[
                pl.BlockSpec((bm, n_x), lambda i: (i, 0)),
                full(w1), full(b1),
                full(w2), full(b2),
                full(w3mu), full(b3mu),
                full(w3ls), full(b3ls),
            ],
            out_specs=[pl.BlockSpec((bm, n_u), lambda i: (i, 0)),
                       pl.BlockSpec((bm, n_u), lambda i: (i, 0))],
        ),
        compiler_params=pltpu.CompilerParams(
            dimension_semantics=("parallel",)),
    )(x, w1, b1, w2, b2, w3mu, b3mu, w3ls, b3ls)
    return act, std


def init_params(key, n_x, n_u):
    """Deterministic PyTorch-style (uniform +-1/sqrt(fan_in)) init."""
    dims = [(n_x, 256), (256, 128), (128, 2 * n_u)]
    params = []
    for (fan_in, fan_out) in dims:
        key, kw, kb = jax.random.split(key, 3)
        bound = 1.0 / jnp.sqrt(float(fan_in))
        w = jax.random.uniform(kw, (fan_in, fan_out), jnp.float32, -bound, bound)
        b = jax.random.uniform(kb, (1, fan_out), jnp.float32, -bound, bound)
        params += [w, b]
    return tuple(params)


def reference_forward(x, params, n_u):
    """Pure-JAX reference of the same forward pass (for a sanity check)."""
    w1, b1, w2, b2, w3, b3 = params
    h = _gelu_exact(_layernorm_no_affine(x @ w1 + b1))
    h = _gelu_exact(_layernorm_no_affine(h @ w2 + b2))
    f3 = h @ w3 + b3
    mu, log_std = f3[:, :n_u], jnp.clip(f3[:, n_u:], LOG_STD_MIN, LOG_STD_MAX)
    return jnp.tanh(mu), jnp.exp(log_std)


if __name__ == "__main__":
    n_x, n_u = 32, 8     # obs dim (n_x[0]) and action dim (n_u[0])
    B = 200              # non-multiple of bm -> exercises the ragged-tail path

    key = jax.random.PRNGKey(0)
    key, kx = jax.random.split(key)
    x = jax.random.normal(kx, (B, n_x), jnp.float32)
    params = init_params(key, n_x, n_u)
    ref_act, ref_std = reference_forward(x, params, n_u)

    # f32 MXU path: must match the pure-JAX reference tightly.
    p32 = prepare_params(params, n_u, matmul_dtype=jnp.float32)
    act, std = jax.block_until_ready(policy_net_forward(x, p32, n_u=n_u))
    assert act.shape == (B, n_u) and std.shape == (B, n_u)
    assert jnp.allclose(act, ref_act, atol=1e-5, rtol=1e-5)
    assert jnp.allclose(std, ref_std, atol=1e-5, rtol=1e-5)

    # bf16 MXU-input path (recommended default on v5e/v6e/v7x): loose-tolerance
    # check so regressions in the in-kernel cast placement are caught.
    pbf = prepare_params(params, n_u)  # default bf16
    act16, std16 = jax.block_until_ready(policy_net_forward(x, pbf, n_u=n_u))
    assert act16.shape == (B, n_u) and std16.shape == (B, n_u)
    assert bool(jnp.all(jnp.isfinite(act16))) and bool(jnp.all(jnp.isfinite(std16)))
    assert jnp.allclose(act16, ref_act, atol=0.1, rtol=0.1)
    assert jnp.allclose(std16, ref_std, atol=0.1, rtol=0.15)

    print("KERNEL_OK")
</pallas_src>

<mosaic_0001>
module attributes {stable_mosaic.version = 11 : i64} {
  func.func @policy_net_kernel(%arg0: i32, %arg1: memref<128x32xf32, #tpu.memory_space<vmem>>, %arg2: memref<32x256xf32, #tpu.memory_space<vmem>>, %arg3: memref<1x256xf32, #tpu.memory_space<vmem>>, %arg4: memref<256x128xf32, #tpu.memory_space<vmem>>, %arg5: memref<1x128xf32, #tpu.memory_space<vmem>>, %arg6: memref<128x8xf32, #tpu.memory_space<vmem>>, %arg7: memref<1x8xf32, #tpu.memory_space<vmem>>, %arg8: memref<128x8xf32, #tpu.memory_space<vmem>>, %arg9: memref<1x8xf32, #tpu.memory_space<vmem>>, %arg10: memref<128x8xf32, #tpu.memory_space<vmem>>, %arg11: memref<128x8xf32, #tpu.memory_space<vmem>>) attributes {dimension_semantics = [#tpu.dimension_semantics<parallel>], iteration_bounds = array<i64: 2>, scalar_prefetch = 0 : i64, scratch_operands = 0 : i64, tpu.core_type = #tpu.core_type<tc>, window_params = [{transform_indices = @transform_0, window_bounds = array<i64: 128, 32>}, {pipeline_mode = #tpu.pipeline_mode<synchronous>, transform_indices = @transform_1, window_bounds = array<i64: 32, 256>}, {pipeline_mode = #tpu.pipeline_mode<synchronous>, transform_indices = @transform_2, window_bounds = array<i64: 1, 256>}, {pipeline_mode = #tpu.pipeline_mode<synchronous>, transform_indices = @transform_3, window_bounds = array<i64: 256, 128>}, {pipeline_mode = #tpu.pipeline_mode<synchronous>, transform_indices = @transform_4, window_bounds = array<i64: 1, 128>}, {pipeline_mode = #tpu.pipeline_mode<synchronous>, transform_indices = @transform_5, window_bounds = array<i64: 128, 8>}, {pipeline_mode = #tpu.pipeline_mode<synchronous>, transform_indices = @transform_6, window_bounds = array<i64: 1, 8>}, {pipeline_mode = #tpu.pipeline_mode<synchronous>, transform_indices = @transform_7, window_bounds = array<i64: 128, 8>}, {pipeline_mode = #tpu.pipeline_mode<synchronous>, transform_indices = @transform_8, window_bounds = array<i64: 1, 8>}, {transform_indices = @transform_9, window_bounds = array<i64: 128, 8>}, {transform_indices = @transform_10, window_bounds = array<i64: 128, 8>}]} {
    %c0 = arith.constant 0 : index
    %c0_0 = arith.constant 0 : index
    %0 = vector.load %arg1[%c0, %c0_0] : memref<128x32xf32, #tpu.memory_space<vmem>>, vector<128x32xf32>
    %c0_1 = arith.constant 0 : index
    %c0_2 = arith.constant 0 : index
    %1 = vector.load %arg2[%c0_1, %c0_2] : memref<32x256xf32, #tpu.memory_space<vmem>>, vector<32x256xf32>
    %cst = arith.constant dense<0.000000e+00> : vector<128x256xf32>
    %2 = tpu.matmul %0, %1, %cst {dimension_numbers = #tpu.dot_dimension_numbers<[1], [0], [0], [1], [0, 0, 1, 1], [], []>} : vector<128x32xf32>, vector<32x256xf32>, vector<128x256xf32> -> vector<128x256xf32>
    %c0_3 = arith.constant 0 : index
    %c0_4 = arith.constant 0 : index
    %3 = vector.load %arg3[%c0_3, %c0_4] : memref<1x256xf32, #tpu.memory_space<vmem>>, vector<1x256xf32>
    %4 = vector.broadcast %3 : vector<1x256xf32> to vector<128x256xf32>
    %5 = arith.addf %2, %4 : vector<128x256xf32>
    %cst_5 = arith.constant dense<0.000000e+00> : vector<128xf32>
    %6 = vector.multi_reduction <add>, %5, %cst_5 [1] : vector<128x256xf32> to vector<128xf32>
    %7 = vector.shape_cast %6 : vector<128xf32> to vector<128x1xf32>
    %cst_6 = arith.constant 2.560000e+02 : f32
    %8 = vector.broadcast %cst_6 : f32 to vector<128x1xf32>
    %9 = arith.divf %7, %8 : vector<128x1xf32>
    %10 = vector.broadcast %9 : vector<128x1xf32> to vector<128x256xf32>
    %11 = arith.subf %5, %10 : vector<128x256xf32>
    %12 = arith.mulf %11, %11 : vector<128x256xf32>
    %cst_7 = arith.constant dense<0.000000e+00> : vector<128xf32>
    %13 = vector.multi_reduction <add>, %12, %cst_7 [1] : vector<128x256xf32> to vector<128xf32>
    %14 = vector.shape_cast %13 : vector<128xf32> to vector<128x1xf32>
    %cst_8 = arith.constant 2.560000e+02 : f32
    %15 = vector.broadcast %cst_8 : f32 to vector<128x1xf32>
    %16 = arith.divf %14, %15 : vector<128x1xf32>
    %cst_9 = arith.constant 9.99999974E-6 : f32
    %17 = vector.broadcast %cst_9 : f32 to vector<128x1xf32>
    %18 = arith.addf %16, %17 : vector<128x1xf32>
    %19 = math.rsqrt %18 : vector<128x1xf32>
    %20 = vector.broadcast %19 : vector<128x1xf32> to vector<128x256xf32>
    %21 = arith.mulf %11, %20 : vector<128x256xf32>
    %cst_10 = arith.constant 5.000000e-01 : f32
    %22 = vector.broadcast %cst_10 : f32 to vector<128x256xf32>
    %23 = arith.mulf %22, %21 : vector<128x256xf32>
    %cst_11 = arith.constant 0.707106769 : f32
    %24 = vector.broadcast %cst_11 : f32 to vector<128x256xf32>
    %25 = arith.mulf %21, %24 : vector<128x256xf32>
    %26 = math.erf %25 : vector<128x256xf32>
    %cst_12 = arith.constant 1.000000e+00 : f32
    %27 = vector.broadcast %cst_12 : f32 to vector<128x256xf32>
    %28 = arith.addf %27, %26 : vector<128x256xf32>
    %29 = arith.mulf %23, %28 : vector<128x256xf32>
    %c0_13 = arith.constant 0 : index
    %c0_14 = arith.constant 0 : index
    %30 = vector.load %arg4[%c0_13, %c0_14] : memref<256x128xf32, #tpu.memory_space<vmem>>, vector<256x128xf32>
    %cst_15 = arith.constant dense<0.000000e+00> : vector<128x128xf32>
    %31 = tpu.matmul %29, %30, %cst_15 {dimension_numbers = #tpu.dot_dimension_numbers<[1], [0], [0], [1], [0, 0, 1, 1], [], []>} : vector<128x256xf32>, vector<256x128xf32>, vector<128x128xf32> -> vector<128x128xf32>
    %c0_16 = arith.constant 0 : index
    %c0_17 = arith.constant 0 : index
    %32 = vector.load %arg5[%c0_16, %c0_17] : memref<1x128xf32, #tpu.memory_space<vmem>>, vector<1x128xf32>
    %33 = vector.broadcast %32 : vector<1x128xf32> to vector<128x128xf32>
    %34 = arith.addf %31, %33 : vector<128x128xf32>
    %cst_18 = arith.constant dense<0.000000e+00> : vector<128xf32>
    %35 = vector.multi_reduction <add>, %34, %cst_18 [1] : vector<128x128xf32> to vector<128xf32>
    %36 = vector.shape_cast %35 : vector<128xf32> to vector<128x1xf32>
    %cst_19 = arith.constant 1.280000e+02 : f32
    %37 = vector.broadcast %cst_19 : f32 to vector<128x1xf32>
    %38 = arith.divf %36, %37 : vector<128x1xf32>
    %39 = vector.broadcast %38 : vector<128x1xf32> to vector<128x128xf32>
    %40 = arith.subf %34, %39 : vector<128x128xf32>
    %41 = arith.mulf %40, %40 : vector<128x128xf32>
    %cst_20 = arith.constant dense<0.000000e+00> : vector<128xf32>
    %42 = vector.multi_reduction <add>, %41, %cst_20 [1] : vector<128x128xf32> to vector<128xf32>
    %43 = vector.shape_cast %42 : vector<128xf32> to vector<128x1xf32>
    %cst_21 = arith.constant 1.280000e+02 : f32
    %44 = vector.broadcast %cst_21 : f32 to vector<128x1xf32>
    %45 = arith.divf %43, %44 : vector<128x1xf32>
    %cst_22 = arith.constant 9.99999974E-6 : f32
    %46 = vector.broadcast %cst_22 : f32 to vector<128x1xf32>
    %47 = arith.addf %45, %46 : vector<128x1xf32>
    %48 = math.rsqrt %47 : vector<128x1xf32>
    %49 = vector.broadcast %48 : vector<128x1xf32> to vector<128x128xf32>
    %50 = arith.mulf %40, %49 : vector<128x128xf32>
    %cst_23 = arith.constant 5.000000e-01 : f32
    %51 = vector.broadcast %cst_23 : f32 to vector<128x128xf32>
    %52 = arith.mulf %51, %50 : vector<128x128xf32>
    %cst_24 = arith.constant 0.707106769 : f32
    %53 = vector.broadcast %cst_24 : f32 to vector<128x128xf32>
    %54 = arith.mulf %50, %53 : vector<128x128xf32>
    %55 = math.erf %54 : vector<128x128xf32>
    %cst_25 = arith.constant 1.000000e+00 : f32
    %56 = vector.broadcast %cst_25 : f32 to vector<128x128xf32>
    %57 = arith.addf %56, %55 : vector<128x128xf32>
    %58 = arith.mulf %52, %57 : vector<128x128xf32>
    %c0_26 = arith.constant 0 : index
    %c0_27 = arith.constant 0 : index
    %59 = vector.load %arg6[%c0_26, %c0_27] : memref<128x8xf32, #tpu.memory_space<vmem>>, vector<128x8xf32>
    %cst_28 = arith.constant dense<0.000000e+00> : vector<128x8xf32>
    %60 = tpu.matmul %58, %59, %cst_28 {dimension_numbers = #tpu.dot_dimension_numbers<[1], [0], [0], [1], [0, 0, 1, 1], [], []>} : vector<128x128xf32>, vector<128x8xf32>, vector<128x8xf32> -> vector<128x8xf32>
    %c0_29 = arith.constant 0 : index
    %c0_30 = arith.constant 0 : index
    %61 = vector.load %arg7[%c0_29, %c0_30] : memref<1x8xf32, #tpu.memory_space<vmem>>, vector<1x8xf32>
    %62 = vector.broadcast %61 : vector<1x8xf32> to vector<128x8xf32>
    %63 = arith.addf %60, %62 : vector<128x8xf32>
    %c0_31 = arith.constant 0 : index
    %c0_32 = arith.constant 0 : index
    %64 = vector.load %arg8[%c0_31, %c0_32] : memref<128x8xf32, #tpu.memory_space<vmem>>, vector<128x8xf32>
    %cst_33 = arith.constant dense<0.000000e+00> : vector<128x8xf32>
    %65 = tpu.matmul %58, %64, %cst_33 {dimension_numbers = #tpu.dot_dimension_numbers<[1], [0], [0], [1], [0, 0, 1, 1], [], []>} : vector<128x128xf32>, vector<128x8xf32>, vector<128x8xf32> -> vector<128x8xf32>
    %c0_34 = arith.constant 0 : index
    %c0_35 = arith.constant 0 : index
    %66 = vector.load %arg9[%c0_34, %c0_35] : memref<1x8xf32, #tpu.memory_space<vmem>>, vector<1x8xf32>
    %67 = vector.broadcast %66 : vector<1x8xf32> to vector<128x8xf32>
    %68 = arith.addf %65, %67 : vector<128x8xf32>
    %69 = math.tanh %63 : vector<128x8xf32>
    %c0_36 = arith.constant 0 : index
    %c0_37 = arith.constant 0 : index
    %70 = vector.load %arg10[%c0_36, %c0_37] : memref<128x8xf32, #tpu.memory_space<vmem>>, vector<128x8xf32>
    tpu.vector_store %arg10[%c0_36, %c0_37], %69 {strides = array<i32>} : memref<128x8xf32, #tpu.memory_space<vmem>>, vector<128x8xf32>,
    %cst_38 = arith.constant -2.000000e+01 : f32
    %cst_39 = arith.constant 2.000000e+00 : f32
    %71 = vector.broadcast %cst_38 : f32 to vector<128x8xf32>
    %72 = arith.maximumf %71, %68 : vector<128x8xf32>
    %73 = vector.broadcast %cst_39 : f32 to vector<128x8xf32>
    %74 = arith.minimumf %73, %72 : vector<128x8xf32>
    %75 = math.exp %74 : vector<128x8xf32>
    %c0_40 = arith.constant 0 : index
    %c0_41 = arith.constant 0 : index
    %76 = vector.load %arg11[%c0_40, %c0_41] : memref<128x8xf32, #tpu.memory_space<vmem>>, vector<128x8xf32>
    tpu.vector_store %arg11[%c0_40, %c0_41], %75 {strides = array<i32>} : memref<128x8xf32, #tpu.memory_space<vmem>>, vector<128x8xf32>,
    return
  }
  func.func @transform_0(%arg0: i32) -> (i32, i32) {
    %c0_i32 = arith.constant 0 : i32
    %c0_i32_0 = arith.constant 0 : i32
    return %arg0, %c0_i32 : i32, i32
  }
  func.func @transform_1(%arg0: i32) -> (i32, i32) {
    %c0_i32 = arith.constant 0 : i32
    %c0_i32_0 = arith.constant 0 : i32
    %c0_i32_1 = arith.constant 0 : i32
    return %c0_i32, %c0_i32_0 : i32, i32
  }
  func.func @transform_2(%arg0: i32) -> (i32, i32) {
    %c0_i32 = arith.constant 0 : i32
    %c0_i32_0 = arith.constant 0 : i32
    %c0_i32_1 = arith.constant 0 : i32
    return %c0_i32, %c0_i32_0 : i32, i32
  }
  func.func @transform_3(%arg0: i32) -> (i32, i32) {
    %c0_i32 = arith.constant 0 : i32
    %c0_i32_0 = arith.constant 0 : i32
    %c0_i32_1 = arith.constant 0 : i32
    return %c0_i32, %c0_i32_0 : i32, i32
  }
  func.func @transform_4(%arg0: i32) -> (i32, i32) {
    %c0_i32 = arith.constant 0 : i32
    %c0_i32_0 = arith.constant 0 : i32
    %c0_i32_1 = arith.constant 0 : i32
    return %c0_i32, %c0_i32_0 : i32, i32
  }
  func.func @transform_5(%arg0: i32) -> (i32, i32) {
    %c0_i32 = arith.constant 0 : i32
    %c0_i32_0 = arith.constant 0 : i32
    %c0_i32_1 = arith.constant 0 : i32
    return %c0_i32, %c0_i32_0 : i32, i32
  }
  func.func @transform_6(%arg0: i32) -> (i32, i32) {
    %c0_i32 = arith.constant 0 : i32
    %c0_i32_0 = arith.constant 0 : i32
    %c0_i32_1 = arith.constant 0 : i32
    return %c0_i32, %c0_i32_0 : i32, i32
  }
  func.func @transform_7(%arg0: i32) -> (i32, i32) {
    %c0_i32 = arith.constant 0 : i32
    %c0_i32_0 = arith.constant 0 : i32
    %c0_i32_1 = arith.constant 0 : i32
    return %c0_i32, %c0_i32_0 : i32, i32
  }
  func.func @transform_8(%arg0: i32) -> (i32, i32) {
    %c0_i32 = arith.constant 0 : i32
    %c0_i32_0 = arith.constant 0 : i32
    %c0_i32_1 = arith.constant 0 : i32
    return %c0_i32, %c0_i32_0 : i32, i32
  }
  func.func @transform_9(%arg0: i32) -> (i32, i32) {
    %c0_i32 = arith.constant 0 : i32
    %c0_i32_0 = arith.constant 0 : i32
    return %arg0, %c0_i32 : i32, i32
  }
  func.func @transform_10(%arg0: i32) -> (i32, i32) {
    %c0_i32 = arith.constant 0 : i32
    %c0_i32_0 = arith.constant 0 : i32
    return %arg0, %c0_i32 : i32, i32
  }
}

</mosaic_0001>

<bundles_post_ra>
// kernel: tpu_custom_call.1
= control target key start
LH: loop header
LB: loop body
LE: loop exit
PB: predicated region body
PF: predicated region fallthrough
CT: control target
= control target key end

     0   :  { %s8384_s0 = inlined_call_operand.vmem [shape: f32[200,32], index: 0, kind: input, shape index: {}]   ;;  %s8385_s1 = inlined_call_operand.vmem [shape: f32[32,256], index: 1, kind: input, shape index: {}]   ;;  %s8386_s2 = inlined_call_operand.vmem [shape: f32[1,256], index: 2, kind: input, shape index: {}]   ;;  %s8387_s3 = inlined_call_operand.vmem [shape: f32[256,128], index: 3, kind: input, shape index: {}]   ;;  %s8388_s4 = inlined_call_operand.vmem [shape: f32[1,128], index: 4, kind: input, shape index: {}]   ;;  %s8389_s5 = inlined_call_operand.vmem [shape: f32[128,8], index: 5, kind: input, shape index: {}]   ;;  %s8390_s6 = inlined_call_operand.vmem [shape: f32[1,8], index: 6, kind: input, shape index: {}]   ;;  %s8391_s7 = inlined_call_operand.vmem [shape: f32[128,8], index: 7, kind: input, shape index: {}]   ;;  %s8392_s8 = inlined_call_operand.vmem [shape: f32[1,8], index: 8, kind: input, shape index: {}]   ;;  %s8393_s9 = inlined_call_operand.vmem [shape: f32[200,8], index: 9, kind: output, shape index: {0}]   ;;  %s8394_s10 = inlined_call_operand.vmem [shape: f32[200,8], index: 10, kind: output, shape index: {1}]  }
   0x1   :  { %8409 = sst [smem:[#allocation18_spill]] %s8384_s0 }
   0x2   :  { %8410 = sst [smem:[#allocation19_spill]] %s8385_s1 }
   0x3   :  { %8411 = sst [smem:[#allocation20_spill]] %s8386_s2 }
   0x4   :  { %s5173_s13 = smov 0   ;;  %s5175_s14 = smov 0  }
   0x5   :  { %s5177_s15 = smov 0  }
   0x6 LB: > { %s5186_s16 = sadd.s32 4294967295, %s5050_s15   ;;  %s5188_s17 = sadd.s32 1, %s5050_s15   ;;  %s5050_s15 = sphi %s5177_s15, %s8512_s15   ;;  %s5046_s14 = sphi %s5175_s14, %s8511_s14   ;;  %s5042_s13 = sphi %s5173_s13, %s8510_s13  }
   0x7   : > { %s219_s18 = ssub.s32 %s5050_s15, %s5188_s17  ;;  %s222_s19 = sadd.s32 1, %s5046_s14 }
   0x8   : > { %p220_p0 = scmp.eq.s32.totalorder %s219_s18, 0  ;;  %p232_p1 = scmp.ne.s32.totalorder %s5046_s14, %s5042_s13 }
   0x9   : > { %p233_p2 = scmp.eq.s32.totalorder %s5186_s16, 1  ;;  %p4429_p3 = scmp.ge.s32.totalorder %s5050_s15, 1 }
   0xa   : > { %s5196_s20 = scalar_select %p220_p0, %s5046_s14, %s222_s19  }
   0xb   : > { %p5198_p4 = por %p233_p2, %p232_p1  ;;  %p324_p5 = scmp.lt.s32.totalorder %s5050_s15, 3 }
   0xd   : > { %p325_p6 = pnand %p4429_p3, %p324_p5 }
   0xf   : > { %328 = sbr.rel (%p325_p6) target bundleno = 1565 (0x61d), region = 56 }
  0x14   : > { %s8413_s1 = sld [smem:[#allocation19_spill]]  ;;  %s5212_s28 = sshll.u32 %s5186_s16, 4  ;;  %vm423_vm0 = vcmask 261120  }
  0x15   : > { %p374_p7 = scmp.lt.s32.totalorder %s5212_s28, 24  ;;  %s8414_s0 = sld [smem:[#allocation18_spill]] }
  0x16   : > { %s8415_s2 = sld [smem:[#allocation20_spill]]  ;;  %s360_s25 = sand.u32 1, %s5042_s13  }
  0x17   : > { %s375_s19 = scalar_select %p374_p7, %s5212_s28, 24 }
  0x18   : > { %s7923_s13 = sshll.u32 %s360_s25, 7  ;;  %s3909_s15 = ssub.s32 (%p5198_p4), 25, %s5212_s28 }
  0x19   : > { %s4433_s26 = sshll.u32 %s375_s19, 3  ;;  %s7978_s27 = scalar_lea.vmem [#allocation3], %s7923_s13  }
  0x1a   : > { %v415_v0 = vld [vmem:[%s8413_s1 + $0x30] sm:$0xff]  ;;  %v416_v1 = vld [vmem:[%s8413_s1 + $0x38] sm:$0xff]  ;;  %v413_v2 = vld [vmem:[%s8413_s1 + $0x20] sm:$0xff]  ;;  %s4546_s18 = sshll.u32 (%p5198_p4), %s5186_s16, 7  ;;  %p3910_p8 = scmp.lt.s32.totalorder (%p5198_p4), %s3909_s15, 16 }
  0x1b   : > { %484 = vmatpush.msra.mxu0 %v415_v0  ;;  %549 = vmatpush.msra.mxu1 %v416_v1  ;;  %v414_v3 = vld [vmem:[%s8413_s1 + $0x28] sm:$0xff]  ;;  %v411_v4 = vld [vmem:[%s8413_s1 + $0x10] sm:$0xff]  ;;  %v412_v5 = vld [vmem:[%s8413_s1 + $0x18] sm:$0xff]  ;;  %s5234_s30 = scalar_lea.vmem %s8414_s0, %s4433_s26  ;;  %s7946_s26 = scalar_lea.vmem [#allocation2], %s7923_s13  }
  0x1c   : > { %4556 = vmatpush.msra.mxu3 %v416_v1  ;;  %4552 = vmatpush.msra.mxu2 %v415_v0  ;;  %v409_v6 = vld [vmem:[%s8413_s1] sm:$0xff]  ;;  %v410_v7 = vld [vmem:[%s8413_s1 + $0x8] sm:$0xff]  ;;  %v395_v10 = vld [vmem:[%s5234_s30 + $0x10] sm:$0xff]  ;;  %s8193_s23 = scalar_lea.vmem (%p5198_p4), %s8393_s9, %s4546_s18  }
  0x1d   : > { %485 = vmatpush.msra.mxu0 %v413_v2  ;;  %550 = vmatpush.msra.mxu1 %v414_v3  ;;  %v393_v8 = vld [vmem:[%s5234_s30] sm:$0xff]  ;;  %v394_v9 = vld [vmem:[%s5234_s30 + $0x8] sm:$0xff]  ;;  %v396_v11 = vld [vmem:[%s5234_s30 + $0x18] sm:$0xff] }
  0x1e   : > { %4557 = vmatpush.msra.mxu3 %v414_v3  ;;  %4553 = vmatpush.msra.mxu2 %v413_v2  ;;  %v397_v12 = vld [vmem:[%s5234_s30 + $0x20] sm:$0xff]  ;;  %v398_v13 = vld [vmem:[%s5234_s30 + $0x28] sm:$0xff]  ;;  %v399_v14 = vld [vmem:[%s5234_s30 + $0x30] sm:$0xff]  ;;  %v5116_v3 = vmov 256.0  }
  0x1f   : > { %486 = vmatpush.msra.mxu0 %v411_v4  ;;  %551 = vmatpush.msra.mxu1 %v412_v5  ;;  %v400_v15 = vld [vmem:[%s5234_s30 + $0x38] sm:$0xff]  ;;  %v401_v16 = vld [vmem:[%s5234_s30 + $0x40] sm:$0xff]  ;;  %v402_v17 = vld [vmem:[%s5234_s30 + $0x48] sm:$0xff]  ;;  %4733 = vrcp.f32 %v5116_v3 }
  0x20   : > { %4558 = vmatpush.msra.mxu3 %v412_v5  ;;  %4554 = vmatpush.msra.mxu2 %v411_v4  ;;  %v403_v18 = vld [vmem:[%s5234_s30 + $0x50] sm:$0xff]  ;;  %v404_v19 = vld [vmem:[%s5234_s30 + $0x58] sm:$0xff]  ;;  %v417_v20 = vld [vmem:[%s8415_s2] sm:$0x3] }
  0x21   : > { %487 = vmatpush.msra.mxu0 %v409_v6  ;;  %552 = vmatpush.msra.mxu1 %v410_v7  ;;  %v5275_v21 = vperm.slane %v417_v20, 0  ;;  %v5277_v22 = vperm.slane %v417_v20, 1  ;;  %v405_v25 = vld [vmem:[%s5234_s30 + $0x60] sm:$0xff]  ;;  %v406_v31 = vld [vmem:[%s5234_s30 + $0x68] sm:$0xff]  ;;  %v407_v37 = vld [vmem:[%s5234_s30 + $0x70] sm:$0xff] }
  0x22   : > { %4434 = vmatmul.msk.f32.vlgmr.msra.gmra.mxu0 %vm423_vm0, %v393_v8  ;;  %4450 = vmatmul.msk.f32.vlgmr.msra.gmra.mxu1 %vm423_vm0, %v393_v8  ;;  %v408_v43 = vld [vmem:[%s5234_s30 + $0x78] sm:$0xff] }
  0x23   : > { %4559 = vmatpush.msra.mxu3 %v410_v7  ;;  %4555 = vmatpush.msra.mxu2 %v409_v6 }
  0x24   : > { %4458 = vmatmul.msk.f32.vlgmr.msra.gmra.mxu3 %vm423_vm0, %v401_v16  ;;  %4443 = vmatmul.msk.f32.vlgmr.msra.gmra.mxu2 %vm423_vm0, %v402_v17 }
  0x25   : > { %v4734_v4 = vpop.eup %4733 }
  0x26   : > { %v651_v5 = vmul.f32 256.0, %v4734_v4  ;;  %vm655_vm1 = vweird.f32 %v4734_v4 }
  0x28   : > { %v652_v6 = vsub.f32 1.0, %v651_v5 }
  0x2a   : > { %4435 = vmatmul.msk.f32.gmra.mxu0 %vm423_vm0, %v394_v9  ;;  %4451 = vmatmul.msk.f32.gmra.mxu1 %vm423_vm0, %v394_v9  ;;  %v653_v7 = vmul.f32 %v4734_v4, %v652_v6 }
  0x2c   : > { %4459 = vmatmul.msk.f32.gmra.mxu3 %vm423_vm0, %v402_v17  ;;  %4444 = vmatmul.msk.f32.gmra.mxu2 %vm423_vm0, %v403_v18  ;;  %v654_v9 = vadd.f32 %v4734_v4, %v653_v7 }
  0x32   : > { %4436 = vmatmul.msk.f32.gmra.mxu0 %vm423_vm0, %v395_v10  ;;  %4452 = vmatmul.msk.f32.gmra.mxu1 %vm423_vm0, %v395_v10  ;;  %v5355_v10 = vsel %vm655_vm1, %v4734_v4, %v654_v9 }
  0x34   : > { %4460 = vmatmul.msk.f32.gmra.mxu3 %vm423_vm0, %v403_v18  ;;  %4445 = vmatmul.msk.f32.gmra.mxu2 %vm423_vm0, %v404_v19 }
  0x3a   : > { %4437 = vmatmul.msk.f32.gmra.mxu0 %vm423_vm0, %v396_v11  ;;  %4453 = vmatmul.msk.f32.gmra.mxu1 %vm423_vm0, %v396_v11 }
  0x3c   : > { %4461 = vmatmul.msk.f32.gmra.mxu3 %vm423_vm0, %v404_v19  ;;  %4446 = vmatmul.msk.f32.gmra.mxu2 %vm423_vm0, %v405_v25 }
  0x42   : > { %4438 = vmatmul.msk.f32.gmra.mxu0 %vm423_vm0, %v397_v12  ;;  %4454 = vmatmul.msk.f32.gmra.mxu1 %vm423_vm0, %v397_v12 }
  0x44   : > { %4462 = vmatmul.msk.f32.gmra.mxu3 %vm423_vm0, %v405_v25  ;;  %4447 = vmatmul.msk.f32.gmra.mxu2 %vm423_vm0, %v406_v31 }
  0x4a   : > { %4439 = vmatmul.msk.f32.gmra.mxu0 %vm423_vm0, %v398_v13  ;;  %4455 = vmatmul.msk.f32.gmra.mxu1 %vm423_vm0, %v398_v13 }
  0x4c   : > { %4463 = vmatmul.msk.f32.gmra.mxu3 %vm423_vm0, %v406_v31  ;;  %4448 = vmatmul.msk.f32.gmra.mxu2 %vm423_vm0, %v407_v37 }
  0x52   : > { %4440 = vmatmul.msk.f32.gmra.mxu0 %vm423_vm0, %v399_v14  ;;  %4456 = vmatmul.msk.f32.gmra.mxu1 %vm423_vm0, %v399_v14 }
  0x54   : > { %4464 = vmatmul.msk.f32.gmra.mxu3 %vm423_vm0, %v407_v37  ;;  %4449 = vmatmul.msk.f32.gmra.mxu2 %vm423_vm0, %v408_v43 }
  0x5a   : > { %4441 = vmatmul.msk.f32.gmra.mxu0 %vm423_vm0, %v400_v15  ;;  %4457 = vmatmul.msk.f32.gmra.mxu1 %vm423_vm0, %v400_v15 }
  0x5c   : > { %4465 = vmatmul.msk.f32.gmra.mxu3 %vm423_vm0, %v408_v43 }
  0x62   : > { %4442 = vmatmul.msk.f32.gmra.mxu0 %vm423_vm0, %v401_v16 }
  0x9f   : > { %v489_v23 = vpop.f32.mrf.mxu0  ;;  %v554_v24 = vpop.f32.mrf.mxu1 }
  0xa0   : > { %v5281_v26 = vadd.f32 %v489_v23, %v5275_v21  ;;  %v5284_v27 = vadd.f32 %v554_v24, %v5277_v22 }
  0xa2   : > { %v602_v28 = vadd.f32 %v5284_v27, %v5281_v26 }
  0xa4   : > { %603 = vadd.xlane.f32.xlu0 %v602_v28 }
  0xa7   : > { %v492_v29 = vpop.f32.mrf.mxu0  ;;  %v557_v30 = vpop.f32.mrf.mxu1 }
  0xa8   : > { %v5292_v32 = vadd.f32 %v492_v29, %v5275_v21  ;;  %v5295_v33 = vadd.f32 %v557_v30, %v5277_v22  ;;  %v578_v8 = vpop.f32.mrf.mxu3  ;;  %v516_v13 = vpop.f32.mrf.mxu2 }
  0xaa   : > { %v605_v34 = vadd.f32 %v5295_v33, %v5292_v32 }
  0xac   : > { %606 = vadd.xlane.f32.xlu0 %v605_v34 }
  0xaf   : > { %v495_v35 = vpop.f32.mrf.mxu0  ;;  %v560_v36 = vpop.f32.mrf.mxu1 }
  0xb0   : > { %v5303_v38 = vadd.f32 %v495_v35, %v5275_v21  ;;  %v5306_v39 = vadd.f32 %v560_v36, %v5277_v22  ;;  %v581_v14 = vpop.f32.mrf.mxu3  ;;  %v519_v29 = vpop.f32.mrf.mxu2 }
  0xb2   : > { %v608_v40 = vadd.f32 %v5306_v39, %v5303_v38 }
  0xb4   : > { %609 = vadd.xlane.f32.xlu1 %v608_v40 }
  0xb7   : > { %v498_v41 = vpop.f32.mrf.mxu0  ;;  %v563_v42 = vpop.f32.mrf.mxu1 }
  0xb8   : > { %v5314_v44 = vadd.f32 %v498_v41, %v5275_v21  ;;  %v5317_v45 = vadd.f32 %v563_v42, %v5277_v22  ;;  %v584_v30 = vpop.f32.mrf.mxu3 }
  0xba   : > { %v611_v46 = vadd.f32 %v5317_v45, %v5314_v44 }
  0xbc   : > { %612 = vadd.xlane.f32.xlu1 %v611_v46 }
  0xbf   : > { %v501_v47 = vpop.f32.mrf.mxu0  ;;  %v566_v48 = vpop.f32.mrf.mxu1 }
  0xc0   : > { %v5324_v49 = vadd.f32 %v501_v47, %v5275_v21  ;;  %v5327_v50 = vadd.f32 %v566_v48, %v5277_v22  ;;  %v522_v48 = vpop.f32.mrf.mxu2 }
  0xc2   : > { %v614_v51 = vadd.f32 %v5327_v50, %v5324_v49 }
  0xc4   : > { %615 = vadd.xlane.f32.xlu2 %v614_v51  ;;  %v587_v51 = vpop.f32.mrf.mxu3 }
  0xc7   : > { %v504_v52 = vpop.f32.mrf.mxu0  ;;  %v569_v53 = vpop.f32.mrf.mxu1 }
  0xc8   : > { %v5332_v54 = vadd.f32 %v504_v52, %v5275_v21  ;;  %v5335_v55 = vadd.f32 %v569_v53, %v5277_v22  ;;  %v525_v3 = vpop.f32.mrf.mxu2 }
  0xca   : > { %v617_v56 = vadd.f32 %v5335_v55, %v5332_v54 }
  0xcc   : > { %618 = vadd.xlane.f32.xlu2 %v617_v56  ;;  %v590_v5 = vpop.f32.mrf.mxu3 }
  0xcf   : > { %v507_v57 = vpop.f32.mrf.mxu0  ;;  %v572_v58 = vpop.f32.mrf.mxu1 }
  0xd0   : > { %v5340_v59 = vadd.f32 %v507_v57, %v5275_v21  ;;  %v5343_v60 = vadd.f32 %v572_v58, %v5277_v22 }
  0xd2   : > { %v620_v61 = vadd.f32 %v5343_v60, %v5340_v59 }
  0xd4   : > { %621 = vadd.xlane.f32.xlu0 %v620_v61 }
  0xd7   : > { %v510_v62 = vpop.f32.mrf.mxu0  ;;  %v575_v63 = vpop.f32.mrf.mxu1 }
  0xd8   : > { %v5348_v0 = vadd.f32 %v510_v62, %v5275_v21  ;;  %v5351_v1 = vadd.f32 %v575_v63, %v5277_v22 }
  0xda   : > { %v623_v2 = vadd.f32 %v5351_v1, %v5348_v0 }
  0xdc   : > { %624 = vadd.xlane.f32.xlu2 %v623_v2 }
  0xdf   : > { %v513_v19 = vpop.f32.mrf.mxu0 }
  0xe0   : > { %v5370_v25 = vadd.f32 %v513_v19, %v5275_v21  ;;  %v593_v19 = vpop.f32.mrf.mxu3 }
 0x117   : > { %v604_v11 = vpop.xlane.xlu0 %603 }
 0x118   : > { %v657_v12 = vmul.f32 %v5355_v10, %v604_v11 }
 0x11a   : > { %v5359_v15 = vsub.f32 %v5281_v26, %v657_v12  ;;  %v5362_v16 = vsub.f32 %v5284_v27, %v657_v12  ;;  %v5373_v26 = vadd.f32 %v578_v8, %v5277_v22 }
 0x11c   : > { %v705_v17 = vmul.f32 %v5359_v15, %v5359_v15  ;;  %v706_v18 = vmul.f32 %v5362_v16, %v5362_v16  ;;  %v626_v31 = vadd.f32 %v5373_v26, %v5370_v25 }
 0x11e   : > { %v737_v20 = vadd.f32 %v706_v18, %v705_v17  ;;  %v528_v18 = vpop.f32.mrf.mxu2 }
 0x11f   : > { %v607_v23 = vpop.xlane.xlu0 %606 }
 0x120   : > { %v658_v24 = vmul.f32 %v5355_v10, %v607_v23  ;;  %738 = vadd.xlane.f32.xlu1 %v737_v20 }
 0x122   : > { %v5376_v27 = vsub.f32 %v5292_v32, %v658_v24  ;;  %v5379_v28 = vsub.f32 %v5295_v33, %v658_v24  ;;  %v5389_v32 = vadd.f32 %v516_v13, %v5275_v21  ;;  %v5392_v33 = vadd.f32 %v581_v14, %v5277_v22 }
 0x124   : > { %v707_v34 = vmul.f32 %v5376_v27, %v5376_v27  ;;  %v708_v35 = vmul.f32 %v5379_v28, %v5379_v28  ;;  %v629_v47 = vadd.f32 %v5392_v33, %v5389_v32 }
 0x126   : > { %v740_v36 = vadd.f32 %v708_v35, %v707_v34 }
 0x127   : > { %v610_v37 = vpop.xlane.xlu1 %609 }
 0x128   : > { %v659_v40 = vmul.f32 %v5355_v10, %v610_v37  ;;  %627 = vadd.xlane.f32.xlu1 %v626_v31  ;;  %741 = vadd.xlane.f32.xlu0 %v740_v36 }
 0x12a   : > { %v5395_v41 = vsub.f32 %v5303_v38, %v659_v40  ;;  %v5398_v42 = vsub.f32 %v5306_v39, %v659_v40  ;;  %v5408_v38 = vadd.f32 %v519_v29, %v5275_v21  ;;  %v5411_v39 = vadd.f32 %v584_v30, %v5277_v22  ;;  %v531_v40 = vpop.f32.mrf.mxu2 }
 0x12c   : > { %v709_v43 = vmul.f32 %v5395_v41, %v5395_v41  ;;  %v710_v46 = vmul.f32 %v5398_v42, %v5398_v42  ;;  %v632_v61 = vadd.f32 %v5411_v39, %v5408_v38 }
 0x12e   : > { %v743_v52 = vadd.f32 %v710_v46, %v709_v43  ;;  %v596_v43 = vpop.f32.mrf.mxu3 }
 0x12f   : > { %v613_v53 = vpop.xlane.xlu1 %612 }
 0x130   : > { %v660_v56 = vmul.f32 %v5355_v10, %v613_v53  ;;  %744 = vadd.xlane.f32.xlu2 %v743_v52  ;;  %630 = vadd.xlane.f32.xlu0 %v629_v47 }
 0x132   : > { %v5414_v57 = vsub.f32 %v5314_v44, %v660_v56  ;;  %v5417_v58 = vsub.f32 %v5317_v45, %v660_v56  ;;  %v5427_v44 = vadd.f32 %v522_v48, %v5275_v21  ;;  %v5430_v45 = vadd.f32 %v587_v51, %v5277_v22 }
 0x134   : > { %v711_v62 = vmul.f32 %v5414_v57, %v5414_v57  ;;  %v712_v63 = vmul.f32 %v5417_v58, %v5417_v58  ;;  %v635_v9 = vadd.f32 %v5430_v45, %v5427_v44 }
 0x136   : > { %v746_v2 = vadd.f32 %v712_v63, %v711_v62 }
 0x137   : > { %v616_v4 = vpop.xlane.xlu2 %615 }
 0x138   : > { %v661_v6 = vmul.f32 %v5355_v10, %v616_v4  ;;  %633 = vadd.xlane.f32.xlu2 %v632_v61  ;;  %747 = vadd.xlane.f32.xlu1 %v746_v2  ;;  %v599_v4 = vpop.f32.mrf.mxu3 }
 0x13a   : > { %v5433_v7 = vsub.f32 %v5324_v49, %v661_v6  ;;  %v5436_v8 = vsub.f32 %v5327_v50, %v661_v6  ;;  %v5446_v49 = vadd.f32 %v525_v3, %v5275_v21  ;;  %v5449_v50 = vadd.f32 %v590_v5, %v5277_v22  ;;  %v534_v3 = vpop.f32.mrf.mxu2 }
 0x13c   : > { %v713_v11 = vmul.f32 %v5433_v7, %v5433_v7  ;;  %v714_v12 = vmul.f32 %v5436_v8, %v5436_v8  ;;  %v638_v30 = vadd.f32 %v5449_v50, %v5446_v49 }
 0x13e   : > { %v749_v13 = vadd.f32 %v714_v12, %v713_v11 }
 0x13f   : > { %v619_v14 = vpop.xlane.xlu2 %618 }
 0x140   : > { %v662_v17 = vmul.f32 %v5355_v10, %v619_v14  ;;  %636 = vadd.xlane.f32.xlu1 %v635_v9  ;;  %750 = vadd.xlane.f32.xlu0 %v749_v13  ;;  %v2448_v9 = vld [vmem:[%s8387_s3 + $0xf8] sm:$0xff]  ;;  %v2446_v14 = vld [vmem:[%s8387_s3 + $0xe8] sm:$0xff] }
 0x141   : > { %2518 = vmatpush.msrb.mxu3 %v2448_v9 }
 0x142   : > { %v5452_v20 = vsub.f32 %v5332_v54, %v662_v17  ;;  %v5455_v23 = vsub.f32 %v5335_v55, %v662_v17  ;;  %v5465_v54 = vadd.f32 %v528_v18, %v5275_v21  ;;  %v5468_v55 = vadd.f32 %v593_v19, %v5277_v22  ;;  %v2431_v17 = vld [vmem:[%s8387_s3 + $0x70] sm:$0xff] }
 0x144   : > { %v715_v24 = vmul.f32 %v5452_v20, %v5452_v20  ;;  %v716_v29 = vmul.f32 %v5455_v23, %v5455_v23  ;;  %v641_v46 = vadd.f32 %v5468_v55, %v5465_v54 }
 0x146   : > { %v752_v31 = vadd.f32 %v716_v29, %v715_v24 }
 0x147   : > { %v622_v34 = vpop.xlane.xlu0 %621 }
 0x148   : > { %v663_v35 = vmul.f32 %v5355_v10, %v622_v34  ;;  %753 = vadd.xlane.f32.xlu2 %v752_v31  ;;  %639 = vadd.xlane.f32.xlu0 %v638_v30 }
 0x14a   : > { %v5471_v36 = vsub.f32 %v5340_v59, %v663_v35  ;;  %v5474_v37 = vsub.f32 %v5343_v60, %v663_v35  ;;  %v5484_v59 = vadd.f32 %v531_v40, %v5275_v21  ;;  %v5487_v60 = vadd.f32 %v596_v43, %v5277_v22  ;;  %v2445_v43 = vld [vmem:[%s8387_s3 + $0xe0] sm:$0xff] }
 0x14c   : > { %v717_v47 = vmul.f32 %v5471_v36, %v5471_v36  ;;  %v718_v48 = vmul.f32 %v5474_v37, %v5474_v37  ;;  %v644_v2 = vadd.f32 %v5487_v60, %v5484_v59 }
 0x14e   : > { %v755_v51 = vadd.f32 %v718_v48, %v717_v47  ;;  %v2444_v47 = vld [vmem:[%s8387_s3 + $0xd8] sm:$0xff]  ;;  %v2429_v48 = vld [vmem:[%s8387_s3 + $0x60] sm:$0xff] }
 0x14f   : > { %v625_v52 = vpop.xlane.xlu2 %624 }
 0x150   : > { %v664_v53 = vmul.f32 %v5355_v10, %v625_v52  ;;  %642 = vadd.xlane.f32.xlu2 %v641_v46  ;;  %756 = vadd.xlane.f32.xlu1 %v755_v51  ;;  %v2430_v46 = vld [vmem:[%s8387_s3 + $0x68] sm:$0xff] }
 0x152   : > { %v5490_v56 = vsub.f32 %v5348_v0, %v664_v53  ;;  %v5493_v61 = vsub.f32 %v5351_v1, %v664_v53  ;;  %v5502_v0 = vadd.f32 %v534_v3, %v5275_v21  ;;  %v5505_v1 = vadd.f32 %v599_v4, %v5277_v22  ;;  %v2447_v21 = vld [vmem:[%s8387_s3 + $0xf0] sm:$0xff]  ;;  %v2432_v22 = vld [vmem:[%s8387_s3 + $0x78] sm:$0xff] }
 0x153   : > { %2519 = vmatpush.msrb.mxu3 %v2447_v21  ;;  %2453 = vmatpush.msrb.mxu2 %v2432_v22  ;;  %v2443_v21 = vld [vmem:[%s8387_s3 + $0xd0] sm:$0xff] }
 0x154   : > { %v719_v62 = vmul.f32 %v5490_v56, %v5490_v56  ;;  %v720_v63 = vmul.f32 %v5493_v61, %v5493_v61  ;;  %v647_v6 = vadd.f32 %v5505_v1, %v5502_v0 }
 0x155   : > { %2520 = vmatpush.msrb.mxu3 %v2446_v14  ;;  %2454 = vmatpush.msrb.mxu2 %v2431_v17  ;;  %v2442_v14 = vld [vmem:[%s8387_s3 + $0xc8] sm:$0xff] }
 0x156   : > { %v758_v5 = vadd.f32 %v720_v63, %v719_v62 }
 0x157   : > { %2521 = vmatpush.msrb.mxu3 %v2445_v43  ;;  %2455 = vmatpush.msrb.mxu2 %v2430_v46 }
 0x158   : > { %759 = vadd.xlane.f32.xlu0 %v758_v5  ;;  %645 = vadd.xlane.f32.xlu1 %v644_v2 }
 0x159   : > { %2522 = vmatpush.msrb.mxu3 %v2444_v47  ;;  %2456 = vmatpush.msrb.mxu2 %v2429_v48  ;;  %v2426_v47 = vld [vmem:[%s8387_s3 + $0x48] sm:$0xff]  ;;  %v2441_v48 = vld [vmem:[%s8387_s3 + $0xc0] sm:$0xff] }
 0x15b   : > { %2523 = vmatpush.msrb.mxu3 %v2443_v21 }
 0x15d   : > { %2524 = vmatpush.msrb.mxu3 %v2442_v14 }
 0x15f   : > { %2525 = vmatpush.msrb.mxu3 %v2441_v48 }
 0x160   : > { %648 = vadd.xlane.f32.xlu0 %v647_v6 }
 0x193   : > { %v739_v11 = vpop.xlane.xlu1 %738 }
 0x194   : > { %v785_v12 = vmul.f32 %v739_v11, %v5355_v10 }
 0x196   : > { %v801_v13 = vadd.f32 1e-05, %v785_v12  ;;  %v2428_v12 = vld [vmem:[%s8387_s3 + $0x58] sm:$0xff] }
 0x197   : > { %2457 = vmatpush.msrb.mxu2 %v2428_v12  ;;  %v2439_v12 = vld [vmem:[%s8387_s3 + $0xb0] sm:$0xff] }
 0x198   : > { %4735 = vrsqrt.f32 %v801_v13  ;;  %vm823_vm3 = vweird.f32 %v801_v13 }
 0x19b   : > { %v628_v18 = vpop.xlane.xlu1 %627  ;;  %v742_v19 = vpop.xlane.xlu0 %741 }
 0x19c   : > { %v665_v24 = vmul.f32 %v5355_v10, %v628_v18  ;;  %v786_v29 = vmul.f32 %v742_v19, %v5355_v10 }
 0x19e   : > { %v4736_v30 = vpop.eup %4735  ;;  %v5528_v31 = vsub.f32 %v5370_v25, %v665_v24  ;;  %v5531_v34 = vsub.f32 %v5373_v26, %v665_v24  ;;  %v5533_v35 = vadd.f32 1e-05, %v786_v29 }
 0x19f   : > { %v818_v40 = vmul.f32 %v4736_v30, %v801_v13  ;;  %vm824_vm2 = vweird.f32 %v4736_v30 }
 0x1a0   : > { %4737 = vrsqrt.f32 %v5533_v35  ;;  %v721_v25 = vmul.f32 %v5528_v31, %v5528_v31  ;;  %v722_v26 = vmul.f32 %v5531_v34, %v5531_v34  ;;  %vm825_vm4 = vmor %vm823_vm3, %vm824_vm2  ;;  %vm833_vm6 = vweird.f32 %v5533_v35 }
 0x1a1   : > { %v819_v51 = vmul.f32 %v4736_v30, %v818_v40 }
 0x1a2   : > { %v761_v52 = vadd.f32 %v722_v26, %v721_v25 }
 0x1a3   : > { %v820_v53 = vmul.f32 0.5, %v819_v51  ;;  %v745_v62 = vpop.xlane.xlu2 %744  ;;  %v631_v63 = vpop.xlane.xlu0 %630  ;;  %v2425_v51 = vld [vmem:[%s8387_s3 + $0x40] sm:$0xff] }
 0x1a4   : > { %v666_v2 = vmul.f32 %v5355_v10, %v631_v63  ;;  %762 = vadd.xlane.f32.xlu2 %v761_v52 }
 0x1a5   : > { %v821_v3 = vsub.f32 1.5, %v820_v53 }
 0x1a6   : > { %v4738_v4 = vpop.eup %4737  ;;  %v5554_v5 = vsub.f32 %v5389_v32, %v666_v2  ;;  %v5557_v6 = vsub.f32 %v5392_v33, %v666_v2  ;;  %v2427_v32 = vld [vmem:[%s8387_s3 + $0x50] sm:$0xff]  ;;  %v787_v33 = vmul.f32 %v745_v62, %v5355_v10 }
 0x1a7   : > { %v822_v9 = vmul.f32 %v4736_v30, %v821_v3  ;;  %v828_v11 = vmul.f32 %v4738_v4, %v5533_v35  ;;  %2458 = vmatpush.msrb.mxu2 %v2427_v32  ;;  %vm834_vm5 = vweird.f32 %v4738_v4  ;;  %v2440_v3 = vld [vmem:[%s8387_s3 + $0xb8] sm:$0xff]  ;;  %v2423_v35 = vld [vmem:[%s8387_s3 + $0x30] sm:$0xff] }
 0x1a8   : > { %8416 = vst [vmem:[#allocation4_spill] sm:$0xff] %v5554_v5  ;;  %v723_v13 = vmul.f32 %v5554_v5, %v5554_v5  ;;  %v724_v22 = vmul.f32 %v5557_v6, %v5557_v6  ;;  %v5586_v25 = vadd.f32 1e-05, %v787_v33  ;;  %2526 = vmatpush.msrb.mxu3 %v2440_v3  ;;  %vm835_vm7 = vmor %vm833_vm6, %vm834_vm5 }
 0x1a9   : > { %8417 = vst [vmem:[#allocation5_spill] sm:$0xff] %v5557_v6  ;;  %v826_v17 = vsel %vm825_vm4, %v4736_v30, %v822_v9  ;;  %v829_v18 = vmul.f32 %v4738_v4, %v828_v11  ;;  %2459 = vmatpush.msrb.mxu2 %v2426_v47  ;;  %v2424_v9 = vld [vmem:[%s8387_s3 + $0x38] sm:$0xff]  ;;  %v2437_v47 = vld [vmem:[%s8387_s3 + $0xa0] sm:$0xff] }
 0x1aa   : > { %v764_v19 = vadd.f32 %v724_v22, %v723_v13  ;;  %v5578_v24 = vmul.f32 %v826_v17, %v5359_v15  ;;  %v5581_v29 = vmul.f32 %v826_v17, %v5362_v16  ;;  %4739 = vrsqrt.f32 %v5586_v25  ;;  %2527 = vmatpush.msrb.mxu3 %v2439_v12  ;;  %v2438_v17 = vld [vmem:[%s8387_s3 + $0xa8] sm:$0xff]  ;;  %v2419_v12 = vld [vmem:[%s8387_s3 + $0x10] sm:$0xff] }
 0x1ab   : > { %v830_v40 = vmul.f32 0.5, %v829_v18  ;;  %v634_v43 = vpop.xlane.xlu2 %633  ;;  %v748_v46 = vpop.xlane.xlu1 %747  ;;  %2460 = vmatpush.msrb.mxu2 %v2425_v51  ;;  %v2422_v18 = vld [vmem:[%s8387_s3 + $0x28] sm:$0xff]  ;;  %vm843_vm8 = vweird.f32 %v5586_v25 }
 0x1ac   : > { %v667_v30 = vmul.f32 %v5355_v10, %v634_v43  ;;  %765 = vadd.xlane.f32.xlu1 %v764_v19  ;;  %v5590_v26 = vmul.f32 0.70710677, %v5578_v24  ;;  %v788_v16 = vmul.f32 %v748_v46, %v5355_v10  ;;  %v5600_v52 = vmul.f32 0.70710677, %v5581_v29  ;;  %2528 = vmatpush.msrb.mxu3 %v2438_v17 }
 0x1ad   : > { %v831_v15 = vsub.f32 1.5, %v830_v40  ;;  %2461 = vmatpush.msrb.mxu2 %v2424_v9  ;;  %v2436_v9 = vld [vmem:[%s8387_s3 + $0x98] sm:$0xff] }
 0x1ae   : > { %v5603_v53 = vsub.f32 %v5408_v38, %v667_v30  ;;  %v5606_v62 = vsub.f32 %v5411_v39, %v667_v30  ;;  %v1073_v63 = vmul.f32 %v5590_v26, %v5590_v26  ;;  %v1113_v38 = vmul.f32 %v5600_v52, %v5600_v52  ;;  %v2421_v30 = vld [vmem:[%s8387_s3 + $0x20] sm:$0xff]  ;;  %2529 = vmatpush.msrb.mxu3 %v2437_v47 }
 0x1af   : > { %v832_v2 = vmul.f32 %v4738_v4, %v831_v15  ;;  %v5633_v32 = vadd.f32 1e-05, %v788_v16  ;;  %2462 = vmatpush.msrb.mxu2 %v2423_v35  ;;  %v2435_v35 = vld [vmem:[%s8387_s3 + $0x90] sm:$0xff] }
 0x1b0   : > { %8418 = vst [vmem:[#allocation6_spill] sm:$0xff] %v5603_v53  ;;  %v725_v39 = vmul.f32 %v5603_v53, %v5603_v53  ;;  %v726_v11 = vmul.f32 %v5606_v62, %v5606_v62  ;;  %v5631_v21 = vmin.f32 %v1073_v63, 16.0  ;;  %v5644_v40 = vmin.f32 %v1113_v38, 16.0  ;;  %v5659_v48 = vpop.eup %4739  ;;  %2530 = vmatpush.msrb.mxu3 %v2436_v9 }
 0x1b1   : > { %8419 = vst [vmem:[#allocation7_spill] sm:$0xff] %v5606_v62  ;;  %v5635_v13 = vsel %vm835_vm7, %v4738_v4, %v832_v2  ;;  %2463 = vmatpush.msrb.mxu2 %v2422_v18  ;;  %4741 = vrsqrt.f32 %v5633_v32  ;;  %vm844_vm9 = vweird.f32 %v5659_v48  ;;  %vm853_vm15 = vweird.f32 %v5633_v32 }
 0x1b2   : > { %v767_v33 = vadd.f32 %v726_v11, %v725_v39  ;;  %v1075_v19 = vmul.f32 2.1237322e-06, %v5631_v21  ;;  %v1086_v4 = vmul.f32 3.8918573e-05, %v5631_v21  ;;  %v5657_v16 = vmul.f32 %v5635_v13, %v5376_v27  ;;  %v2420_v27 = vld [vmem:[%s8387_s3 + $0x18] sm:$0xff]  ;;  %2531 = vmatpush.msrb.mxu3 %v2435_v35  ;;  %vm845_vm10 = vmor %vm843_vm8, %vm844_vm9 }
 0x1b3   : > { %v637_v22 = vpop.xlane.xlu1 %636  ;;  %v751_v14 = vpop.xlane.xlu0 %750  ;;  %2464 = vmatpush.msrb.mxu2 %v2421_v30  ;;  %v838_v11 = vmul.f32 %v5659_v48, %v5586_v25  ;;  %v1126_v17 = vmul.f32 3.8918573e-05, %v5644_v40 }
 0x1b4   : > { %v668_v43 = vmul.f32 %v5355_v10, %v637_v22  ;;  %v789_v46 = vmul.f32 %v751_v14, %v5355_v10  ;;  %768 = vadd.xlane.f32.xlu2 %v767_v33  ;;  %v1076_v15 = vadd.f32 0.00028619796, %v1075_v19  ;;  %v1087_v3 = vadd.f32 0.001143296, %v1086_v4  ;;  %v2434_v4 = vld [vmem:[%s8387_s3 + $0x88] sm:$0xff] }
 0x1b5   : > { %2465 = vmatpush.msrb.mxu2 %v2420_v27  ;;  %v5694_v18 = vmul.f32 0.70710677, %v5657_v16  ;;  %2532 = vmatpush.msrb.mxu3 %v2434_v4 }
 0x1b6   : > { %v5662_v51 = vsub.f32 %v5427_v44, %v668_v43  ;;  %v5665_v63 = vsub.f32 %v5430_v45, %v668_v43  ;;  %v5667_v2 = vadd.f32 1e-05, %v789_v46  ;;  %v1077_v44 = vmul.f32 %v1076_v15, %v5631_v21  ;;  %v2418_v46 = vld [vmem:[%s8387_s3 + $0x8] sm:$0xff] }
 0x1b7   : > { %v1115_v45 = vmul.f32 2.1237322e-06, %v5644_v40  ;;  %v1088_v22 = vmul.f32 %v1087_v3, %v5631_v21  ;;  %2466 = vmatpush.msrb.mxu2 %v2419_v12  ;;  %v5705_v9 = vpop.eup %4741  ;;  %v1127_v12 = vadd.f32 0.001143296, %v1126_v17 }
 0x1b8   : > { %8420 = vst [vmem:[#allocation8_spill] sm:$0xff] %v5662_v51  ;;  %4743 = vrsqrt.f32 %v5667_v2  ;;  %v727_v38 = vmul.f32 %v5662_v51, %v5662_v51  ;;  %v728_v39 = vmul.f32 %v5665_v63, %v5665_v63  ;;  %v1078_v33 = vadd.f32 0.0036580483, %v1077_v44 }
 0x1b9   : > { %8421 = vst [vmem:[#allocation9_spill] sm:$0xff] %v5665_v63  ;;  %v1089_v30 = vadd.f32 0.014752088, %v1088_v22  ;;  %v1116_v15 = vadd.f32 0.00028619796, %v1115_v45  ;;  %v839_v44 = vmul.f32 %v5659_v48, %v838_v11  ;;  %2467 = vmatpush.msrb.mxu2 %v2418_v46  ;;  %v848_v17 = vmul.f32 %v5705_v9, %v5633_v32 }
 0x1ba   : > { %v770_v14 = vadd.f32 %v728_v39, %v727_v38  ;;  %v1079_v47 = vmul.f32 %v1078_v33, %v5631_v21  ;;  %v2417_v38 = vld [vmem:[%s8387_s3] sm:$0xff]  ;;  %vm854_vm12 = vweird.f32 %v5705_v9 }
 0x1bb   : > { %v754_v19 = vpop.xlane.xlu2 %753  ;;  %v640_v43 = vpop.xlane.xlu0 %639  ;;  %v2433_v39 = vld [vmem:[%s8387_s3 + $0x80] sm:$0xff]  ;;  %v1090_v45 = vmul.f32 %v1089_v30, %v5631_v21  ;;  %2468 = vmatpush.msrb.mxu2 %v2417_v38  ;;  %v840_v46 = vmul.f32 0.5, %v839_v44  ;;  %v5746_v44 = vmul.f32 0.5, %v5581_v29  ;;  %vm855_vm3 = vmor %vm853_vm15, %vm854_vm12 }
 0x1bc   : > { %v790_v3 = vmul.f32 %v754_v19, %v5355_v10  ;;  %v669_v27 = vmul.f32 %v5355_v10, %v640_v43  ;;  %771 = vadd.xlane.f32.xlu0 %v770_v14  ;;  %2533 = vmatpush.msrb.mxu3 %v2433_v39  ;;  %v1153_v14 = vmul.f32 %v5694_v18, %v5694_v18  ;;  %v1080_v19 = vadd.f32 0.05243302, %v1079_v47 }
 0x1bd   : > { %v1117_v43 = vmul.f32 %v1116_v15, %v5644_v40  ;;  %v1091_v30 = vadd.f32 0.112945676, %v1090_v45  ;;  %v5738_v47 = vmul.f32 0.5, %v5578_v24  ;;  %v1128_v15 = vmul.f32 %v1127_v12, %v5644_v40 }
 0x1be   : > { %v5715_v35 = vpop.eup %4743  ;;  %v5717_v33 = vadd.f32 1e-05, %v790_v3  ;;  %v5720_v22 = vsub.f32 %v5446_v49, %v669_v27  ;;  %v5723_v11 = vsub.f32 %v5449_v50, %v669_v27  ;;  %v5741_v27 = vmin.f32 %v1153_v14, 16.0 }
 0x1bf   : > { %v858_v4 = vmul.f32 %v5715_v35, %v5667_v2  ;;  %v1092_v63 = vmul.f32 %v1091_v30, %v5631_v21  ;;  %v849_v45 = vmul.f32 %v5705_v9, %v848_v17  ;;  %v1129_v12 = vadd.f32 0.014752088, %v1128_v15 }
 0x1c0   : > { %8422 = vst [vmem:[#allocation10_spill] sm:$0xff] %v5720_v22  ;;  %4745 = vrsqrt.f32 %v5717_v33  ;;  %v729_v49 = vmul.f32 %v5720_v22, %v5720_v22  ;;  %v730_v50 = vmul.f32 %v5723_v11, %v5723_v11  ;;  %v1081_v22 = vmul.f32 %v1080_v19, %v5631_v21 }
 0x1c1   : > { %8423 = vst [vmem:[#allocation11_spill] sm:$0xff] %v5723_v11  ;;  %v1118_v11 = vadd.f32 0.0036580483, %v1117_v43  ;;  %v841_v14 = vsub.f32 1.5, %v840_v46  ;;  %v1093_v51 = vadd.f32 0.4994258, %v1092_v63  ;;  %v980_v19 = vmul.f32 %v5635_v13, %v5379_v28 }
 0x1c2   : > { %v773_v3 = vadd.f32 %v730_v50, %v729_v49  ;;  %v859_v50 = vmul.f32 %v5715_v35, %v858_v4  ;;  %v1130_v17 = vmul.f32 %v1129_v12, %v5644_v40  ;;  %v1082_v28 = vadd.f32 0.18741608, %v1081_v22 }
 0x1c3   : > { %v643_v38 = vpop.xlane.xlu2 %642  ;;  %v757_v39 = vpop.xlane.xlu1 %756  ;;  %v1119_v13 = vmul.f32 %v1118_v11, %v5644_v40  ;;  %v850_v46 = vmul.f32 0.5, %v849_v45  ;;  %v842_v12 = vmul.f32 %v5659_v48, %v841_v14  ;;  %v1166_v11 = vmul.f32 3.8918573e-05, %v5741_v27 }
 0x1c4   : > { %v670_v49 = vmul.f32 %v5355_v10, %v643_v38  ;;  %v791_v24 = vmul.f32 %v757_v39, %v5355_v10  ;;  %774 = vadd.xlane.f32.xlu1 %v773_v3  ;;  %v1155_v3 = vmul.f32 2.1237322e-06, %v5741_v27  ;;  %v860_v15 = vmul.f32 0.5, %v859_v50 }
 0x1c5   : > { %v1094_v38 = vmul.f32 %v1093_v51, %v5631_v21  ;;  %v1131_v39 = vadd.f32 0.112945676, %v1130_v17  ;;  %v1120_v50 = vadd.f32 0.05243302, %v1119_v13  ;;  %v5821_v25 = vsel %vm845_vm10, %v5659_v48, %v842_v12 }
 0x1c6   : > { %v5754_v30 = vpop.eup %4745  ;;  %v5757_v29 = vsub.f32 %v5465_v54, %v670_v49  ;;  %v5760_v43 = vsub.f32 %v5468_v55, %v670_v49  ;;  %v5769_v54 = vadd.f32 1e-05, %v791_v24  ;;  %v5776_v49 = vmul.f32 0.70710677, %v980_v19 }
 0x1c7   : > { %v868_v63 = vmul.f32 %v5754_v30, %v5717_v33  ;;  %v1156_v62 = vadd.f32 0.00028619796, %v1155_v3  ;;  %v5782_v6 = vadd.f32 1.0, %v1094_v38  ;;  %v861_v17 = vsub.f32 1.5, %v860_v15 }
 0x1c8   : > { %8424 = vst [vmem:[#allocation12_spill] sm:$0xff] %v5757_v29  ;;  %v731_v55 = vmul.f32 %v5757_v29, %v5757_v29  ;;  %v732_v4 = vmul.f32 %v5760_v43, %v5760_v43  ;;  %v1083_v29 = vmul.f32 %v1082_v28, %v5631_v21  ;;  %4747 = vrsqrt.f32 %v5769_v54 }
 0x1c9   : > { %8425 = vst [vmem:[#allocation13_spill] sm:$0xff] %v5760_v43  ;;  %v869_v45 = vmul.f32 %v5754_v30, %v868_v63  ;;  %v851_v43 = vsub.f32 1.5, %v850_v46  ;;  %4749 = vrcp.f32 %v5782_v6  ;;  %v1132_v3 = vmul.f32 %v1131_v39, %v5644_v40 }
 0x1ca   : > { %v776_v22 = vadd.f32 %v732_v4, %v731_v55  ;;  %v1193_v63 = vmul.f32 %v5776_v49, %v5776_v49  ;;  %v1157_v13 = vmul.f32 %v1156_v62, %v5741_v27  ;;  %v1167_v46 = vadd.f32 0.001143296, %v1166_v11 }
 0x1cb   : > { %v646_v24 = vpop.xlane.xlu1 %645  ;;  %v760_v53 = vpop.xlane.xlu0 %759  ;;  %v870_v55 = vmul.f32 0.5, %v869_v45  ;;  %v1121_v4 = vmul.f32 %v1120_v50, %v5644_v40  ;;  %v5800_v15 = vmul.f32 0.5, %v5657_v16  ;;  %v5812_v38 = vmul.f32 0.5, %v980_v19 }
 0x1cc   : > { %v671_v51 = vmul.f32 %v5355_v10, %v646_v24  ;;  %v792_v14 = vmul.f32 %v760_v53, %v5355_v10  ;;  %777 = vadd.xlane.f32.xlu2 %v776_v22  ;;  %v1084_v53 = vadd.f32 1.1283791, %v1083_v29  ;;  %v5815_v29 = vmul.f32 %v5705_v9, %v851_v43 }
 0x1cd   : > { %v5818_v16 = vmul.f32 %v5715_v35, %v861_v17  ;;  %v1133_v39 = vadd.f32 0.4994258, %v1132_v3  ;;  %v1158_v45 = vadd.f32 0.0036580483, %v1157_v13  ;;  %v1168_v24 = vmul.f32 %v1167_v46, %v5741_v27 }
 0x1ce   : > { %v5792_v21 = vsub.f32 %v5484_v59, %v671_v51  ;;  %v5795_v28 = vsub.f32 %v5487_v60, %v671_v51  ;;  %v5806_v59 = vadd.f32 1e-05, %v792_v14  ;;  %v5823_v22 = vpop.eup %4747  ;;  %v5826_v50 = vmin.f32 %v1193_v63, 16.0 }
 0x1cf   : > { %v4750_v19 = vpop.eup %4749  ;;  %v871_v51 = vsub.f32 1.5, %v870_v55  ;;  %v1085_v43 = vmul.f32 %v1084_v53, %v5590_v26  ;;  %v1134_v17 = vmul.f32 %v1133_v39, %v5644_v40  ;;  %v1159_v3 = vmul.f32 %v1158_v45, %v5741_v27 }
 0x1d0   : > { %8426 = vst [vmem:[#allocation14_spill] sm:$0xff] %v5792_v21  ;;  %v733_v60 = vmul.f32 %v5792_v21, %v5792_v21  ;;  %v734_v62 = vmul.f32 %v5795_v28, %v5795_v28  ;;  %4751 = vrsqrt.f32 %v5806_v59  ;;  %v1097_v12 = vmul.f32 %v4750_v19, %v5782_v6 }
 0x1d1   : > { %8427 = vst [vmem:[#allocation15_spill] sm:$0xff] %v5795_v28  ;;  %v1122_v28 = vadd.f32 0.18741608, %v1121_v4  ;;  %v878_v63 = vmul.f32 %v5823_v22, %v5769_v54  ;;  %v1105_v13 = vand.u32 2147483647, %v5782_v6  ;;  %v5837_v46 = vadd.f32 1.0, %v1134_v17 }
 0x1d2   : > { %v779_v11 = vadd.f32 %v734_v62, %v733_v60  ;;  %v1169_v26 = vadd.f32 0.014752088, %v1168_v24  ;;  %v1098_v4 = vsub.f32 1.0, %v1097_v12  ;;  %v1195_v60 = vmul.f32 2.1237322e-06, %v5826_v50 }
 0x1d3   : > { %v649_v14 = vpop.xlane.xlu0 %648  ;;  %v1107_v62 = vand.u32 2147483648, %v5782_v6  ;;  %v1123_v39 = vmul.f32 %v1122_v28, %v5644_v40  ;;  %4753 = vrcp.f32 %v5837_v46  ;;  %vm1102_vm11 = vweird.f32 %v4750_v19 }
 0x1d4   : > { %v672_v48 = vmul.f32 %v5355_v10, %v649_v14  ;;  %780 = vadd.xlane.f32.xlu0 %v779_v11  ;;  %v1160_v11 = vadd.f32 0.05243302, %v1159_v3  ;;  %v1099_v24 = vmul.f32 %v4750_v19, %v1098_v4  ;;  %v879_v14 = vmul.f32 %v5823_v22, %v878_v63 }
 0x1d5   : > { %vm1101_vm13 = vweird.f32 %v5782_v6  ;;  %vm5859_vm14 = vcmp.eq.f32.partialorder %v1105_v13, 8.507059e+37  ;;  %v1170_v12 = vmul.f32 %v1169_v26, %v5741_v27  ;;  %v1196_v3 = vadd.f32 0.00028619796, %v1195_v60 }
 0x1d6   : > { %v5840_v55 = vsub.f32 %v5502_v0, %v672_v48  ;;  %v5843_v53 = vsub.f32 %v5505_v1, %v672_v48  ;;  %v5855_v1 = vmul.f32 %v5754_v30, %v871_v51  ;;  %v5863_v28 = vpop.eup %4751  ;;  %v1100_v48 = vadd.f32 %v4750_v19, %v1099_v24  ;;  %vm1103_vm0 = vmor %vm1101_vm13, %vm1102_vm11 }
 0x1d7   : > { %v1108_v51 = vor.u32 1.1754944e-38, %v1107_v62  ;;  %v1124_v4 = vadd.f32 1.1283791, %v1123_v39  ;;  %v1161_v63 = vmul.f32 %v1160_v11, %v5741_v27  ;;  %v981_v6 = vmul.f32 %v5821_v25, %v5395_v41 }
 0x1d8   : > { %8428 = vst [vmem:[#allocation16_spill] sm:$0xff] %v5840_v55  ;;  %v735_v45 = vmul.f32 %v5840_v55, %v5840_v55  ;;  %v736_v0 = vmul.f32 %v5843_v53, %v5843_v53  ;;  %v1104_v13 = vsel %vm1103_vm0, %v4750_v19, %v1100_v48  ;;  %v1197_v55 = vmul.f32 %v1196_v3, %v5826_v50 }
 0x1d9   : > { %8429 = vst [vmem:[#allocation17_spill] sm:$0xff] %v5843_v53  ;;  %v1171_v53 = vadd.f32 0.112945676, %v1170_v12  ;;  %v5872_v26 = vmul.f32 0.5, %v879_v14  ;;  %v888_v60 = vmul.f32 %v5863_v28, %v5806_v59  ;;  %v1109_v62 = vsel %vm5859_vm14, %v1108_v51, %v1104_v13 }
 0x1da   : > { %v782_v17 = vadd.f32 %v736_v0, %v735_v45  ;;  %v1206_v45 = vmul.f32 3.8918573e-05, %v5826_v50  ;;  %v4754_v0 = vpop.eup %4753  ;;  %v1145_v39 = vand.u32 2147483647, %v5837_v46  ;;  %v1110_v11 = vmul.f32 %v1109_v62, %v1085_v43 }
 0x1db   : > { %v1137_v41 = vmul.f32 %v4754_v0, %v5837_v46  ;;  %v1147_v19 = vand.u32 2147483648, %v5837_v46  ;;  %v1172_v24 = vmul.f32 %v1171_v53, %v5741_v27  ;;  %vm1141_vm1 = vweird.f32 %v5837_v46 }
 0x1dc   : > { %783 = vadd.xlane.f32.xlu1 %v782_v17  ;;  %v1162_v17 = vadd.f32 0.18741608, %v1161_v63  ;;  %v1198_v14 = vadd.f32 0.0036580483, %v1197_v55  ;;  %v1207_v48 = vadd.f32 0.001143296, %v1206_v45  ;;  %vm1142_vm2 = vweird.f32 %v4754_v0 }
 0x1dd   : > { %v4466_v12 = vclamps-f32 %v1110_v11, 1.0  ;;  %v1138_v3 = vsub.f32 1.0, %v1137_v41  ;;  %v1173_v21 = vadd.f32 0.4994258, %v1172_v24  ;;  %v5883_v5 = vmul.f32 0.70710677, %v981_v6  ;;  %vm1143_vm4 = vmor %vm1141_vm1, %vm1142_vm2 }
 0x1de   : > { %v1199_v40 = vmul.f32 %v1198_v14, %v5826_v50  ;;  %v1208_v43 = vmul.f32 %v1207_v48, %v5826_v50  ;;  %v5889_v51 = vmul.f32 %v5821_v25, %v5398_v42  ;;  %v889_v45 = vmul.f32 %v5863_v28, %v888_v60 }
 0x1df   : > { %v2353_v53 = vadd.f32 1.0, %v4466_v12  ;;  %v1139_v13 = vmul.f32 %v4754_v0, %v1138_v3  ;;  %v1174_v63 = vmul.f32 %v1173_v21, %v5741_v27  ;;  %v1233_v55 = vmul.f32 %v5883_v5, %v5883_v5 }
 0x1e0   : > { %v1163_v62 = vmul.f32 %v1162_v17, %v5741_v27  ;;  %v1200_v11 = vadd.f32 0.05243302, %v1199_v40  ;;  %v1209_v41 = vadd.f32 0.014752088, %v1208_v43  ;;  %v1148_v60 = vor.u32 1.1754944e-38, %v1147_v19 }
 0x1e1   : > { %v2385_v42 = vmul.f32 %v2353_v53, %v5738_v47  ;;  %v1140_v25 = vadd.f32 %v4754_v0, %v1139_v13  ;;  %v5901_v24 = vadd.f32 1.0, %v1174_v63  ;;  %v5903_v21 = vmin.f32 %v1233_v55, 16.0 }
 0x1e2   : > { %v1210_v27 = vmul.f32 %v1209_v41, %v5826_v50  ;;  %v5910_v17 = vmul.f32 0.70710677, %v5889_v51  ;;  %v5914_v32 = vsel %vm855_vm3, %v5705_v9, %v5815_v29  ;;  %v1125_v47 = vmul.f32 %v1124_v4, %v5600_v52 }
 0x1e3   : > { %2469 = vmatmul.f32.vlgmr.msrb.gmra.mxu2 %v2385_v42  ;;  %v1144_v14 = vsel %vm1143_vm4, %v4754_v0, %v1140_v25  ;;  %vm1146_vm5 = vcmp.eq.f32.partialorder %v1145_v39, 8.507059e+37  ;;  %4755 = vrcp.f32 %v5901_v24  ;;  %v1164_v46 = vadd.f32 1.1283791, %v1163_v62 }
 0x1e4   : > { %v1149_v48 = vsel %vm1146_vm5, %v1148_v60, %v1144_v14  ;;  %v1201_v19 = vmul.f32 %v1200_v11, %v5826_v50  ;;  %v1211_v12 = vadd.f32 0.112945676, %v1210_v27  ;;  %v1235_v40 = vmul.f32 2.1237322e-06, %v5903_v21 }
 0x1e5   : > { %v1150_v3 = vmul.f32 %v1149_v48, %v1125_v47  ;;  %v1246_v43 = vmul.f32 3.8918573e-05, %v5903_v21  ;;  %v5923_v9 = vmul.f32 %v5914_v32, %v5414_v57  ;;  %v881_v52 = vsub.f32 1.5, %v5872_v26 }
 0x1e6   : > { %v5926_v29 = vmul.f32 0.5, %v889_v45  ;;  %v1212_v4 = vmul.f32 %v1211_v12, %v5826_v50  ;;  %v1273_v0 = vmul.f32 %v5910_v17, %v5910_v17  ;;  %v5931_v53 = vmul.f32 0.5, %v981_v6 }
 0x1e7   : > { %v4467_v39 = vclamps-f32 %v1150_v3, 1.0  ;;  %v1236_v13 = vadd.f32 0.00028619796, %v1235_v40  ;;  %v1247_v63 = vadd.f32 0.001143296, %v1246_v43  ;;  %v1165_v55 = vmul.f32 %v1164_v46, %v5694_v18 }
 0x1e8   : > { %v1202_v62 = vadd.f32 0.18741608, %v1201_v19  ;;  %v1213_v11 = vadd.f32 0.4994258, %v1212_v4  ;;  %v5934_v57 = vmin.f32 %v1273_v0, 16.0  ;;  %v1187_v47 = vand.u32 2147483648, %v5901_v24 }
 0x1e9   : > { %v4756_v41 = vpop.eup %4755  ;;  %v2354_v42 = vadd.f32 1.0, %v4467_v39  ;;  %v1237_v45 = vmul.f32 %v1236_v13, %v5903_v21  ;;  %v1248_v25 = vmul.f32 %v1247_v63, %v5903_v21  ;;  %v5939_v60 = vmul.f32 0.70710677, %v5923_v9 }
 0x1ea   : > { %v1177_v6 = vmul.f32 %v4756_v41, %v5901_v24  ;;  %v1185_v27 = vand.u32 2147483647, %v5901_v24  ;;  %v1214_v18 = vmul.f32 %v1213_v11, %v5826_v50  ;;  %v1275_v19 = vmul.f32 2.1237322e-06, %v5934_v57 }
 0x1eb   : > { %v2386_v14 = vmul.f32 %v2354_v42, %v5746_v44  ;;  %v1238_v48 = vadd.f32 0.0036580483, %v1237_v45  ;;  %v1249_v46 = vadd.f32 0.014752088, %v1248_v25  ;;  %v1286_v40 = vmul.f32 3.8918573e-05, %v5934_v57 }
 0x1ec   : > { %v1178_v12 = vsub.f32 1.0, %v1177_v6  ;;  %v5947_v3 = vadd.f32 1.0, %v1214_v18  ;;  %v1313_v43 = vmul.f32 %v5939_v60, %v5939_v60  ;;  %v1203_v4 = vmul.f32 %v1202_v62, %v5826_v50 }
 0x1ed   : > { %2534 = vmatmul.f32.vlgmr.msrb.gmra.mxu3 %v2386_v14  ;;  %v1239_v0 = vmul.f32 %v1238_v48, %v5903_v21  ;;  %v1250_v39 = vmul.f32 %v1249_v46, %v5903_v21  ;;  %v1276_v44 = vadd.f32 0.00028619796, %v1275_v19  ;;  %vm1181_vm6 = vweird.f32 %v5901_v24 }
 0x1ee   : > { %v1179_v13 = vmul.f32 %v4756_v41, %v1178_v12  ;;  %vm1182_vm7 = vweird.f32 %v4756_v41  ;;  %4757 = vrcp.f32 %v5947_v3  ;;  %vm5957_vm8 = vcmp.eq.f32.partialorder %v1185_v27, 8.507059e+37 }
 0x1ef   : > { %v1240_v11 = vadd.f32 0.05243302, %v1239_v0  ;;  %v1251_v42 = vadd.f32 0.112945676, %v1250_v39  ;;  %v1277_v45 = vmul.f32 %v1276_v44, %v5934_v57  ;;  %v1188_v62 = vor.u32 1.1754944e-38, %v1187_v47  ;;  %vm1183_vm9 = vmor %vm1181_vm6, %vm1182_vm7 }
 0x1f0   : > { %v1180_v50 = vadd.f32 %v4756_v41, %v1179_v13  ;;  %v1287_v25 = vadd.f32 0.001143296, %v1286_v40  ;;  %v5962_v6 = vmin.f32 %v1313_v43, 16.0  ;;  %v1204_v18 = vadd.f32 1.1283791, %v1203_v4 }
 0x1f1   : > { %v1241_v24 = vmul.f32 %v1240_v11, %v5903_v21  ;;  %v1252_v14 = vmul.f32 %v1251_v42, %v5903_v21  ;;  %v1278_v48 = vadd.f32 0.0036580483, %v1277_v45  ;;  %vm864_vm10 = vweird.f32 %v5715_v35 }
 0x1f2   : > { %v1184_v27 = vsel %vm1183_vm9, %v4756_v41, %v1180_v50  ;;  %v1288_v46 = vmul.f32 %v1287_v25, %v5934_v57  ;;  %v1315_v19 = vmul.f32 2.1237322e-06, %v5962_v6  ;;  %v1326_v12 = vmul.f32 3.8918573e-05, %v5962_v6 }
 0x1f3   : > { %v1189_v47 = vsel %vm5957_vm8, %v1188_v62, %v1184_v27  ;;  %v1242_v40 = vadd.f32 0.18741608, %v1241_v24  ;;  %v1253_v43 = vadd.f32 0.4994258, %v1252_v14  ;;  %v1279_v0 = vmul.f32 %v1278_v48, %v5934_v57 }
 0x1f4   : > { %v4758_v4 = vpop.eup %4757  ;;  %v1190_v39 = vmul.f32 %v1189_v47, %v1165_v55  ;;  %v1289_v44 = vadd.f32 0.014752088, %v1288_v46  ;;  %v1316_v13 = vadd.f32 0.00028619796, %v1315_v19  ;;  %v1327_v41 = vadd.f32 0.001143296, %v1326_v12 }
 0x1f5   : > { %v1217_v11 = vmul.f32 %v4758_v4, %v5947_v3  ;;  %v1243_v42 = vmul.f32 %v1242_v40, %v5903_v21  ;;  %v1254_v45 = vmul.f32 %v1253_v43, %v5903_v21  ;;  %v5978_v63 = vmul.f32 %v5914_v32, %v5417_v58 }
 0x1f6   : > { %vm863_vm11 = vweird.f32 %v5667_v2  ;;  %v4468_v50 = vclamps-f32 %v1190_v39, 1.0  ;;  %v1280_v62 = vadd.f32 0.05243302, %v1279_v0  ;;  %v1290_v25 = vmul.f32 %v1289_v44, %v5934_v57 }
 0x1f7   : > { %v1317_v55 = vmul.f32 %v1316_v13, %v5962_v6  ;;  %v1218_v24 = vsub.f32 1.0, %v1217_v11  ;;  %v1225_v14 = vand.u32 2147483647, %v5947_v3  ;;  %v5984_v48 = vadd.f32 1.0, %v1254_v45  ;;  %vm865_vm0 = vmor %vm863_vm11, %vm864_vm10 }
 0x1f8   : > { %v1328_v27 = vmul.f32 %v1327_v41, %v5962_v6  ;;  %v2355_v21 = vadd.f32 1.0, %v4468_v50  ;;  %v1227_v46 = vand.u32 2147483648, %v5947_v3  ;;  %v1291_v58 = vadd.f32 0.112945676, %v1290_v25 }
 0x1f9   : > { %v1318_v32 = vadd.f32 0.0036580483, %v1317_v55  ;;  %v1219_v19 = vmul.f32 %v4758_v4, %v1218_v24  ;;  %vm1222_vm12 = vweird.f32 %v4758_v4  ;;  %4759 = vrcp.f32 %v5984_v48 }
 0x1fa   : > { %v5990_v12 = vmul.f32 0.5, %v5889_v51  ;;  %v2387_v47 = vmul.f32 %v2355_v21, %v5800_v15  ;;  %vm1221_vm13 = vweird.f32 %v5947_v3  ;;  %v1244_v40 = vadd.f32 1.1283791, %v1243_v42 }
 0x1fb   : > { %v1281_v43 = vmul.f32 %v1280_v62, %v5934_v57  ;;  %v1220_v0 = vadd.f32 %v4758_v4, %v1219_v19  ;;  %v1292_v39 = vmul.f32 %v1291_v58, %v5934_v57  ;;  %v1319_v44 = vmul.f32 %v1318_v32, %v5962_v6  ;;  %vm1223_vm14 = vmor %vm1221_vm13, %vm1222_vm12 }
 0x1fc   : > { %v1329_v13 = vadd.f32 0.014752088, %v1328_v27  ;;  %2472 = vmatmul.f32.gmra.mxu2 %v2387_v47  ;;  %v1205_v41 = vmul.f32 %v1204_v18, %v5776_v49  ;;  %vm1226_vm15 = vcmp.eq.f32.partialorder %v1225_v14, 8.507059e+37  ;;  %v1228_v51 = vor.u32 1.1754944e-38, %v1227_v46 }
 0x1fd   : > { %v5999_v11 = vmul.f32 0.70710677, %v5978_v63  ;;  %v1224_v15 = vsel %vm1223_vm14, %v4758_v4, %v1220_v0  ;;  %v1293_v3 = vadd.f32 0.4994258, %v1292_v39  ;;  %v1320_v42 = vadd.f32 0.05243302, %v1319_v44 }
 0x1fe   : > { %v1330_v45 = vmul.f32 %v1329_v13, %v5962_v6  ;;  %v1229_v50 = vsel %vm1226_vm15, %v1228_v51, %v1224_v15  ;;  %v1245_v62 = vmul.f32 %v1244_v40, %v5883_v5  ;;  %v1282_v25 = vadd.f32 0.18741608, %v1281_v43 }
 0x1ff   : > { %v1353_v55 = vmul.f32 %v5999_v11, %v5999_v11  ;;  %v4760_v24 = vpop.eup %4759  ;;  %v1230_v49 = vmul.f32 %v1229_v50, %v1205_v41  ;;  %v1294_v18 = vmul.f32 %v1293_v3, %v5934_v57  ;;  %v1321_v4 = vmul.f32 %v1320_v42, %v5962_v6 }
 0x200   : > { %v1331_v14 = vadd.f32 0.112945676, %v1330_v45  ;;  %v1257_v27 = vmul.f32 %v4760_v24, %v5984_v48  ;;  %v1265_v5 = vand.u32 2147483647, %v5984_v48  ;;  %v866_v46 = vsel %vm865_vm0, %v5715_v35, %v5818_v16 }
 0x201   : > { %v6013_v21 = vmin.f32 %v1353_v55, 16.0  ;;  %v4469_v58 = vclamps-f32 %v1230_v49, 1.0  ;;  %v1267_v32 = vand.u32 2147483648, %v5984_v48  ;;  %v6018_v2 = vadd.f32 1.0, %v1294_v18 }
 0x202   : > { %v1332_v19 = vmul.f32 %v1331_v14, %v5962_v6  ;;  %v1258_v47 = vsub.f32 1.0, %v1257_v27  ;;  %v1283_v40 = vmul.f32 %v1282_v25, %v5934_v57  ;;  %v1322_v44 = vadd.f32 0.18741608, %v1321_v4 }
 0x203   : > { %v1355_v43 = vmul.f32 2.1237322e-06, %v6013_v21  ;;  %v1366_v0 = vmul.f32 3.8918573e-05, %v6013_v21  ;;  %v2356_v39 = vadd.f32 1.0, %v4469_v58  ;;  %4761 = vrcp.f32 %v6018_v2 }
 0x204   : > { %v6026_v35 = vmul.f32 %v866_v46, %v5433_v7  ;;  %v1259_v16 = vmul.f32 %v4760_v24, %v1258_v47  ;;  %vm1261_vm1 = vweird.f32 %v5984_v48  ;;  %vm1262_vm2 = vweird.f32 %v4760_v24 }
 0x205   : > { %v1333_v13 = vadd.f32 0.4994258, %v1332_v19  ;;  %v2388_v41 = vmul.f32 %v2356_v39, %v5812_v38  ;;  %vm6030_vm3 = vcmp.eq.f32.partialorder %v1265_v5, 8.507059e+37  ;;  %v1356_v51 = vadd.f32 0.00028619796, %v1355_v43  ;;  %vm1263_vm5 = vmor %vm1261_vm1, %vm1262_vm2 }
 0x206   : > { %v1367_v15 = vadd.f32 0.001143296, %v1366_v0  ;;  %v1260_v3 = vadd.f32 %v4760_v24, %v1259_v16  ;;  %v1268_v42 = vor.u32 1.1754944e-38, %v1267_v32  ;;  %v1284_v45 = vadd.f32 1.1283791, %v1283_v40 }
 0x207   : > { %v1334_v50 = vmul.f32 %v1333_v13, %v5962_v6  ;;  %vm874_vm4 = vweird.f32 %v5754_v30  ;;  %2537 = vmatmul.f32.gmra.mxu3 %v2388_v41  ;;  %v1323_v7 = vmul.f32 %v1322_v44, %v5962_v6  ;;  %v1357_v48 = vmul.f32 %v1356_v51, %v6013_v21 }
 0x208   : > { %v1368_v38 = vmul.f32 %v1367_v15, %v6013_v21  ;;  %v6040_v25 = vmul.f32 0.70710677, %v6026_v35  ;;  %v1264_v55 = vsel %vm1263_vm5, %v4760_v24, %v1260_v3  ;;  %v1305_v49 = vand.u32 2147483647, %v6018_v2 }
 0x209   : > { %v1307_v18 = vand.u32 2147483648, %v6018_v2  ;;  %v6044_v4 = vadd.f32 1.0, %v1334_v50  ;;  %v4762_v14 = vpop.eup %4761  ;;  %vm873_vm6 = vweird.f32 %v5717_v33  ;;  %v1269_v6 = vsel %vm6030_vm3, %v1268_v42, %v1264_v55 }
 0x20a   : > { %v1358_v27 = vadd.f32 0.0036580483, %v1357_v48  ;;  %v1369_v5 = vadd.f32 0.014752088, %v1368_v38  ;;  %v1393_v58 = vmul.f32 %v6040_v25, %v6040_v25  ;;  %v1270_v32 = vmul.f32 %v1269_v6, %v1245_v62  ;;  %vm875_vm11 = vmor %vm873_vm6, %vm874_vm4 }
 0x20b   : > { %v1285_v24 = vmul.f32 %v1284_v45, %v5910_v17  ;;  %v1297_v19 = vmul.f32 %v4762_v14, %v6018_v2  ;;  %4763 = vrcp.f32 %v6044_v4  ;;  %vm1301_vm7 = vweird.f32 %v6018_v2 }
 0x20c   : > { %v1324_v47 = vadd.f32 1.1283791, %v1323_v7  ;;  %v1359_v40 = vmul.f32 %v1358_v27, %v6013_v21  ;;  %v6057_v43 = vmul.f32 %v866_v46, %v5436_v8  ;;  %v4470_v0 = vclamps-f32 %v1270_v32, 1.0 }
 0x20d   : > { %v1298_v39 = vsub.f32 1.0, %v1297_v19  ;;  %v1370_v44 = vmul.f32 %v1369_v5, %v6013_v21  ;;  %v6060_v16 = vmin.f32 %v1393_v58, 16.0  ;;  %vm1302_vm8 = vweird.f32 %v4762_v14 }
 0x20e   : > { %vm6062_vm9 = vcmp.eq.f32.partialorder %v1305_v49, 8.507059e+37  ;;  %v1308_v62 = vor.u32 1.1754944e-38, %v1307_v18  ;;  %v1360_v13 = vadd.f32 0.05243302, %v1359_v40  ;;  %v2357_v41 = vadd.f32 1.0, %v4470_v0  ;;  %vm1303_vm10 = vmor %vm1301_vm7, %vm1302_vm8 }
 0x20f   : > { %v1299_v57 = vmul.f32 %v4762_v14, %v1298_v39  ;;  %v1371_v51 = vadd.f32 0.112945676, %v1370_v44  ;;  %v1395_v15 = vmul.f32 2.1237322e-06, %v6060_v16  ;;  %v1325_v8 = vmul.f32 %v1324_v47, %v5939_v60 }
 0x210   : > { %v1345_v46 = vand.u32 2147483647, %v6044_v4  ;;  %v1406_v3 = vmul.f32 3.8918573e-05, %v6060_v16  ;;  %v6071_v42 = vmul.f32 0.70710677, %v6057_v43  ;;  %v2389_v50 = vmul.f32 %v2357_v41, %v5931_v53 }
 0x211   : > { %v4764_v45 = vpop.eup %4763  ;;  %v1300_v7 = vadd.f32 %v4762_v14, %v1299_v57  ;;  %v1372_v48 = vmul.f32 %v1371_v51, %v6013_v21  ;;  %v1396_v38 = vadd.f32 0.00028619796, %v1395_v15  ;;  %v1347_v55 = vand.u32 2147483648, %v6044_v4 }
 0x212   : > { %v1337_v60 = vmul.f32 %v4764_v45, %v6044_v4  ;;  %v1361_v49 = vmul.f32 %v1360_v13, %v6013_v21  ;;  %v1407_v18 = vadd.f32 0.001143296, %v1406_v3  ;;  %2475 = vmatmul.f32.gmra.mxu2 %v2389_v50  ;;  %v1433_v2 = vmul.f32 %v6071_v42, %v6071_v42 }
 0x213   : > { %v1304_v53 = vsel %vm1303_vm10, %v4762_v14, %v1300_v7  ;;  %v1373_v6 = vadd.f32 0.4994258, %v1372_v48  ;;  %v1397_v27 = vmul.f32 %v1396_v38, %v6060_v16  ;;  %v876_v19 = vsel %vm875_vm11, %v5754_v30, %v5855_v1 }
 0x214   : > { %v1309_v5 = vsel %vm6062_vm9, %v1308_v62, %v1304_v53  ;;  %v1338_v58 = vsub.f32 1.0, %v1337_v60  ;;  %v1408_v32 = vmul.f32 %v1407_v18, %v6060_v16  ;;  %v6094_v14 = vmin.f32 %v1433_v2, 16.0 }
 0x215   : > { %v1310_v47 = vmul.f32 %v1309_v5, %v1285_v24  ;;  %v1374_v33 = vmul.f32 %v1373_v6, %v6013_v21  ;;  %v1398_v40 = vadd.f32 0.0036580483, %v1397_v27  ;;  %vm1342_vm12 = vweird.f32 %v4764_v45 }
 0x216   : > { %v1339_v0 = vmul.f32 %v4764_v45, %v1338_v58  ;;  %v1362_v39 = vadd.f32 0.18741608, %v1361_v49  ;;  %v1409_v44 = vadd.f32 0.014752088, %v1408_v32  ;;  %v1435_v62 = vmul.f32 2.1237322e-06, %v6094_v14 }
 0x217   : > { %v4471_v13 = vclamps-f32 %v1310_v47, 1.0  ;;  %v6096_v41 = vadd.f32 1.0, %v1374_v33  ;;  %v1399_v17 = vmul.f32 %v1398_v40, %v6060_v16  ;;  %vm1341_vm13 = vweird.f32 %v6044_v4 }
 0x218   : > { %v1340_v57 = vadd.f32 %v4764_v45, %v1339_v0  ;;  %v1348_v30 = vor.u32 1.1754944e-38, %v1347_v55  ;;  %v1410_v1 = vmul.f32 %v1409_v44, %v6060_v16  ;;  %vm1343_vm14 = vmor %vm1341_vm13, %vm1342_vm12  ;;  %v1446_v51 = vmul.f32 3.8918573e-05, %v6094_v14 }
 0x219   : > { %v2358_v24 = vadd.f32 1.0, %v4471_v13  ;;  %4765 = vrcp.f32 %v6096_v41  ;;  %v6105_v15 = vmul.f32 %v876_v19, %v5452_v20  ;;  %vm1346_vm15 = vcmp.eq.f32.partialorder %v1345_v46, 8.507059e+37 }
 0x21a   : > { %v1344_v3 = vsel %vm1343_vm14, %v4764_v45, %v1340_v57  ;;  %v1400_v50 = vadd.f32 0.05243302, %v1399_v17  ;;  %v1411_v7 = vadd.f32 0.112945676, %v1410_v1  ;;  %v1363_v4 = vmul.f32 %v1362_v39, %v6013_v21 }
 0x21b   : > { %v2390_v48 = vmul.f32 %v2358_v24, %v5990_v12  ;;  %v1349_v38 = vsel %vm1346_vm15, %v1348_v30, %v1344_v3  ;;  %v1436_v60 = vadd.f32 0.00028619796, %v1435_v62  ;;  %v6114_v20 = vmul.f32 %v5823_v22, %v881_v52 }
 0x21c   : > { %v1350_v55 = vmul.f32 %v1349_v38, %v1325_v8  ;;  %v1401_v49 = vmul.f32 %v1400_v50, %v6060_v16  ;;  %v1412_v18 = vmul.f32 %v1411_v7, %v6060_v16  ;;  %v1447_v45 = vadd.f32 0.001143296, %v1446_v51 }
 0x21d   : > { %2540 = vmatmul.f32.gmra.mxu3 %v2390_v48  ;;  %v1437_v46 = vmul.f32 %v1436_v60, %v6094_v14  ;;  %v6118_v12 = vmul.f32 0.70710677, %v6105_v15  ;;  %v891_v21 = vsub.f32 1.5, %v5926_v29  ;;  %v1015_v8 = vmul.f32 0.5, %v5923_v9 }
 0x21e   : > { %v4472_v53 = vclamps-f32 %v1350_v55, 1.0  ;;  %v1413_v6 = vadd.f32 0.4994258, %v1412_v18  ;;  %vm884_vm0 = vweird.f32 %v5823_v22  ;;  %v1364_v26 = vadd.f32 1.1283791, %v1363_v4 }
 0x21f   : > { %v4766_v27 = vpop.eup %4765  ;;  %v1438_v2 = vadd.f32 0.0036580483, %v1437_v46  ;;  %v1448_v52 = vmul.f32 %v1447_v45, %v6094_v14  ;;  %v1473_v5 = vmul.f32 %v6118_v12, %v6118_v12  ;;  %v1402_v47 = vadd.f32 0.18741608, %v1401_v49 }
 0x220   : > { %v2359_v58 = vadd.f32 1.0, %v4472_v53  ;;  %v1377_v32 = vmul.f32 %v4766_v27, %v6096_v41  ;;  %v6128_v33 = vmul.f32 %v876_v19, %v5455_v23  ;;  %vm883_vm1 = vweird.f32 %v5769_v54 }
 0x221   : > { %v1414_v9 = vmul.f32 %v1413_v6, %v6060_v16  ;;  %v1439_v40 = vmul.f32 %v1438_v2, %v6094_v14  ;;  %v1449_v0 = vadd.f32 0.014752088, %v1448_v52  ;;  %v6133_v39 = vmin.f32 %v1473_v5, 16.0  ;;  %vm885_vm6 = vmor %vm883_vm1, %vm884_vm0 }
 0x222   : > { %v2391_v44 = vmul.f32 %v2359_v58, %v1015_v8  ;;  %v1378_v13 = vsub.f32 1.0, %v1377_v32  ;;  %v1385_v17 = vand.u32 2147483647, %v6096_v41  ;;  %v1387_v62 = vand.u32 2147483648, %v6096_v41 }
 0x223   : > { %vm1382_vm2 = vweird.f32 %v4766_v27  ;;  %v6137_v57 = vadd.f32 1.0, %v1414_v9  ;;  %v1450_v23 = vmul.f32 %v1449_v0, %v6094_v14  ;;  %v1475_v19 = vmul.f32 2.1237322e-06, %v6133_v39 }
 0x224   : > { %2478 = vmatmul.f32.gmra.mxu2 %v2391_v44  ;;  %v1379_v30 = vmul.f32 %v4766_v27, %v1378_v13  ;;  %v1440_v1 = vadd.f32 0.05243302, %v1439_v40  ;;  %v1486_v24 = vmul.f32 3.8918573e-05, %v6133_v39  ;;  %v6143_v51 = vmul.f32 0.70710677, %v6128_v33 }
 0x225   : > { %v1016_v3 = vmul.f32 0.5, %v5978_v63  ;;  %v1365_v50 = vmul.f32 %v1364_v26, %v5999_v11  ;;  %v1403_v7 = vmul.f32 %v1402_v47, %v6060_v16  ;;  %4767 = vrcp.f32 %v6137_v57 }
 0x226   : > { %v1380_v48 = vadd.f32 %v4766_v27, %v1379_v30  ;;  %vm1381_vm3 = vweird.f32 %v6096_v41  ;;  %v1451_v38 = vadd.f32 0.112945676, %v1450_v23  ;;  %v1476_v4 = vadd.f32 0.00028619796, %v1475_v19 }
 0x227   : > { %vm1383_vm4 = vmor %vm1381_vm3, %vm1382_vm2  ;;  %vm1386_vm5 = vcmp.eq.f32.partialorder %v1385_v17, 8.507059e+37  ;;  %v1388_v60 = vor.u32 1.1754944e-38, %v1387_v62  ;;  %v1487_v55 = vadd.f32 0.001143296, %v1486_v24  ;;  %v1513_v49 = vmul.f32 %v6143_v51, %v6143_v51 }
 0x228   : > { %v1384_v63 = vsel %vm1383_vm4, %v4766_v27, %v1380_v48  ;;  %v1441_v11 = vmul.f32 %v1440_v1, %v6094_v14  ;;  %v1452_v16 = vmul.f32 %v1451_v38, %v6094_v14  ;;  %v1477_v18 = vmul.f32 %v1476_v4, %v6133_v39 }
 0x229   : > { %v1389_v46 = vsel %vm1386_vm5, %v1388_v60, %v1384_v63  ;;  %v1404_v45 = vadd.f32 1.1283791, %v1403_v7  ;;  %v1488_v41 = vmul.f32 %v1487_v55, %v6133_v39  ;;  %v6157_v8 = vmin.f32 %v1513_v49, 16.0 }
 0x22a   : > { %v1390_v53 = vmul.f32 %v1389_v46, %v1365_v50  ;;  %v1425_v6 = vand.u32 2147483647, %v6137_v57  ;;  %v1453_v27 = vadd.f32 0.4994258, %v1452_v16  ;;  %v1478_v26 = vadd.f32 0.0036580483, %v1477_v18 }
 0x22b   : > { %v4768_v2 = vpop.eup %4767  ;;  %v1489_v52 = vadd.f32 0.014752088, %v1488_v41  ;;  %v1515_v5 = vmul.f32 2.1237322e-06, %v6157_v8  ;;  %v1526_v58 = vmul.f32 3.8918573e-05, %v6157_v8  ;;  %v886_v32 = vsel %vm885_vm6, %v5823_v22, %v6114_v20 }
 0x22c   : > { %v4473_v47 = vclamps-f32 %v1390_v53, 1.0  ;;  %v1417_v9 = vmul.f32 %v4768_v2, %v6137_v57  ;;  %v1427_v54 = vand.u32 2147483648, %v6137_v57  ;;  %v1442_v40 = vadd.f32 0.18741608, %v1441_v11 }
 0x22d   : > { %v1454_v0 = vmul.f32 %v1453_v27, %v6094_v14  ;;  %v1479_v44 = vmul.f32 %v1478_v26, %v6133_v39  ;;  %v1490_v13 = vmul.f32 %v1489_v52, %v6133_v39  ;;  %v1516_v17 = vadd.f32 0.00028619796, %v1515_v5 }
 0x22e   : > { %v2360_v62 = vadd.f32 1.0, %v4473_v47  ;;  %v1418_v23 = vsub.f32 1.0, %v1417_v9  ;;  %v1527_v19 = vadd.f32 0.001143296, %v1526_v58  ;;  %v6174_v30 = vmul.f32 %v886_v32, %v5471_v36 }
 0x22f   : > { %v6176_v22 = vadd.f32 1.0, %v1454_v0  ;;  %v1480_v20 = vadd.f32 0.05243302, %v1479_v44  ;;  %v1491_v1 = vadd.f32 0.112945676, %v1490_v13  ;;  %v1517_v24 = vmul.f32 %v1516_v17, %v6157_v8 }
 0x230   : > { %v2392_v50 = vmul.f32 %v2360_v62, %v1016_v3  ;;  %v1419_v7 = vmul.f32 %v4768_v2, %v1418_v23  ;;  %vm1422_vm7 = vweird.f32 %v4768_v2  ;;  %v1528_v48 = vmul.f32 %v1527_v19, %v6157_v8 }
 0x231   : > { %v6183_v38 = vmul.f32 %v5863_v28, %v891_v21  ;;  %v1405_v4 = vmul.f32 %v1404_v45, %v6040_v25  ;;  %vm1421_vm8 = vweird.f32 %v6137_v57  ;;  %4769 = vrcp.f32 %v6176_v22 }
 0x232   : > { %2543 = vmatmul.f32.gmra.mxu3 %v2392_v50  ;;  %v1420_v36 = vadd.f32 %v4768_v2, %v1419_v7  ;;  %v1481_v60 = vmul.f32 %v1480_v20, %v6133_v39  ;;  %v1492_v3 = vmul.f32 %v1491_v1, %v6133_v39  ;;  %v1518_v55 = vadd.f32 0.0036580483, %v1517_v24  ;;  %vm1423_vm10 = vmor %vm1421_vm8, %vm1422_vm7 }
 0x233   : > { %vm894_vm9 = vweird.f32 %v5863_v28  ;;  %v1428_v29 = vor.u32 1.1754944e-38, %v1427_v54  ;;  %v1443_v21 = vmul.f32 %v1442_v40, %v6094_v14  ;;  %v1529_v49 = vadd.f32 0.014752088, %v1528_v48 }
 0x234   : > { %v6193_v25 = vmul.f32 0.70710677, %v6174_v30  ;;  %v1424_v57 = vsel %vm1423_vm10, %v4768_v2, %v1420_v36  ;;  %vm1426_vm11 = vcmp.eq.f32.partialorder %v1425_v6, 8.507059e+37  ;;  %v1493_v63 = vadd.f32 0.4994258, %v1492_v3 }
 0x235   : > { %v1519_v11 = vmul.f32 %v1518_v55, %v6157_v8  ;;  %vm893_vm12 = vweird.f32 %v5806_v59  ;;  %v1429_v16 = vsel %vm1426_vm11, %v1428_v29, %v1424_v57  ;;  %v1482_v18 = vadd.f32 0.18741608, %v1481_v60 }
 0x236   : > { %v1530_v46 = vmul.f32 %v1529_v49, %v6157_v8  ;;  %v1553_v45 = vmul.f32 %v6193_v25, %v6193_v25  ;;  %v1017_v14 = vmul.f32 0.5, %v6026_v35  ;;  %v1430_v41 = vmul.f32 %v1429_v16, %v1405_v4  ;;  %vm895_vm0 = vmor %vm893_vm12, %vm894_vm9 }
 0x237   : > { %v1494_v53 = vmul.f32 %v1493_v63, %v6133_v39  ;;  %v6203_v27 = vmul.f32 %v886_v32, %v5474_v37  ;;  %v4770_v6 = vpop.eup %4769  ;;  %v6206_v26 = vmul.f32 0.5, %v6057_v43  ;;  %v1444_v2 = vadd.f32 1.1283791, %v1443_v21 }
 0x238   : > { %v1531_v52 = vadd.f32 0.112945676, %v1530_v46  ;;  %v6208_v5 = vmin.f32 %v1553_v45, 16.0  ;;  %v4474_v58 = vclamps-f32 %v1430_v41, 1.0  ;;  %v1457_v47 = vmul.f32 %v4770_v6, %v6176_v22 }
 0x239   : > { %v1465_v9 = vand.u32 2147483647, %v6176_v22  ;;  %v1520_v35 = vadd.f32 0.05243302, %v1519_v11  ;;  %v1483_v54 = vmul.f32 %v1482_v18, %v6133_v39  ;;  %v6213_v40 = vadd.f32 1.0, %v1494_v53 }
 0x23a   : > { %v1532_v37 = vmul.f32 %v1531_v52, %v6157_v8  ;;  %v1555_v32 = vmul.f32 2.1237322e-06, %v6208_v5  ;;  %v2361_v43 = vadd.f32 1.0, %v4474_v58  ;;  %v1458_v0 = vsub.f32 1.0, %v1457_v47 }
 0x23b   : > { %v1566_v44 = vmul.f32 3.8918573e-05, %v6208_v5  ;;  %v6219_v13 = vmul.f32 0.70710677, %v6203_v27  ;;  %v1445_v17 = vmul.f32 %v1444_v2, %v6071_v42  ;;  %vm1462_vm13 = vweird.f32 %v4770_v6 }
 0x23c   : > { %v1467_v62 = vand.u32 2147483648, %v6176_v22  ;;  %4771 = vrcp.f32 %v6213_v40  ;;  %v2393_v39 = vmul.f32 %v2361_v43, %v1017_v14  ;;  %v1459_v23 = vmul.f32 %v4770_v6, %v1458_v0 }
 0x23d   : > { %v1521_v19 = vmul.f32 %v1520_v35, %v6157_v8  ;;  %v1533_v20 = vadd.f32 0.4994258, %v1532_v37  ;;  %vm1461_vm14 = vweird.f32 %v6176_v22  ;;  %vm6226_vm15 = vcmp.eq.f32.partialorder %v1465_v9, 8.507059e+37 }
 0x23e   : > { %v1556_v24 = vadd.f32 0.00028619796, %v1555_v32  ;;  %v1567_v50 = vadd.f32 0.001143296, %v1566_v44  ;;  %2481 = vmatmul.f32.gmra.mxu2 %v2393_v39  ;;  %v1460_v42 = vadd.f32 %v4770_v6, %v1459_v23  ;;  %v1484_v7 = vadd.f32 1.1283791, %v1483_v54  ;;  %vm1463_vm1 = vmor %vm1461_vm14, %vm1462_vm13 }
 0x23f   : > { %v1534_v48 = vmul.f32 %v1533_v20, %v6157_v8  ;;  %v1593_v4 = vmul.f32 %v6219_v13, %v6219_v13  ;;  %v1468_v22 = vor.u32 1.1754944e-38, %v1467_v62  ;;  %v1505_v36 = vand.u32 2147483647, %v6213_v40 }
 0x240   : > { %v1557_v60 = vmul.f32 %v1556_v24, %v6208_v5  ;;  %v1568_v3 = vmul.f32 %v1567_v50, %v6208_v5  ;;  %v1464_v55 = vsel %vm1463_vm1, %v4770_v6, %v1460_v42  ;;  %v1522_v59 = vadd.f32 0.18741608, %v1521_v19 }
 0x241   : > { %v6241_v29 = vadd.f32 1.0, %v1534_v48  ;;  %v896_v21 = vsel %vm895_vm0, %v5863_v28, %v6183_v38  ;;  %v1469_v57 = vsel %vm6226_vm15, %v1468_v22, %v1464_v55  ;;  %v6247_v16 = vmin.f32 %v1593_v4, 16.0 }
 0x242   : > { %v4772_v49 = vpop.eup %4771  ;;  %v1558_v63 = vadd.f32 0.0036580483, %v1557_v60  ;;  %v1569_v11 = vadd.f32 0.014752088, %v1568_v3  ;;  %v1470_v18 = vmul.f32 %v1469_v57, %v1445_v17  ;;  %v6250_v46 = vmul.f32 0.5, %v6105_v15 }
 0x243   : > { %v1485_v45 = vmul.f32 %v1484_v7, %v6118_v12  ;;  %v1497_v14 = vmul.f32 %v4772_v49, %v6213_v40  ;;  %vm6254_vm2 = vcmp.eq.f32.partialorder %v1505_v36, 8.507059e+37  ;;  %v1507_v28 = vand.u32 2147483648, %v6213_v40 }
 0x244   : > { %4773 = vrcp.f32 %v6241_v29  ;;  %v6261_v38 = vmul.f32 %v896_v21, %v5490_v56  ;;  %v4475_v53 = vclamps-f32 %v1470_v18, 1.0  ;;  %v1559_v15 = vmul.f32 %v1558_v63, %v6208_v5 }
 0x245   : > { %v1498_v6 = vsub.f32 1.0, %v1497_v14  ;;  %v1570_v2 = vmul.f32 %v1569_v11, %v6208_v5  ;;  %vm1502_vm3 = vweird.f32 %v4772_v49  ;;  %v1523_v12 = vmul.f32 %v1522_v59, %v6157_v8 }
 0x246   : > { %v1595_v52 = vmul.f32 2.1237322e-06, %v6247_v16  ;;  %v1606_v58 = vmul.f32 3.8918573e-05, %v6247_v16  ;;  %v2362_v47 = vadd.f32 1.0, %v4475_v53  ;;  %vm1501_vm4 = vweird.f32 %v6213_v40 }
 0x247   : > { %v1499_v9 = vmul.f32 %v4772_v49, %v1498_v6  ;;  %v1560_v35 = vadd.f32 0.05243302, %v1559_v15  ;;  %v1571_v54 = vadd.f32 0.112945676, %v1570_v2  ;;  %v6270_v32 = vmul.f32 0.70710677, %v6261_v38  ;;  %vm1503_vm5 = vmor %vm1501_vm4, %vm1502_vm3 }
 0x248   : > { %v1596_v56 = vadd.f32 0.00028619796, %v1595_v52  ;;  %v1607_v37 = vadd.f32 0.001143296, %v1606_v58  ;;  %v2394_v43 = vmul.f32 %v2362_v47, %v6206_v26  ;;  %v1508_v44 = vor.u32 1.1754944e-38, %v1507_v28 }
 0x249   : > { %v1500_v0 = vadd.f32 %v4772_v49, %v1499_v9  ;;  %v1572_v8 = vmul.f32 %v1571_v54, %v6208_v5  ;;  %v1633_v40 = vmul.f32 %v6270_v32, %v6270_v32  ;;  %v6280_v23 = vmul.f32 %v896_v21, %v5493_v61 }
 0x24a   : > { %v4774_v17 = vpop.eup %4773  ;;  %v1597_v62 = vmul.f32 %v1596_v56, %v6247_v16  ;;  %v1608_v39 = vmul.f32 %v1607_v37, %v6247_v16  ;;  %2546 = vmatmul.f32.gmra.mxu3 %v2394_v43  ;;  %v1524_v26 = vadd.f32 1.1283791, %v1523_v12  ;;  %v1561_v1 = vmul.f32 %v1560_v35, %v6208_v5  ;;  %v763_v35 = vpop.xlane.xlu2 %762 }
 0x24b   : > { %v1504_v19 = vsel %vm1503_vm5, %v4772_v49, %v1500_v0  ;;  %v1537_v20 = vmul.f32 %v4774_v17, %v6241_v29  ;;  %v1573_v50 = vadd.f32 0.4994258, %v1572_v8  ;;  %v1545_v22 = vand.u32 2147483647, %v6241_v29 }
 0x24c   : > { %v1509_v24 = vsel %vm6254_vm2, %v1508_v44, %v1504_v19  ;;  %v1598_v42 = vadd.f32 0.0036580483, %v1597_v62  ;;  %v1609_v7 = vadd.f32 0.014752088, %v1608_v39  ;;  %v6287_v36 = vmin.f32 %v1633_v40, 16.0 }
 0x24d   : > { %v1510_v48 = vmul.f32 %v1509_v24, %v1485_v45  ;;  %v1538_v4 = vsub.f32 1.0, %v1537_v20  ;;  %v1547_v61 = vand.u32 2147483648, %v6241_v29  ;;  %v1574_v60 = vmul.f32 %v1573_v50, %v6208_v5 }
 0x24e   : > { %v1610_v3 = vmul.f32 %v1609_v7, %v6247_v16  ;;  %v6293_v55 = vmul.f32 0.70710677, %v6280_v23  ;;  %vm1542_vm6 = vweird.f32 %v4774_v17  ;;  %v1635_v49 = vmul.f32 2.1237322e-06, %v6287_v36 }
 0x24f   : > { %v4476_v59 = vclamps-f32 %v1510_v48, 1.0  ;;  %v1539_v21 = vmul.f32 %v4774_v17, %v1538_v4  ;;  %v1562_v57 = vadd.f32 0.18741608, %v1561_v1  ;;  %v6296_v63 = vadd.f32 1.0, %v1574_v60 }
 0x250   : > { %v1599_v11 = vmul.f32 %v1598_v42, %v6247_v16  ;;  %v1611_v18 = vadd.f32 0.112945676, %v1610_v3  ;;  %vm1541_vm7 = vweird.f32 %v6241_v29  ;;  %v1636_v41 = vadd.f32 0.00028619796, %v1635_v49 }
 0x251   : > { %v2363_v45 = vadd.f32 1.0, %v4476_v59  ;;  %v1540_v14 = vadd.f32 %v4774_v17, %v1539_v21  ;;  %v1525_v28 = vmul.f32 %v1524_v26, %v6143_v51  ;;  %vm1543_vm8 = vmor %vm1541_vm7, %vm1542_vm6  ;;  %v1548_v53 = vor.u32 1.1754944e-38, %v1547_v61 }
 0x252   : > { %4775 = vrcp.f32 %v6296_v63  ;;  %v1673_v6 = vmul.f32 %v6293_v55, %v6293_v55  ;;  %vm1546_vm9 = vcmp.eq.f32.partialorder %v1545_v22, 8.507059e+37  ;;  %v1612_v12 = vmul.f32 %v1611_v18, %v6247_v16 }
 0x253   : > { %v2395_v15 = vmul.f32 %v2363_v45, %v6250_v46  ;;  %v1544_v2 = vsel %vm1543_vm8, %v4774_v17, %v1540_v14  ;;  %v1563_v58 = vmul.f32 %v1562_v57, %v6208_v5  ;;  %v1600_v29 = vadd.f32 0.05243302, %v1599_v11 }
 0x254   : > { %v1549_v52 = vsel %vm1546_vm9, %v1548_v53, %v1544_v2  ;;  %v1637_v47 = vmul.f32 %v1636_v41, %v6287_v36  ;;  %v1613_v9 = vadd.f32 0.4994258, %v1612_v12  ;;  %v1646_v54 = vmul.f32 3.8918573e-05, %v6287_v36 }
 0x255   : > { %2484 = vmatmul.f32.gmra.mxu2 %v2395_v15  ;;  %v1550_v51 = vmul.f32 %v1549_v52, %v1525_v28  ;;  %v793_v56 = vmul.f32 %v763_v35, %v5355_v10  ;;  %v6310_v37 = vmin.f32 %v1673_v6, 16.0  ;;  %v1020_v5 = vmul.f32 0.5, %v6128_v33 }
 0x256   : > { %v1614_v43 = vmul.f32 %v1613_v9, %v6247_v16  ;;  %v1647_v0 = vadd.f32 0.001143296, %v1646_v54  ;;  %v1564_v8 = vadd.f32 1.1283791, %v1563_v58  ;;  %v1601_v17 = vmul.f32 %v1600_v29, %v6247_v16 }
 0x257   : > { %v4477_v46 = vclamps-f32 %v1550_v51, 1.0  ;;  %v1638_v62 = vadd.f32 0.0036580483, %v1637_v47  ;;  %v6316_v19 = vadd.f32 1e-05, %v793_v56  ;;  %v1587_v33 = vand.u32 2147483648, %v6296_v63 }
 0x258   : > { %v4776_v44 = vpop.eup %4775  ;;  %v1675_v26 = vmul.f32 2.1237322e-06, %v6310_v37  ;;  %v1585_v20 = vand.u32 2147483647, %v6296_v63  ;;  %v6320_v1 = vadd.f32 1.0, %v1614_v43  ;;  %v1648_v7 = vmul.f32 %v1647_v0, %v6287_v36 }
 0x259   : > { %v2364_v39 = vadd.f32 1.0, %v4477_v46  ;;  %v1577_v40 = vmul.f32 %v4776_v44, %v6296_v63  ;;  %v1686_v24 = vmul.f32 3.8918573e-05, %v6310_v37  ;;  %vm1582_vm10 = vweird.f32 %v4776_v44 }
 0x25a   : > { %v1602_v48 = vadd.f32 0.18741608, %v1601_v17  ;;  %4777 = vrcp.f32 %v6320_v1  ;;  %v1639_v4 = vmul.f32 %v1638_v62, %v6287_v36  ;;  %v1649_v61 = vadd.f32 0.014752088, %v1648_v7  ;;  %v769_v7 = vpop.xlane.xlu2 %768 }
 0x25b   : > { %v2396_v50 = vmul.f32 %v2364_v39, %v1020_v5  ;;  %v1578_v42 = vsub.f32 1.0, %v1577_v40  ;;  %4779 = vrsqrt.f32 %v6316_v19  ;;  %v1676_v60 = vadd.f32 0.00028619796, %v1675_v26 }
 0x25c   : > { %v1687_v3 = vadd.f32 0.001143296, %v1686_v24  ;;  %vm1581_vm11 = vweird.f32 %v6296_v63  ;;  %v1650_v21 = vmul.f32 %v1649_v61, %v6287_v36  ;;  %v1588_v57 = vor.u32 1.1754944e-38, %v1587_v33  ;;  %v766_v33 = vpop.xlane.xlu1 %765 }
 0x25d   : > { %2549 = vmatmul.f32.gmra.mxu3 %v2396_v50  ;;  %v1579_v22 = vmul.f32 %v4776_v44, %v1578_v42  ;;  %v1677_v49 = vmul.f32 %v1676_v60, %v6310_v37  ;;  %vm1583_vm12 = vmor %vm1581_vm11, %vm1582_vm10  ;;  %v1603_v11 = vmul.f32 %v1602_v48, %v6247_v16  ;;  %v1565_v45 = vmul.f32 %v1564_v8, %v6193_v25 }
 0x25e   : > { %v1688_v18 = vmul.f32 %v1687_v3, %v6310_v37  ;;  %vm1586_vm13 = vcmp.eq.f32.partialorder %v1585_v20, 8.507059e+37  ;;  %v1640_v41 = vadd.f32 0.05243302, %v1639_v4  ;;  %v1651_v6 = vadd.f32 0.112945676, %v1650_v21  ;;  %v772_v4 = vpop.xlane.xlu0 %771 }
 0x25f   : > { %v1580_v59 = vadd.f32 %v4776_v44, %v1579_v22  ;;  %v1678_v15 = vadd.f32 0.0036580483, %v1677_v49  ;;  %v1021_v58 = vmul.f32 0.5, %v6174_v30  ;;  %v1604_v16 = vadd.f32 1.1283791, %v1603_v11 }
 0x260   : > { %v4778_v28 = vpop.eup %4777  ;;  %v1689_v63 = vadd.f32 0.014752088, %v1688_v18  ;;  %v1652_v29 = vmul.f32 %v1651_v6, %v6287_v36  ;;  %v1641_v9 = vmul.f32 %v1640_v41, %v6287_v36  ;;  %v1627_v54 = vand.u32 2147483648, %v6320_v1 }
 0x261   : > { %v1584_v14 = vsel %vm1583_vm12, %v4776_v44, %v1580_v59  ;;  %v6334_v2 = vpop.eup %4779  ;;  %v1617_v52 = vmul.f32 %v4778_v28, %v6320_v1  ;;  %v1679_v35 = vmul.f32 %v1678_v15, %v6310_v37  ;;  %vm1622_vm14 = vweird.f32 %v4778_v28 }
 0x262   : > { %v1589_v53 = vsel %vm1586_vm13, %v1588_v57, %v1584_v14  ;;  %v1690_v25 = vmul.f32 %v1689_v63, %v6310_v37  ;;  %v898_v56 = vmul.f32 %v6334_v2, %v6316_v19  ;;  %v1653_v46 = vadd.f32 0.4994258, %v1652_v29 }
 0x263   : > { %v1590_v12 = vmul.f32 %v1589_v53, %v1565_v45  ;;  %v1618_v51 = vsub.f32 1.0, %v1617_v52  ;;  %v1625_v44 = vand.u32 2147483647, %v6320_v1  ;;  %v1605_v5 = vmul.f32 %v1604_v16, %v6219_v13 }
 0x264   : > { %v1691_v43 = vadd.f32 0.112945676, %v1690_v25  ;;  %vm1621_vm15 = vweird.f32 %v6320_v1  ;;  %v1654_v8 = vmul.f32 %v1653_v46, %v6287_v36  ;;  %v1642_v40 = vadd.f32 0.18741608, %v1641_v9  ;;  %v775_v63 = vpop.xlane.xlu1 %774  ;;  %v778_v46 = vpop.xlane.xlu2 %777 }
 0x265   : > { %v4478_v47 = vclamps-f32 %v1590_v12, 1.0  ;;  %v1619_v30 = vmul.f32 %v4778_v28, %v1618_v51  ;;  %v1680_v26 = vadd.f32 0.05243302, %v1679_v35  ;;  %vm1623_vm0 = vmor %vm1621_vm15, %vm1622_vm14  ;;  %v1628_v20 = vor.u32 1.1754944e-38, %v1627_v54  ;;  %v6387_v35 = vld [vmem:[%s8388_s4] ss:$0 sm:$0xff] }
 0x266   : > { %v1692_v17 = vmul.f32 %v1691_v43, %v6310_v37  ;;  %v899_v24 = vmul.f32 %v6334_v2, %v898_v56  ;;  %v6351_v50 = vadd.f32 1.0, %v1654_v8  ;;  %vm1626_vm1 = vcmp.eq.f32.partialorder %v1625_v44, 8.507059e+37  ;;  %v2470_v43 = vpop.f32.mrf.mxu2  ;;  %v781_v8 = vpop.xlane.xlu0 %780 }
 0x267   : > { %v2365_v0 = vadd.f32 1.0, %v4478_v47  ;;  %v1620_v39 = vadd.f32 %v4778_v28, %v1619_v30  ;;  %v794_v1 = vmul.f32 %v766_v33, %v5355_v10  ;;  %v795_v48 = vmul.f32 %v769_v7, %v5355_v10 }
 0x268   : > { %v1693_v42 = vadd.f32 0.4994258, %v1692_v17  ;;  %4781 = vrcp.f32 %v6351_v50  ;;  %v1643_v60 = vmul.f32 %v1642_v40, %v6287_v36  ;;  %v1681_v3 = vmul.f32 %v1680_v26, %v6310_v37 }
 0x269   : > { %v2397_v62 = vmul.f32 %v2365_v0, %v1021_v58  ;;  %v1624_v13 = vsel %vm1623_vm0, %v4778_v28, %v1620_v39  ;;  %v900_v21 = vmul.f32 0.5, %v899_v24  ;;  %v6359_v49 = vadd.f32 1e-05, %v794_v1 }
 0x26a   : > { %v1629_v22 = vsel %vm1626_vm1, %v1628_v20, %v1624_v13  ;;  %v1694_v59 = vmul.f32 %v1693_v42, %v6310_v37  ;;  %v6361_v57 = vadd.f32 1e-05, %v795_v48  ;;  %v796_v11 = vmul.f32 %v772_v4, %v5355_v10 }
 0x26b   : > { %2487 = vmatmul.f32.gmra.mxu2 %v2397_v62  ;;  %v1630_v61 = vmul.f32 %v1629_v22, %v1605_v5  ;;  %4783 = vrsqrt.f32 %v6359_v49  ;;  %v1022_v36 = vmul.f32 0.5, %v6203_v27  ;;  %v1682_v28 = vadd.f32 0.18741608, %v1681_v3 }
 0x26c   : > { %v6364_v45 = vadd.f32 1.0, %v1694_v59  ;;  %v6367_v14 = vadd.f32 1e-05, %v796_v11  ;;  %v901_v6 = vsub.f32 1.5, %v900_v21  ;;  %v1644_v15 = vadd.f32 1.1283791, %v1643_v60 }
 0x26d   : > { %v4479_v18 = vclamps-f32 %v1630_v61, 1.0  ;;  %v1665_v58 = vand.u32 2147483647, %v6351_v50  ;;  %v1667_v16 = vand.u32 2147483648, %v6351_v50  ;;  %v797_v27 = vmul.f32 %v775_v63, %v5355_v10 }
 0x26e   : > { %4785 = vrcp.f32 %v6364_v45  ;;  %v4782_v53 = vpop.eup %4781  ;;  %v1683_v25 = vmul.f32 %v1682_v28, %v6310_v37  ;;  %v902_v51 = vmul.f32 %v6334_v2, %v901_v6  ;;  %vm903_vm2 = vweird.f32 %v6316_v19 }
 0x26f   : > { %v2366_v41 = vadd.f32 1.0, %v4479_v18  ;;  %4787 = vrsqrt.f32 %v6361_v57  ;;  %v1657_v52 = vmul.f32 %v4782_v53, %v6351_v50  ;;  %vm904_vm3 = vweird.f32 %v6334_v2 }
 0x270   : > { %4789 = vrsqrt.f32 %v6367_v14  ;;  %v1645_v9 = vmul.f32 %v1644_v15, %v6270_v32  ;;  %vm1661_vm4 = vweird.f32 %v6351_v50  ;;  %vm1662_vm5 = vweird.f32 %v4782_v53  ;;  %vm905_vm9 = vmor %vm903_vm2, %vm904_vm3  ;;  %v2535_v3 = vpop.f32.mrf.mxu3 }
 0x271   : > { %v2398_v12 = vmul.f32 %v2366_v41, %v1022_v36  ;;  %v1658_v29 = vsub.f32 1.0, %v1657_v52  ;;  %v6378_v47 = vpop.eup %4783  ;;  %vm6394_vm6 = vcmp.eq.f32.partialorder %v1665_v58, 8.507059e+37  ;;  %v1668_v32 = vor.u32 1.1754944e-38, %v1667_v16  ;;  %vm1663_vm7 = vmor %vm1661_vm4, %vm1662_vm5 }
 0x272   : > { %v908_v37 = vmul.f32 %v6378_v47, %v6359_v49  ;;  %v6399_v5 = vadd.f32 1e-05, %v797_v27  ;;  %v1684_v39 = vadd.f32 1.1283791, %v1683_v25  ;;  %v1705_v40 = vand.u32 2147483647, %v6364_v45 }
 0x273   : > { %2552 = vmatmul.f32.gmra.mxu3 %v2398_v12  ;;  %v1659_v56 = vmul.f32 %v4782_v53, %v1658_v29  ;;  %v1707_v24 = vand.u32 2147483648, %v6364_v45  ;;  %v798_v42 = vmul.f32 %v778_v46, %v5355_v10  ;;  %v2471_v33 = vadd.f32 %v6387_v35, %v2470_v43  ;;  %v784_v29 = vpop.xlane.xlu1 %783 }
 0x274   : > { %v4786_v54 = vpop.eup %4785  ;;  %v909_v26 = vmul.f32 %v6378_v47, %v908_v37  ;;  %v799_v1 = vmul.f32 %v781_v8, %v5355_v10  ;;  %4791 = vrsqrt.f32 %v6399_v5  ;;  %v1023_v22 = vmul.f32 0.5, %v6261_v38 }
 0x275   : > { %v6392_v0 = vpop.eup %4787  ;;  %v1697_v44 = vmul.f32 %v4786_v54, %v6364_v45  ;;  %v1660_v62 = vadd.f32 %v4782_v53, %v1659_v56  ;;  %vm1702_vm8 = vweird.f32 %v4786_v54  ;;  %vm1701_vm10 = vweird.f32 %v6364_v45 }
 0x276   : > { %v6401_v17 = vpop.eup %4789  ;;  %v918_v13 = vmul.f32 %v6392_v0, %v6361_v57  ;;  %v910_v60 = vmul.f32 0.5, %v909_v26  ;;  %v6425_v21 = vadd.f32 1e-05, %v798_v42  ;;  %v6427_v11 = vadd.f32 %v2535_v3, %v2471_v33  ;;  %vm1703_vm11 = vmor %vm1701_vm10, %vm1702_vm8  ;;  %v8445_v26 = vld [vmem:[#allocation5_spill] sm:$0xff] }
 0x277   : > { %v1698_v20 = vsub.f32 1.0, %v1697_v44  ;;  %v1664_v7 = vsel %vm1663_vm7, %v4782_v53, %v1660_v62  ;;  %v928_v50 = vmul.f32 %v6401_v17, %v6367_v14  ;;  %v906_v18 = vsel %vm905_vm9, %v6334_v2, %v902_v51 }
 0x278   : > { %v1669_v48 = vsel %vm6394_vm6, %v1668_v32, %v1664_v7  ;;  %v1685_v41 = vmul.f32 %v1684_v39, %v6293_v55  ;;  %v1708_v19 = vor.u32 1.1754944e-38, %v1707_v24  ;;  %v919_v38 = vmul.f32 %v6392_v0, %v918_v13  ;;  %2583 = vadd.xlane.f32.xlu2 %v6427_v11  ;;  %v8444_v39 = vld [vmem:[#allocation4_spill] sm:$0xff] }
 0x279   : > { %v1699_v4 = vmul.f32 %v4786_v54, %v1698_v20  ;;  %v1670_v61 = vmul.f32 %v1669_v48, %v1645_v9  ;;  %vm1706_vm12 = vcmp.eq.f32.partialorder %v1705_v40, 8.507059e+37  ;;  %v929_v45 = vmul.f32 %v6401_v17, %v928_v50 }
 0x27a   : > { %v6434_v53 = vadd.f32 1e-05, %v799_v1  ;;  %v911_v63 = vsub.f32 1.5, %v910_v60  ;;  %v993_v2 = vmul.f32 %v906_v18, %v5528_v31  ;;  %v6438_v12 = vpop.eup %4791  ;;  %4793 = vrsqrt.f32 %v6425_v21 }
 0x27b   : > { %v1700_v59 = vadd.f32 %v4786_v54, %v1699_v4  ;;  %v4480_v36 = vclamps-f32 %v1670_v61, 1.0  ;;  %v920_v58 = vmul.f32 0.5, %v919_v38  ;;  %v930_v27 = vmul.f32 0.5, %v929_v45 }
 0x27c   : > { %4795 = vrsqrt.f32 %v6434_v53  ;;  %v912_v25 = vmul.f32 %v6378_v47, %v911_v63  ;;  %vm914_vm13 = vweird.f32 %v6378_v47  ;;  %v938_v31 = vmul.f32 %v6438_v12, %v6399_v5 }
 0x27d   : > { %v1704_v28 = vsel %vm1703_vm11, %v4786_v54, %v1700_v59  ;;  %v2367_v6 = vadd.f32 1.0, %v4480_v36  ;;  %v6446_v51 = vmul.f32 0.70710677, %v993_v2  ;;  %v1024_v9 = vmul.f32 0.5, %v6280_v23 }
 0x27e   : > { %v1709_v15 = vsel %vm1706_vm12, %v1708_v19, %v1704_v28  ;;  %v6450_v56 = vmul.f32 %v906_v18, %v5531_v34  ;;  %vm913_vm14 = vweird.f32 %v6359_v49  ;;  %v921_v37 = vsub.f32 1.5, %v920_v58 }
 0x27f   : > { %v1710_v55 = vmul.f32 %v1709_v15, %v1685_v41  ;;  %v2399_v52 = vmul.f32 %v2367_v6, %v1023_v22  ;;  %v800_v46 = vmul.f32 %v784_v29, %v5355_v10  ;;  %v1713_v43 = vmul.f32 %v6446_v51, %v6446_v51  ;;  %vm915_vm15 = vmor %vm913_vm14, %vm914_vm13 }
 0x280   : > { %v6456_v30 = vpop.eup %4793  ;;  %v931_v44 = vsub.f32 1.5, %v930_v27  ;;  %v6459_v8 = vmul.f32 0.70710677, %v6450_v56  ;;  %v939_v23 = vmul.f32 %v6438_v12, %v938_v31  ;;  %v916_v49 = vsel %vm915_vm15, %v6378_v47, %v912_v25 }
 0x281   : > { %v4481_v16 = vclamps-f32 %v1710_v55, 1.0  ;;  %2490 = vmatmul.f32.gmra.mxu2 %v2399_v52  ;;  %v6462_v34 = vmin.f32 %v1713_v43, 16.0  ;;  %v6470_v40 = vmul.f32 %v916_v49, %v8444_v39  ;;  %v6473_v20 = vmul.f32 %v916_v49, %v8445_v26 }
 0x282   : > { %v6465_v62 = vpop.eup %4795  ;;  %v1753_v10 = vmul.f32 %v6459_v8, %v6459_v8  ;;  %v6476_v24 = vmul.f32 %v6392_v0, %v921_v37  ;;  %v948_v42 = vmul.f32 %v6456_v30, %v6425_v21  ;;  %v6480_v33 = vadd.f32 1e-05, %v800_v46 }
 0x283   : > { %v2368_v54 = vadd.f32 1.0, %v4481_v16  ;;  %v1715_v47 = vmul.f32 2.1237322e-06, %v6462_v34  ;;  %v6484_v7 = vmul.f32 %v6401_v17, %v931_v44  ;;  %v1726_v13 = vmul.f32 3.8918573e-05, %v6462_v34 }
 0x284   : > { %v6487_v1 = vmin.f32 %v1753_v10, 16.0  ;;  %v6490_v48 = vmul.f32 0.70710677, %v6470_v40  ;;  %v940_v4 = vmul.f32 0.5, %v939_v23  ;;  %v958_v50 = vmul.f32 %v6465_v62, %v6434_v53 }
 0x285   : > { %v2400_v32 = vmul.f32 %v2368_v54, %v1024_v9  ;;  %v1716_v22 = vadd.f32 0.00028619796, %v1715_v47  ;;  %v6495_v61 = vmul.f32 0.70710677, %v6473_v20  ;;  %v1727_v60 = vadd.f32 0.001143296, %v1726_v13 }
 0x286   : > { %v1755_v3 = vmul.f32 2.1237322e-06, %v6487_v1  ;;  %v1766_v59 = vmul.f32 3.8918573e-05, %v6487_v1  ;;  %v1793_v18 = vmul.f32 %v6490_v48, %v6490_v48  ;;  %vm924_vm0 = vweird.f32 %v6392_v0 }
 0x287   : > { %2555 = vmatmul.f32.gmra.mxu3 %v2400_v32  ;;  %v949_v36 = vmul.f32 %v6456_v30, %v948_v42  ;;  %4797 = vrsqrt.f32 %v6480_v33  ;;  %v1717_v41 = vmul.f32 %v1716_v22, %v6462_v34  ;;  %v1833_v19 = vmul.f32 %v6495_v61, %v6495_v61 }
 0x288   : > { %v1728_v38 = vmul.f32 %v1727_v60, %v6462_v34  ;;  %v1756_v28 = vadd.f32 0.00028619796, %v1755_v3  ;;  %v1767_v45 = vadd.f32 0.001143296, %v1766_v59  ;;  %v6508_v6 = vmin.f32 %v1793_v18, 16.0 }
 0x289   : > { %vm923_vm1 = vweird.f32 %v6361_v57  ;;  %v941_v15 = vsub.f32 1.5, %v940_v4  ;;  %v6511_v63 = vmul.f32 0.5, %v993_v2  ;;  %v1718_v55 = vadd.f32 0.0036580483, %v1717_v41 }
 0x28a   : > { %v6513_v52 = vmin.f32 %v1833_v19, 16.0  ;;  %v1729_v58 = vadd.f32 0.014752088, %v1728_v38  ;;  %v1757_v16 = vmul.f32 %v1756_v28, %v6487_v1  ;;  %v1768_v27 = vmul.f32 %v1767_v45, %v6487_v1  ;;  %vm925_vm2 = vmor %vm923_vm1, %vm924_vm0 }
 0x28b   : > { %v1795_v29 = vmul.f32 2.1237322e-06, %v6508_v6  ;;  %v6518_v25 = vmul.f32 0.5, %v949_v36  ;;  %v1719_v31 = vmul.f32 %v1718_v55, %v6462_v34  ;;  %v1806_v9 = vmul.f32 3.8918573e-05, %v6508_v6 }
 0x28c   : > { %v1835_v54 = vmul.f32 2.1237322e-06, %v6513_v52  ;;  %v1730_v2 = vmul.f32 %v1729_v58, %v6462_v34  ;;  %v1758_v37 = vadd.f32 0.0036580483, %v1757_v16  ;;  %v1769_v46 = vadd.f32 0.014752088, %v1768_v27 }
 0x28d   : > { %v1796_v43 = vadd.f32 0.00028619796, %v1795_v29  ;;  %v6524_v32 = vpop.eup %4797  ;;  %v959_v44 = vmul.f32 %v6465_v62, %v958_v50  ;;  %v1720_v23 = vadd.f32 0.05243302, %v1719_v31  ;;  %v1807_v49 = vadd.f32 0.001143296, %v1806_v9 }
 0x28e   : > { %v1836_v10 = vadd.f32 0.00028619796, %v1835_v54  ;;  %v1731_v39 = vadd.f32 0.112945676, %v1730_v2  ;;  %v1759_v26 = vmul.f32 %v1758_v37, %v6487_v1  ;;  %v1770_v42 = vmul.f32 %v1769_v46, %v6487_v1  ;;  %v2473_v54 = vpop.f32.mrf.mxu2 }
 0x28f   : > { %v1797_v47 = vmul.f32 %v1796_v43, %v6508_v6  ;;  %v1721_v13 = vmul.f32 %v1720_v23, %v6462_v34  ;;  %v1808_v4 = vmul.f32 %v1807_v49, %v6508_v6  ;;  %v1846_v60 = vmul.f32 3.8918573e-05, %v6513_v52 }
 0x290   : > { %v1837_v22 = vmul.f32 %v1836_v10, %v6513_v52  ;;  %v1732_v50 = vmul.f32 %v1731_v39, %v6462_v34  ;;  %v1760_v3 = vadd.f32 0.05243302, %v1759_v26  ;;  %v1771_v59 = vadd.f32 0.112945676, %v1770_v42  ;;  %v2538_v26 = vpop.f32.mrf.mxu3 }
 0x291   : > { %v1798_v18 = vadd.f32 0.0036580483, %v1797_v47  ;;  %v6536_v36 = vmul.f32 %v6438_v12, %v941_v15  ;;  %v1722_v41 = vadd.f32 0.18741608, %v1721_v13  ;;  %v1809_v19 = vadd.f32 0.014752088, %v1808_v4 }
 0x292   : > { %v1838_v38 = vadd.f32 0.0036580483, %v1837_v22  ;;  %v1733_v28 = vadd.f32 0.4994258, %v1732_v50  ;;  %v1761_v45 = vmul.f32 %v1760_v3, %v6487_v1  ;;  %v1772_v55 = vmul.f32 %v1771_v59, %v6487_v1  ;;  %v8446_v4 = vld [vmem:[#allocation6_spill] sm:$0xff] }
 0x293   : > { %v1799_v58 = vmul.f32 %v1798_v18, %v6508_v6  ;;  %v1723_v16 = vmul.f32 %v1722_v41, %v6462_v34  ;;  %v1810_v15 = vmul.f32 %v1809_v19, %v6508_v6  ;;  %v926_v29 = vsel %vm925_vm2, %v6392_v0, %v6476_v24 }
 0x294   : > { %v1839_v27 = vmul.f32 %v1838_v38, %v6513_v52  ;;  %v1734_v31 = vmul.f32 %v1733_v28, %v6462_v34  ;;  %v1762_v57 = vadd.f32 0.18741608, %v1761_v45  ;;  %v1773_v9 = vadd.f32 0.4994258, %v1772_v55  ;;  %v8447_v28 = vld [vmem:[#allocation7_spill] sm:$0xff] }
 0x295   : > { %v1800_v2 = vadd.f32 0.05243302, %v1799_v58  ;;  %v2474_v37 = vadd.f32 %v6387_v35, %v2473_v54  ;;  %v1811_v46 = vadd.f32 0.112945676, %v1810_v15  ;;  %v1847_v23 = vadd.f32 0.001143296, %v1846_v60 }
 0x296   : > { %v1840_v43 = vadd.f32 0.05243302, %v1839_v27  ;;  %v6552_v49 = vmul.f32 0.5, %v959_v44  ;;  %v6554_v10 = vadd.f32 1.0, %v1734_v31  ;;  %v1774_v39 = vmul.f32 %v1773_v9, %v6487_v1 }
 0x297   : > { %v1801_v0 = vmul.f32 %v1800_v2, %v6508_v6  ;;  %v951_v34 = vsub.f32 1.5, %v6518_v25  ;;  %v6559_v24 = vadd.f32 %v2538_v26, %v2474_v37  ;;  %v1812_v42 = vmul.f32 %v1811_v46, %v6508_v6 }
 0x298   : > { %v1841_v47 = vmul.f32 %v1840_v43, %v6513_v52  ;;  %4799 = vrcp.f32 %v6554_v10  ;;  %v6565_v44 = vmul.f32 0.5, %v6450_v56  ;;  %v1763_v13 = vmul.f32 %v1762_v57, %v6487_v1 }
 0x299   : > { %v6569_v22 = vmul.f32 %v926_v29, %v8446_v4  ;;  %v1724_v60 = vadd.f32 1.1283791, %v1723_v16  ;;  %v6571_v50 = vadd.f32 1.0, %v1774_v39  ;;  %v1802_v3 = vadd.f32 0.18741608, %v1801_v0  ;;  %2585 = vadd.xlane.f32.xlu0 %v6559_v24 }
 0x29a   : > { %v1848_v59 = vmul.f32 %v1847_v23, %v6513_v52  ;;  %vm934_vm3 = vweird.f32 %v6401_v17  ;;  %v961_v18 = vsub.f32 1.5, %v6552_v49  ;;  %v6579_v56 = vmul.f32 %v6524_v32, %v6480_v33 }
 0x29b   : > { %v1813_v1 = vadd.f32 0.4994258, %v1812_v42  ;;  %v1842_v41 = vadd.f32 0.18741608, %v1841_v47  ;;  %v1745_v19 = vand.u32 2147483647, %v6554_v10  ;;  %4801 = vrcp.f32 %v6571_v50 }
 0x29c   : > { %v6584_v38 = vmul.f32 0.5, %v6470_v40  ;;  %v6587_v45 = vmul.f32 %v926_v29, %v8447_v28  ;;  %vm933_vm4 = vweird.f32 %v6367_v14  ;;  %v1747_v55 = vand.u32 2147483648, %v6554_v10 }
 0x29d   : > { %v1764_v58 = vadd.f32 1.1283791, %v1763_v13  ;;  %v1803_v16 = vmul.f32 %v1802_v3, %v6508_v6  ;;  %v1814_v15 = vmul.f32 %v1813_v1, %v6508_v6  ;;  %v1725_v27 = vmul.f32 %v1724_v60, %v6446_v51  ;;  %vm6633_vm10 = vmor %vm933_vm4, %vm934_vm3 }
 0x29e   : > { %v1787_v31 = vand.u32 2147483648, %v6571_v50  ;;  %v1849_v57 = vadd.f32 0.014752088, %v1848_v59  ;;  %v6596_v40 = vmul.f32 0.70710677, %v6569_v22  ;;  %v4800_v9 = vpop.eup %4799  ;;  %vm1741_vm5 = vweird.f32 %v6554_v10 }
 0x29f   : > { %v1785_v29 = vand.u32 2147483647, %v6571_v50  ;;  %v6600_v54 = vadd.f32 1.0, %v1814_v15  ;;  %v1843_v2 = vmul.f32 %v1842_v41, %v6513_v52  ;;  %v1737_v37 = vmul.f32 %v4800_v9, %v6554_v10 }
 0x2a0   : > { %v1804_v6 = vadd.f32 1.1283791, %v1803_v16  ;;  %v1850_v51 = vmul.f32 %v1849_v57, %v6513_v52  ;;  %v1873_v46 = vmul.f32 %v6596_v40, %v6596_v40  ;;  %vm6607_vm6 = vcmp.eq.f32.partialorder %v1745_v19, 8.507059e+37 }
 0x2a1   : > { %v1748_v23 = vor.u32 1.1754944e-38, %v1747_v55  ;;  %v1765_v39 = vmul.f32 %v1764_v58, %v6459_v8  ;;  %4803 = vrcp.f32 %v6600_v54  ;;  %v4802_v26 = vpop.eup %4801  ;;  %v1738_v0 = vsub.f32 1.0, %v1737_v37  ;;  %v2476_v55 = vpop.f32.mrf.mxu2 }
 0x2a2   : > { %vm1781_vm7 = vweird.f32 %v6571_v50  ;;  %v1788_v42 = vor.u32 1.1754944e-38, %v1787_v31  ;;  %v1851_v47 = vadd.f32 0.112945676, %v1850_v51  ;;  %vm1742_vm8 = vweird.f32 %v4800_v9 }
 0x2a3   : > { %v1777_v13 = vmul.f32 %v4802_v26, %v6571_v50  ;;  %vm6615_vm9 = vcmp.eq.f32.partialorder %v1785_v29, 8.507059e+37  ;;  %v1844_v60 = vadd.f32 1.1283791, %v1843_v2  ;;  %v6619_v3 = vmin.f32 %v1873_v46, 16.0  ;;  %vm1743_vm13 = vmor %vm1741_vm5, %vm1742_vm8 }
 0x2a4   : > { %v1739_v59 = vmul.f32 %v4800_v9, %v1738_v0  ;;  %v6622_v8 = vmul.f32 %v1804_v6, %v6490_v48  ;;  %v1825_v1 = vand.u32 2147483647, %v6600_v54  ;;  %v1852_v41 = vmul.f32 %v1851_v47, %v6513_v52  ;;  %v2541_v47 = vpop.f32.mrf.mxu3 }
 0x2a5   : > { %v1778_v19 = vsub.f32 1.0, %v1777_v13  ;;  %v1827_v28 = vand.u32 2147483648, %v6600_v54  ;;  %v1875_v58 = vmul.f32 2.1237322e-06, %v6619_v3  ;;  %v1886_v16 = vmul.f32 3.8918573e-05, %v6619_v3 }
 0x2a6   : > { %v1740_v48 = vadd.f32 %v4800_v9, %v1739_v59  ;;  %vm1782_vm11 = vweird.f32 %v4802_v26  ;;  %vm1821_vm12 = vweird.f32 %v6600_v54  ;;  %v1853_v31 = vadd.f32 0.4994258, %v1852_v41 }
 0x2a7   : > { %v2477_v57 = vadd.f32 %v6387_v35, %v2476_v55  ;;  %v4804_v29 = vpop.eup %4803  ;;  %v1779_v2 = vmul.f32 %v4802_v26, %v1778_v19  ;;  %v1876_v37 = vadd.f32 0.00028619796, %v1875_v58  ;;  %v1887_v6 = vadd.f32 0.001143296, %v1886_v16  ;;  %vm1783_vm14 = vmor %vm1781_vm7, %vm1782_vm11 }
 0x2a8   : > { %v6643_v14 = vmul.f32 0.70710677, %v6587_v45  ;;  %v1744_v51 = vsel %vm1743_vm13, %v4800_v9, %v1740_v48  ;;  %v1817_v46 = vmul.f32 %v4804_v29, %v6600_v54  ;;  %v1854_v0 = vmul.f32 %v1853_v31, %v6513_v52  ;;  %v8456_v48 = vld [vmem:[#allocation8_spill] sm:$0xff] }
 0x2a9   : > { %v6651_v13 = vsel %vm6633_vm10, %v6401_v17, %v6484_v7  ;;  %v1749_v10 = vsel %vm6607_vm6, %v1748_v23, %v1744_v51  ;;  %v1780_v59 = vadd.f32 %v4802_v26, %v1779_v2  ;;  %v6655_v41 = vadd.f32 %v2541_v47, %v2477_v57 }
 0x2aa   : > { %v1877_v19 = vmul.f32 %v1876_v37, %v6619_v3  ;;  %v1750_v9 = vmul.f32 %v1749_v10, %v1725_v27  ;;  %v1818_v52 = vsub.f32 1.0, %v1817_v46  ;;  %v6661_v55 = vadd.f32 1.0, %v1854_v0 }
 0x2ab   : > { %v1888_v58 = vmul.f32 %v1887_v6, %v6619_v3  ;;  %v1784_v17 = vsel %vm1783_vm14, %v4802_v26, %v1780_v59  ;;  %vm1822_vm15 = vweird.f32 %v4804_v29  ;;  %v1913_v43 = vmul.f32 %v6643_v14, %v6643_v14  ;;  %2587 = vadd.xlane.f32.xlu1 %v6655_v41 }
 0x2ac   : > { %v1878_v7 = vadd.f32 0.0036580483, %v1877_v19  ;;  %v4482_v23 = vclamps-f32 %v1750_v9, 1.0  ;;  %v1789_v27 = vsel %vm6615_vm9, %v1788_v42, %v1784_v17  ;;  %v1819_v16 = vmul.f32 %v4804_v29, %v1818_v52  ;;  %vm1823_vm1 = vmor %vm1821_vm12, %vm1822_vm15 }
 0x2ad   : > { %4805 = vrcp.f32 %v6661_v55  ;;  %v1790_v50 = vmul.f32 %v1789_v27, %v1765_v39  ;;  %vm6670_vm0 = vcmp.eq.f32.partialorder %v1825_v1, 8.507059e+37  ;;  %v6675_v26 = vmul.f32 %v1844_v60, %v6495_v61 }
 0x2ae   : > { %v6679_v31 = vmul.f32 %v6651_v13, %v8456_v48  ;;  %v2369_v57 = vadd.f32 1.0, %v4482_v23  ;;  %v1820_v2 = vadd.f32 %v4804_v29, %v1819_v16  ;;  %v1879_v4 = vmul.f32 %v1878_v7, %v6619_v3 }
 0x2af   : > { %v1889_v42 = vadd.f32 0.014752088, %v1888_v58  ;;  %v4483_v37 = vclamps-f32 %v1790_v50, 1.0  ;;  %v1828_v39 = vor.u32 1.1754944e-38, %v1827_v28  ;;  %v1865_v1 = vand.u32 2147483647, %v6661_v55 }
 0x2b0   : > { %v6686_v6 = vmin.f32 %v1913_v43, 16.0  ;;  %v2401_v61 = vmul.f32 %v2369_v57, %v6511_v63  ;;  %v1824_v60 = vsel %vm1823_vm1, %v4804_v29, %v1820_v2  ;;  %v1880_v51 = vadd.f32 0.05243302, %v1879_v4  ;;  %v8459_v2 = vld [vmem:[#allocation9_spill] sm:$0xff] }
 0x2b1   : > { %v1890_v46 = vmul.f32 %v1889_v42, %v6619_v3  ;;  %v2370_v0 = vadd.f32 1.0, %v4483_v37  ;;  %v1829_v47 = vsel %vm6670_vm0, %v1828_v39, %v1824_v60  ;;  %vm1861_vm2 = vweird.f32 %v6661_v55 }
 0x2b2   : > { %v1915_v54 = vmul.f32 2.1237322e-06, %v6686_v6  ;;  %v1926_v28 = vmul.f32 3.8918573e-05, %v6686_v6  ;;  %2493 = vmatmul.f32.gmra.mxu2 %v2401_v61  ;;  %v1830_v59 = vmul.f32 %v1829_v47, %v6622_v8  ;;  %v1881_v63 = vmul.f32 %v1880_v51, %v6619_v3 }
 0x2b3   : > { %v4806_v10 = vpop.eup %4805  ;;  %v1891_v29 = vadd.f32 0.112945676, %v1890_v46  ;;  %v6698_v19 = vmul.f32 0.70710677, %v6679_v31  ;;  %v2402_v9 = vmul.f32 %v2370_v0, %v6565_v44  ;;  %v1867_v58 = vand.u32 2147483648, %v6661_v55 }
 0x2b4   : > { %v1857_v52 = vmul.f32 %v4806_v10, %v6661_v55  ;;  %v1916_v17 = vadd.f32 0.00028619796, %v1915_v54  ;;  %vm944_vm3 = vweird.f32 %v6438_v12  ;;  %v4484_v7 = vclamps-f32 %v1830_v59, 1.0 }
 0x2b5   : > { %vm6704_vm4 = vcmp.eq.f32.partialorder %v1865_v1, 8.507059e+37  ;;  %v1892_v8 = vmul.f32 %v1891_v29, %v6619_v3  ;;  %v1927_v23 = vadd.f32 0.001143296, %v1926_v28  ;;  %2558 = vmatmul.f32.gmra.mxu3 %v2402_v9  ;;  %v1882_v16 = vadd.f32 0.18741608, %v1881_v63 }
 0x2b6   : > { %v1858_v27 = vsub.f32 1.0, %v1857_v52  ;;  %v1917_v44 = vmul.f32 %v1916_v17, %v6686_v6  ;;  %v1953_v50 = vmul.f32 %v6698_v19, %v6698_v19  ;;  %vm943_vm5 = vweird.f32 %v6399_v5 }
 0x2b7   : > { %v2371_v15 = vadd.f32 1.0, %v4484_v7  ;;  %v1893_v48 = vadd.f32 0.4994258, %v1892_v8  ;;  %v1928_v57 = vmul.f32 %v1927_v23, %v6686_v6  ;;  %v6716_v4 = vmul.f32 %v6651_v13, %v8459_v2  ;;  %vm945_vm8 = vmor %vm943_vm5, %vm944_vm3 }
 0x2b8   : > { %v1859_v42 = vmul.f32 %v4806_v10, %v1858_v27  ;;  %vm1862_vm6 = vweird.f32 %v4806_v10  ;;  %v1918_v37 = vadd.f32 0.0036580483, %v1917_v44  ;;  %v6718_v39 = vmin.f32 %v1953_v50, 16.0 }
 0x2b9   : > { %v2403_v1 = vmul.f32 %v2371_v15, %v6584_v38  ;;  %v1868_v61 = vor.u32 1.1754944e-38, %v1867_v58  ;;  %v1894_v60 = vmul.f32 %v1893_v48, %v6619_v3  ;;  %v1929_v51 = vadd.f32 0.014752088, %v1928_v57  ;;  %vm1863_vm7 = vmor %vm1861_vm2, %vm1862_vm6  ;;  %v2479_v57 = vpop.f32.mrf.mxu2 }
 0x2ba   : > { %v1860_v46 = vadd.f32 %v4806_v10, %v1859_v42  ;;  %v1919_v0 = vmul.f32 %v1918_v37, %v6686_v6  ;;  %v1955_v47 = vmul.f32 2.1237322e-06, %v6718_v39  ;;  %v1966_v54 = vmul.f32 3.8918573e-05, %v6718_v39 }
 0x2bb   : > { %2496 = vmatmul.f32.gmra.mxu2 %v2403_v1  ;;  %v1883_v13 = vmul.f32 %v1882_v16, %v6619_v3  ;;  %v6728_v28 = vadd.f32 1.0, %v1894_v60  ;;  %v1930_v38 = vmul.f32 %v1929_v51, %v6686_v6  ;;  %v6732_v59 = vmul.f32 0.70710677, %v6716_v4 }
 0x2bc   : > { %v1864_v63 = vsel %vm1863_vm7, %v4806_v10, %v1860_v46  ;;  %v1920_v29 = vadd.f32 0.05243302, %v1919_v0  ;;  %v1956_v9 = vadd.f32 0.00028619796, %v1955_v47  ;;  %v1967_v52 = vadd.f32 0.001143296, %v1966_v54 }
 0x2bd   : > { %v6737_v58 = vmul.f32 %v6456_v30, %v951_v34  ;;  %v6742_v3 = vmul.f32 %v6465_v62, %v961_v18  ;;  %v1869_v55 = vsel %vm6704_vm4, %v1868_v61, %v1864_v63  ;;  %4807 = vrcp.f32 %v6728_v28  ;;  %v8460_v46 = vld [vmem:[#allocation10_spill] sm:$0xff] }
 0x2be   : > { %v969_v10 = vmul.f32 %v6524_v32, %v6579_v56  ;;  %v1870_v17 = vmul.f32 %v1869_v55, %v6675_v26  ;;  %v1921_v25 = vmul.f32 %v1920_v29, %v6686_v6  ;;  %v1931_v7 = vadd.f32 0.112945676, %v1930_v38 }
 0x2bf   : > { %v1028_v34 = vmul.f32 0.5, %v6473_v20  ;;  %v1957_v49 = vmul.f32 %v1956_v9, %v6718_v39  ;;  %v1968_v18 = vmul.f32 %v1967_v52, %v6718_v39  ;;  %v1993_v43 = vmul.f32 %v6732_v59, %v6732_v59 }
 0x2c0   : > { %v4485_v56 = vclamps-f32 %v1870_v17, 1.0  ;;  %v1884_v8 = vadd.f32 1.1283791, %v1883_v13  ;;  %v1905_v26 = vand.u32 2147483647, %v6728_v28  ;;  %v1932_v23 = vmul.f32 %v1931_v7, %v6686_v6 }
 0x2c1   : > { %v1958_v27 = vadd.f32 0.0036580483, %v1957_v49  ;;  %v1969_v20 = vadd.f32 0.014752088, %v1968_v18  ;;  %v6762_v16 = vmin.f32 %v1993_v43, 16.0  ;;  %v6766_v44 = vsel %vm945_vm8, %v6438_v12, %v6536_v36  ;;  %v2544_v36 = vpop.f32.mrf.mxu3 }
 0x2c2   : > { %v6768_v50 = vmul.f32 0.5, %v969_v10  ;;  %v2372_v15 = vadd.f32 1.0, %v4485_v56  ;;  %v1922_v48 = vadd.f32 0.18741608, %v1921_v25  ;;  %v1933_v5 = vadd.f32 0.4994258, %v1932_v23 }
 0x2c3   : > { %v4808_v2 = vpop.eup %4807  ;;  %v2480_v42 = vadd.f32 %v6387_v35, %v2479_v57  ;;  %v1959_v37 = vmul.f32 %v1958_v27, %v6718_v39  ;;  %v1970_v1 = vmul.f32 %v1969_v20, %v6718_v39  ;;  %v1995_v61 = vmul.f32 2.1237322e-06, %v6762_v16 }
 0x2c4   : > { %v2404_v60 = vmul.f32 %v2372_v15, %v1028_v34  ;;  %v1897_v51 = vmul.f32 %v4808_v2, %v6728_v28  ;;  %v1907_v12 = vand.u32 2147483648, %v6728_v28  ;;  %v6778_v0 = vmul.f32 %v6766_v44, %v8460_v46 }
 0x2c5   : > { %v1934_v47 = vmul.f32 %v1933_v5, %v6686_v6  ;;  %v6781_v54 = vadd.f32 %v2544_v36, %v2480_v42  ;;  %v1960_v13 = vadd.f32 0.05243302, %v1959_v37  ;;  %v1971_v38 = vadd.f32 0.112945676, %v1970_v1 }
 0x2c6   : > { %2561 = vmatmul.f32.gmra.mxu3 %v2404_v60  ;;  %v1898_v63 = vsub.f32 1.0, %v1897_v51  ;;  %v1923_v29 = vmul.f32 %v1922_v48, %v6686_v6  ;;  %v1996_v9 = vadd.f32 0.00028619796, %v1995_v61  ;;  %v2006_v52 = vmul.f32 3.8918573e-05, %v6762_v16 }
 0x2c7   : > { %vm1902_vm9 = vweird.f32 %v4808_v2  ;;  %v6785_v55 = vadd.f32 1.0, %v1934_v47  ;;  %v1961_v10 = vmul.f32 %v1960_v13, %v6718_v39  ;;  %v1972_v17 = vmul.f32 %v1971_v38, %v6718_v39  ;;  %2589 = vadd.xlane.f32.xlu2 %v6781_v54 }
 0x2c8   : > { %v1899_v25 = vmul.f32 %v4808_v2, %v1898_v63  ;;  %v1997_v7 = vmul.f32 %v1996_v9, %v6762_v16  ;;  %v2007_v34 = vadd.f32 0.001143296, %v2006_v52  ;;  %v6792_v49 = vmul.f32 0.70710677, %v6778_v0  ;;  %v8461_v63 = vld [vmem:[#allocation11_spill] sm:$0xff] }
 0x2c9   : > { %vm954_vm10 = vweird.f32 %v6456_v30  ;;  %v971_v6 = vsub.f32 1.5, %v6768_v50  ;;  %v1885_v18 = vmul.f32 %v1884_v8, %v6596_v40  ;;  %vm1901_vm11 = vweird.f32 %v6728_v28 }
 0x2ca   : > { %4809 = vrcp.f32 %v6785_v55  ;;  %v1900_v43 = vadd.f32 %v4808_v2, %v1899_v25  ;;  %v1962_v56 = vadd.f32 0.18741608, %v1961_v10  ;;  %v1973_v23 = vadd.f32 0.4994258, %v1972_v17  ;;  %vm1903_vm13 = vmor %vm1901_vm11, %vm1902_vm9 }
 0x2cb   : > { %v1998_v27 = vadd.f32 0.0036580483, %v1997_v7  ;;  %vm953_vm12 = vweird.f32 %v6425_v21  ;;  %vm1906_vm14 = vcmp.eq.f32.partialorder %v1905_v26, 8.507059e+37  ;;  %v1908_v20 = vor.u32 1.1754944e-38, %v1907_v12 }
 0x2cc   : > { %v2008_v15 = vmul.f32 %v2007_v34, %v6762_v16  ;;  %v2033_v48 = vmul.f32 %v6792_v49, %v6792_v49  ;;  %v1904_v40 = vsel %vm1903_vm13, %v4808_v2, %v1900_v43  ;;  %v1924_v8 = vadd.f32 1.1283791, %v1923_v29  ;;  %vm955_vm2 = vmor %vm953_vm12, %vm954_vm10 }
 0x2cd   : > { %v1974_v28 = vmul.f32 %v1973_v23, %v6718_v39  ;;  %v1999_v5 = vmul.f32 %v1998_v27, %v6762_v16  ;;  %v1029_v57 = vmul.f32 0.5, %v6569_v22  ;;  %v1909_v42 = vsel %vm1906_vm14, %v1908_v20, %v1904_v40 }
 0x2ce   : > { %v2009_v37 = vadd.f32 0.014752088, %v2008_v15  ;;  %v6807_v1 = vmin.f32 %v2033_v48, 16.0  ;;  %v1910_v61 = vmul.f32 %v1909_v42, %v1885_v18  ;;  %v6810_v26 = vmul.f32 0.5, %v6587_v45 }
 0x2cf   : > { %v1963_v60 = vmul.f32 %v1962_v56, %v6718_v39  ;;  %v6813_v51 = vadd.f32 1.0, %v1974_v28  ;;  %v1945_v12 = vand.u32 2147483647, %v6785_v55  ;;  %v1925_v13 = vmul.f32 %v1924_v8, %v6643_v14  ;;  %v2482_v8 = vpop.f32.mrf.mxu2 }
 0x2d0   : > { %v4810_v2 = vpop.eup %4809  ;;  %v2010_v36 = vmul.f32 %v2009_v37, %v6762_v16  ;;  %v2035_v46 = vmul.f32 2.1237322e-06, %v6807_v1  ;;  %v2046_v22 = vmul.f32 3.8918573e-05, %v6807_v1  ;;  %v4486_v47 = vclamps-f32 %v1910_v61, 1.0 }
 0x2d1   : > { %v1937_v38 = vmul.f32 %v4810_v2, %v6785_v55  ;;  %v2000_v45 = vadd.f32 0.05243302, %v1999_v5  ;;  %vm1941_vm15 = vweird.f32 %v6785_v55  ;;  %v1947_v39 = vand.u32 2147483648, %v6785_v55 }
 0x2d2   : > { %4811 = vrcp.f32 %v6813_v51  ;;  %v6826_v29 = vmul.f32 %v6766_v44, %v8461_v63  ;;  %v2373_v9 = vadd.f32 1.0, %v4486_v47  ;;  %v1964_v10 = vadd.f32 1.1283791, %v1963_v60  ;;  %v2547_v60 = vpop.f32.mrf.mxu3 }
 0x2d3   : > { %v1938_v52 = vsub.f32 1.0, %v1937_v38  ;;  %v2011_v17 = vadd.f32 0.112945676, %v2010_v36  ;;  %vm1942_vm0 = vweird.f32 %v4810_v2  ;;  %vm6828_vm1 = vcmp.eq.f32.partialorder %v1945_v12, 8.507059e+37 }
 0x2d4   : > { %v2036_v25 = vadd.f32 0.00028619796, %v2035_v46  ;;  %v2047_v7 = vadd.f32 0.001143296, %v2046_v22  ;;  %v2405_v34 = vmul.f32 %v2373_v9, %v1029_v57  ;;  %v2001_v44 = vmul.f32 %v2000_v45, %v6762_v16  ;;  %vm1943_vm3 = vmor %vm1941_vm15, %vm1942_vm0 }
 0x2d5   : > { %v1939_v18 = vmul.f32 %v4810_v2, %v1938_v52  ;;  %v2012_v43 = vmul.f32 %v2011_v17, %v6762_v16  ;;  %v6841_v27 = vmul.f32 0.70710677, %v6826_v29  ;;  %v6845_v20 = vsel %vm955_vm2, %v6456_v30, %v6737_v58 }
 0x2d6   : > { %v2037_v56 = vmul.f32 %v2036_v25, %v6807_v1  ;;  %v2048_v23 = vmul.f32 %v2047_v7, %v6807_v1  ;;  %2499 = vmatmul.f32.gmra.mxu2 %v2405_v34  ;;  %v1948_v15 = vor.u32 1.1754944e-38, %v1947_v39  ;;  %v1965_v48 = vmul.f32 %v1964_v10, %v6698_v19  ;;  %v8464_v19 = vld [vmem:[#allocation12_spill] sm:$0xff] }
 0x2d7   : > { %v1940_v21 = vadd.f32 %v4810_v2, %v1939_v18  ;;  %v2013_v40 = vadd.f32 0.4994258, %v2012_v43  ;;  %v2483_v5 = vadd.f32 %v6387_v35, %v2482_v8  ;;  %v2073_v30 = vmul.f32 %v6841_v27, %v6841_v27 }
 0x2d8   : > { %v4812_v28 = vpop.eup %4811  ;;  %v2038_v57 = vadd.f32 0.0036580483, %v2037_v56  ;;  %v2049_v42 = vadd.f32 0.014752088, %v2048_v23  ;;  %v2002_v61 = vadd.f32 0.18741608, %v2001_v44  ;;  %v6857_v12 = vmul.f32 %v6845_v20, %v8464_v19 }
 0x2d9   : > { %v1944_v58 = vsel %vm1943_vm3, %v4810_v2, %v1940_v21  ;;  %v1977_v37 = vmul.f32 %v4812_v28, %v6813_v51  ;;  %v2014_v36 = vmul.f32 %v2013_v40, %v6762_v16  ;;  %v6862_v35 = vadd.f32 %v2547_v60, %v2483_v5 }
 0x2da   : > { %v1949_v55 = vsel %vm6828_vm1, %v1948_v15, %v1944_v58  ;;  %v2039_v46 = vmul.f32 %v2038_v57, %v6807_v1  ;;  %v1985_v2 = vand.u32 2147483647, %v6813_v51  ;;  %v2050_v38 = vmul.f32 %v2049_v42, %v6807_v1 }
 0x2db   : > { %v1950_v22 = vmul.f32 %v1949_v55, %v1925_v13  ;;  %v1978_v47 = vsub.f32 1.0, %v1977_v37  ;;  %v1987_v45 = vand.u32 2147483648, %v6813_v51  ;;  %v6868_v39 = vadd.f32 1.0, %v2014_v36  ;;  %2591 = vadd.xlane.f32.xlu0 %v6862_v35 }
 0x2dc   : > { %v2040_v63 = vadd.f32 0.05243302, %v2039_v46  ;;  %v6870_v9 = vmin.f32 %v2073_v30, 16.0  ;;  %vm1982_vm4 = vweird.f32 %v4812_v28  ;;  %v2051_v17 = vadd.f32 0.112945676, %v2050_v38 }
 0x2dd   : > { %v4487_v52 = vclamps-f32 %v1950_v22, 1.0  ;;  %v1979_v10 = vmul.f32 %v4812_v28, %v1978_v47  ;;  %vm1981_vm5 = vweird.f32 %v6813_v51  ;;  %v2003_v13 = vmul.f32 %v2002_v61, %v6762_v16 }
 0x2de   : > { %4813 = vrcp.f32 %v6868_v39  ;;  %v6877_v14 = vmul.f32 0.70710677, %v6857_v12  ;;  %v2041_v34 = vmul.f32 %v2040_v63, %v6807_v1  ;;  %v2052_v18 = vmul.f32 %v2051_v17, %v6807_v1  ;;  %vm1983_vm7 = vmor %vm1981_vm5, %vm1982_vm4 }
 0x2df   : > { %v2374_v25 = vadd.f32 1.0, %v4487_v52  ;;  %v1980_v7 = vadd.f32 %v4812_v28, %v1979_v10  ;;  %vm964_vm6 = vweird.f32 %v6465_v62  ;;  %vm1986_vm8 = vcmp.eq.f32.partialorder %v1985_v2, 8.507059e+37 }
 0x2e0   : > { %v1988_v44 = vor.u32 1.1754944e-38, %v1987_v45  ;;  %v2075_v51 = vmul.f32 2.1237322e-06, %v6870_v9  ;;  %v2086_v16 = vmul.f32 3.8918573e-05, %v6870_v9  ;;  %vm963_vm9 = vweird.f32 %v6434_v53  ;;  %v8465_v45 = vld [vmem:[#allocation13_spill] sm:$0xff] }
 0x2e1   : > { %v2406_v43 = vmul.f32 %v2374_v25, %v6810_v26  ;;  %v1984_v56 = vsel %vm1983_vm7, %v4812_v28, %v1980_v7  ;;  %v2042_v23 = vadd.f32 0.18741608, %v2041_v34  ;;  %v2053_v21 = vadd.f32 0.4994258, %v2052_v18  ;;  %vm965_vm13 = vmor %vm963_vm9, %vm964_vm6 }
 0x2e2   : > { %v1989_v15 = vsel %vm1986_vm8, %v1988_v44, %v1984_v56  ;;  %v2076_v40 = vadd.f32 0.00028619796, %v2075_v51  ;;  %v2087_v8 = vadd.f32 0.001143296, %v2086_v16  ;;  %v2113_v5 = vmul.f32 %v6877_v14, %v6877_v14 }
 0x2e3   : > { %2564 = vmatmul.f32.gmra.mxu3 %v2406_v43  ;;  %v1031_v57 = vmul.f32 0.5, %v6679_v31  ;;  %v1990_v42 = vmul.f32 %v1989_v15, %v1965_v48  ;;  %v2004_v30 = vadd.f32 1.1283791, %v2003_v13  ;;  %v2054_v58 = vmul.f32 %v2053_v21, %v6807_v1 }
 0x2e4   : > { %v4814_v37 = vpop.eup %4813  ;;  %v2043_v26 = vmul.f32 %v2042_v23, %v6807_v1  ;;  %v2077_v28 = vmul.f32 %v2076_v40, %v6870_v9  ;;  %v2088_v61 = vmul.f32 %v2087_v8, %v6870_v9  ;;  %v6893_v60 = vmin.f32 %v2113_v5, 16.0 }
 0x2e5   : > { %v4488_v19 = vclamps-f32 %v1990_v42, 1.0  ;;  %v6896_v55 = vmul.f32 0.5, %v6716_v4  ;;  %v2017_v36 = vmul.f32 %v4814_v37, %v6868_v39  ;;  %v2025_v31 = vand.u32 2147483647, %v6868_v39 }
 0x2e6   : > { %v2027_v48 = vand.u32 2147483648, %v6868_v39  ;;  %v6901_v46 = vadd.f32 1.0, %v2054_v58  ;;  %v2078_v22 = vadd.f32 0.0036580483, %v2077_v28  ;;  %v2089_v1 = vadd.f32 0.014752088, %v2088_v61 }
 0x2e7   : > { %v2375_v47 = vadd.f32 1.0, %v4488_v19  ;;  %v2018_v2 = vsub.f32 1.0, %v2017_v36  ;;  %v2115_v38 = vmul.f32 2.1237322e-06, %v6893_v60  ;;  %v6906_v63 = vmul.f32 %v6845_v20, %v8465_v45 }
 0x2e8   : > { %v2005_v4 = vmul.f32 %v2004_v30, %v6732_v59  ;;  %vm2022_vm10 = vweird.f32 %v4814_v37  ;;  %v2044_v52 = vadd.f32 1.1283791, %v2043_v26  ;;  %4815 = vrcp.f32 %v6901_v46  ;;  %v2485_v30 = vpop.f32.mrf.mxu2 }
 0x2e9   : > { %v2407_v10 = vmul.f32 %v2375_v47, %v1031_v57  ;;  %v2019_v17 = vmul.f32 %v4814_v37, %v2018_v2  ;;  %v2079_v13 = vmul.f32 %v2078_v22, %v6870_v9  ;;  %v2090_v25 = vmul.f32 %v2089_v1, %v6870_v9 }
 0x2ea   : > { %vm2021_vm11 = vweird.f32 %v6868_v39  ;;  %vm6913_vm12 = vcmp.eq.f32.partialorder %v2025_v31, 8.507059e+37  ;;  %v2116_v20 = vadd.f32 0.00028619796, %v2115_v38  ;;  %v2126_v34 = vmul.f32 3.8918573e-05, %v6893_v60 }
 0x2eb   : > { %2502 = vmatmul.f32.gmra.mxu2 %v2407_v10  ;;  %v2020_v59 = vadd.f32 %v4814_v37, %v2019_v17  ;;  %v2028_v18 = vor.u32 1.1754944e-38, %v2027_v48  ;;  %v2091_v44 = vadd.f32 0.112945676, %v2090_v25  ;;  %v6923_v51 = vmul.f32 0.70710677, %v6906_v63  ;;  %vm2023_vm14 = vmor %vm2021_vm11, %vm2022_vm10  ;;  %v2550_v48 = vpop.f32.mrf.mxu3 }
 0x2ec   : > { %v2045_v39 = vmul.f32 %v2044_v52, %v6792_v49  ;;  %v2117_v16 = vmul.f32 %v2116_v20, %v6893_v60  ;;  %v2127_v43 = vadd.f32 0.001143296, %v2126_v34  ;;  %v966_v56 = vsel %vm965_vm13, %v6465_v62, %v6742_v3 }
 0x2ed   : > { %v2024_v23 = vsel %vm2023_vm14, %v4814_v37, %v2020_v59  ;;  %v2080_v53 = vadd.f32 0.05243302, %v2079_v13  ;;  %v2092_v21 = vmul.f32 %v2091_v44, %v6870_v9  ;;  %v2153_v15 = vmul.f32 %v6923_v51, %v6923_v51  ;;  %v6943_v37 = vld [vmem:[%s8388_s4] ss:$0 sm:$0xff]  ;;  %v8470_v44 = vld [vmem:[#allocation14_spill] sm:$0xff] }
 0x2ee   : > { %v4816_v40 = vpop.eup %4815  ;;  %v2029_v8 = vsel %vm6913_vm12, %v2028_v18, %v2024_v23  ;;  %vm2061_vm15 = vweird.f32 %v6901_v46  ;;  %v2118_v49 = vadd.f32 0.0036580483, %v2117_v16  ;;  %v2128_v5 = vmul.f32 %v2127_v43, %v6893_v60  ;;  %v8471_v43 = vld [vmem:[#allocation15_spill] sm:$0xff] }
 0x2ef   : > { %v2030_v57 = vmul.f32 %v2029_v8, %v2005_v4  ;;  %v2057_v42 = vmul.f32 %v4816_v40, %v6901_v46  ;;  %v2065_v62 = vand.u32 2147483647, %v6901_v46  ;;  %v2067_v3 = vand.u32 2147483648, %v6901_v46 }
 0x2f0   : > { %v2093_v58 = vadd.f32 0.4994258, %v2092_v21  ;;  %v2486_v26 = vadd.f32 %v6943_v37, %v2485_v30  ;;  %v2119_v28 = vmul.f32 %v2118_v49, %v6893_v60  ;;  %v2129_v61 = vadd.f32 0.014752088, %v2128_v5 }
 0x2f1   : > { %v4489_v19 = vclamps-f32 %v2030_v57, 1.0  ;;  %v2058_v36 = vsub.f32 1.0, %v2057_v42  ;;  %v2081_v31 = vmul.f32 %v2080_v53, %v6870_v9  ;;  %v6948_v22 = vmin.f32 %v2153_v15, 16.0 }
 0x2f2   : > { %vm2062_vm0 = vweird.f32 %v4816_v40  ;;  %v2094_v1 = vmul.f32 %v2093_v58, %v6870_v9  ;;  %v6951_v47 = vadd.f32 %v2550_v48, %v2486_v26  ;;  %v2130_v2 = vmul.f32 %v2129_v61, %v6893_v60 }
 0x2f3   : > { %v2376_v38 = vadd.f32 1.0, %v4489_v19  ;;  %v2059_v45 = vmul.f32 %v4816_v40, %v2058_v36  ;;  %v2120_v4 = vadd.f32 0.05243302, %v2119_v28  ;;  %v2155_v52 = vmul.f32 2.1237322e-06, %v6948_v22  ;;  %vm2063_vm2 = vmor %vm2061_vm15, %vm2062_vm0 }
 0x2f4   : > { %vm6955_vm1 = vcmp.eq.f32.partialorder %v2065_v62, 8.507059e+37  ;;  %v6959_v17 = vadd.f32 1.0, %v2094_v1  ;;  %v2131_v13 = vadd.f32 0.112945676, %v2130_v2  ;;  %v2166_v25 = vmul.f32 3.8918573e-05, %v6948_v22  ;;  %2593 = vadd.xlane.f32.xlu1 %v6951_v47 }
 0x2f5   : > { %v2408_v7 = vmul.f32 %v2376_v38, %v6896_v55  ;;  %v2060_v20 = vadd.f32 %v4816_v40, %v2059_v45  ;;  %v2068_v34 = vor.u32 1.1754944e-38, %v2067_v3  ;;  %v2156_v59 = vadd.f32 0.00028619796, %v2155_v52 }
 0x2f6   : > { %v2082_v18 = vadd.f32 0.18741608, %v2081_v31  ;;  %4817 = vrcp.f32 %v6959_v17  ;;  %v6969_v16 = vmul.f32 %v966_v56, %v8470_v44  ;;  %v6972_v23 = vmul.f32 %v966_v56, %v8471_v43 }
 0x2f7   : > { %2567 = vmatmul.f32.gmra.mxu3 %v2408_v7  ;;  %v2064_v53 = vsel %vm2063_vm2, %v4816_v40, %v2060_v20  ;;  %v2121_v55 = vmul.f32 %v2120_v4, %v6893_v60  ;;  %v2132_v21 = vmul.f32 %v2131_v13, %v6893_v60  ;;  %v2157_v15 = vmul.f32 %v2156_v59, %v6948_v22 }
 0x2f8   : > { %v2069_v46 = vsel %vm6955_vm1, %v2068_v34, %v2064_v53  ;;  %v2167_v8 = vadd.f32 0.001143296, %v2166_v25  ;;  %v2083_v42 = vmul.f32 %v2082_v18, %v6870_v9  ;;  %v6982_v62 = vmul.f32 0.70710677, %v6969_v16 }
 0x2f9   : > { %v2070_v49 = vmul.f32 %v2069_v46, %v2045_v39  ;;  %v2133_v5 = vadd.f32 0.4994258, %v2132_v21  ;;  %v2158_v57 = vadd.f32 0.0036580483, %v2157_v15  ;;  %v6985_v40 = vmul.f32 0.70710677, %v6972_v23 }
 0x2fa   : > { %v2168_v56 = vmul.f32 %v2167_v8, %v6948_v22  ;;  %v972_v3 = vmul.f32 %v6524_v32, %v971_v6  ;;  %vm974_vm3 = vweird.f32 %v6524_v32  ;;  %v2122_v39 = vadd.f32 0.18741608, %v2121_v55  ;;  %v2488_v8 = vpop.f32.mrf.mxu2 }
 0x2fb   : > { %v4490_v30 = vclamps-f32 %v2070_v49, 1.0  ;;  %v2134_v58 = vmul.f32 %v2133_v5, %v6893_v60  ;;  %v2159_v9 = vmul.f32 %v2158_v57, %v6948_v22  ;;  %v2193_v61 = vmul.f32 %v6982_v62, %v6982_v62 }
 0x2fc   : > { %v4818_v26 = vpop.eup %4817  ;;  %v2169_v28 = vadd.f32 0.014752088, %v2168_v56  ;;  %v2233_v19 = vmul.f32 %v6985_v40, %v6985_v40  ;;  %vm973_vm4 = vweird.f32 %v6480_v33  ;;  %v1033_v50 = vmul.f32 0.5, %v6778_v0 }
 0x2fd   : > { %v2377_v6 = vadd.f32 1.0, %v4490_v30  ;;  %v7000_v36 = vmul.f32 0.5, %v6826_v29  ;;  %v2097_v31 = vmul.f32 %v4818_v26, %v6959_v17  ;;  %v2084_v48 = vadd.f32 1.1283791, %v2083_v42  ;;  %vm975_vm9 = vmor %vm973_vm4, %vm974_vm3 }
 0x2fe   : > { %v7003_v1 = vadd.f32 1.0, %v2134_v58  ;;  %v2170_v2 = vmul.f32 %v2169_v28, %v6948_v22  ;;  %v7006_v38 = vmin.f32 %v2193_v61, 16.0  ;;  %v2105_v52 = vand.u32 2147483647, %v6959_v17  ;;  %v2553_v28 = vpop.f32.mrf.mxu3 }
 0x2ff   : > { %v2409_v45 = vmul.f32 %v2377_v6, %v1033_v50  ;;  %v2098_v4 = vsub.f32 1.0, %v2097_v31  ;;  %v7009_v10 = vmin.f32 %v2233_v19, 16.0  ;;  %v2107_v0 = vand.u32 2147483648, %v6959_v17 }
 0x300   : > { %v2123_v29 = vmul.f32 %v2122_v39, %v6893_v60  ;;  %4819 = vrcp.f32 %v7003_v1  ;;  %v2160_v13 = vadd.f32 0.05243302, %v2159_v9  ;;  %vm2102_vm5 = vweird.f32 %v4818_v26 }
 0x301   : > { %2505 = vmatmul.f32.gmra.mxu2 %v2409_v45  ;;  %v2099_v25 = vmul.f32 %v4818_v26, %v2098_v4  ;;  %v2171_v7 = vadd.f32 0.112945676, %v2170_v2  ;;  %v2195_v20 = vmul.f32 2.1237322e-06, %v7006_v38  ;;  %v2085_v34 = vmul.f32 %v2084_v48, %v6841_v27 }
 0x302   : > { %vm2101_vm6 = vweird.f32 %v6959_v17  ;;  %v2206_v59 = vmul.f32 3.8918573e-05, %v7006_v38  ;;  %v2235_v18 = vmul.f32 2.1237322e-06, %v7009_v10  ;;  %vm7019_vm7 = vcmp.eq.f32.partialorder %v2105_v52, 8.507059e+37 }
 0x303   : > { %v2100_v44 = vadd.f32 %v4818_v26, %v2099_v25  ;;  %v2172_v43 = vmul.f32 %v2171_v7, %v6948_v22  ;;  %v2196_v53 = vadd.f32 0.00028619796, %v2195_v20  ;;  %vm2103_vm8 = vmor %vm2101_vm6, %vm2102_vm5  ;;  %v2108_v55 = vor.u32 1.1754944e-38, %v2107_v0 }
 0x304   : > { %v2124_v21 = vadd.f32 1.1283791, %v2123_v29  ;;  %v2161_v15 = vmul.f32 %v2160_v13, %v6948_v22  ;;  %v2207_v27 = vadd.f32 0.001143296, %v2206_v59  ;;  %v2236_v5 = vadd.f32 0.00028619796, %v2235_v18 }
 0x305   : > { %v2104_v46 = vsel %vm2103_vm8, %v4818_v26, %v2100_v44  ;;  %v2173_v17 = vadd.f32 0.4994258, %v2172_v43  ;;  %v2197_v49 = vmul.f32 %v2196_v53, %v7006_v38  ;;  %v2489_v56 = vadd.f32 %v6943_v37, %v2488_v8  ;;  %v8474_v13 = vld [vmem:[#allocation16_spill] sm:$0xff] }
 0x306   : > { %v4820_v57 = vpop.eup %4819  ;;  %v2109_v42 = vsel %vm7019_vm7, %v2108_v55, %v2104_v46  ;;  %v2208_v30 = vmul.f32 %v2207_v27, %v7006_v38  ;;  %v2246_v39 = vmul.f32 3.8918573e-05, %v7009_v10  ;;  %v2145_v9 = vand.u32 2147483647, %v7003_v1 }
 0x307   : > { %v2110_v58 = vmul.f32 %v2109_v42, %v2085_v34  ;;  %v2137_v26 = vmul.f32 %v4820_v57, %v7003_v1  ;;  %v976_v61 = vsel %vm975_vm9, %v6524_v32, %v972_v3  ;;  %v2174_v33 = vmul.f32 %v2173_v17, %v6948_v22 }
 0x308   : > { %v7039_v19 = vadd.f32 %v2553_v28, %v2489_v56  ;;  %v2198_v50 = vadd.f32 0.0036580483, %v2197_v49  ;;  %v2209_v6 = vadd.f32 0.014752088, %v2208_v30  ;;  %v2147_v2 = vand.u32 2147483648, %v7003_v1 }
 0x309   : > { %v4491_v31 = vclamps-f32 %v2110_v58, 1.0  ;;  %v2138_v48 = vsub.f32 1.0, %v2137_v26  ;;  %v2237_v45 = vmul.f32 %v2236_v5, %v7009_v10  ;;  %v2162_v4 = vadd.f32 0.18741608, %v2161_v15 }
 0x30a   : > { %v7043_v52 = vadd.f32 1.0, %v2174_v33  ;;  %v2210_v0 = vmul.f32 %v2209_v6, %v7006_v38  ;;  %v2247_v29 = vadd.f32 0.001143296, %v2246_v39  ;;  %2595 = vadd.xlane.f32.xlu0 %v7039_v19  ;;  %vm2142_vm10 = vweird.f32 %v4820_v57 }
 0x30b   : > { %v2378_v32 = vadd.f32 1.0, %v4491_v31  ;;  %v2139_v3 = vmul.f32 %v4820_v57, %v2138_v48  ;;  %v7048_v25 = vmul.f32 %v976_v61, %v8474_v13  ;;  %v2125_v7 = vmul.f32 %v2124_v21, %v6877_v14  ;;  %v8475_v21 = vld [vmem:[#allocation17_spill] sm:$0xff] }
 0x30c   : > { %vm2141_vm11 = vweird.f32 %v7003_v1  ;;  %4821 = vrcp.f32 %v7043_v52  ;;  %v2199_v20 = vmul.f32 %v2198_v50, %v7006_v38  ;;  %v2211_v18 = vadd.f32 0.112945676, %v2210_v0 }
 0x30d   : > { %v2410_v34 = vmul.f32 %v2378_v32, %v7000_v36  ;;  %v2140_v59 = vadd.f32 %v4820_v57, %v2139_v3  ;;  %v2238_v44 = vadd.f32 0.0036580483, %v2237_v45  ;;  %vm2143_vm12 = vmor %vm2141_vm11, %vm2142_vm10  ;;  %vm2146_vm13 = vcmp.eq.f32.partialorder %v2145_v9, 8.507059e+37 }
 0x30e   : > { %v2148_v60 = vor.u32 1.1754944e-38, %v2147_v2  ;;  %v2163_v43 = vmul.f32 %v2162_v4, %v6948_v22  ;;  %v2248_v53 = vmul.f32 %v2247_v29, %v7009_v10  ;;  %v2212_v1 = vmul.f32 %v2211_v18, %v7006_v38 }
 0x30f   : > { %2570 = vmatmul.f32.gmra.mxu3 %v2410_v34  ;;  %v2144_v14 = vsel %vm2143_vm12, %v4820_v57, %v2140_v59  ;;  %v7059_v55 = vmul.f32 0.70710677, %v7048_v25  ;;  %v7062_v15 = vmul.f32 %v976_v61, %v8475_v21  ;;  %v2200_v27 = vadd.f32 0.05243302, %v2199_v20 }
 0x310   : > { %v2149_v36 = vsel %vm2146_vm13, %v2148_v60, %v2144_v14  ;;  %v2249_v46 = vadd.f32 0.014752088, %v2248_v53  ;;  %v2213_v8 = vadd.f32 0.4994258, %v2212_v1  ;;  %v2239_v49 = vmul.f32 %v2238_v44, %v7009_v10 }
 0x311   : > { %v2150_v17 = vmul.f32 %v2149_v36, %v2125_v7  ;;  %v2273_v22 = vmul.f32 %v7059_v55, %v7059_v55  ;;  %v1035_v57 = vmul.f32 0.5, %v6857_v12  ;;  %v2164_v42 = vadd.f32 1.1283791, %v2163_v43 }
 0x312   : > { %v4822_v5 = vpop.eup %4821  ;;  %v2250_v56 = vmul.f32 %v2249_v46, %v7009_v10  ;;  %v2185_v58 = vand.u32 2147483647, %v7043_v52  ;;  %v7072_v26 = vmul.f32 0.70710677, %v7062_v15  ;;  %v2201_v9 = vmul.f32 %v2200_v27, %v7006_v38 }
 0x313   : > { %v4492_v30 = vclamps-f32 %v2150_v17, 1.0  ;;  %v2177_v39 = vmul.f32 %v4822_v5, %v7043_v52  ;;  %v2214_v28 = vmul.f32 %v2213_v8, %v7006_v38  ;;  %v7076_v33 = vmin.f32 %v2273_v22, 16.0 }
 0x314   : > { %v2251_v61 = vadd.f32 0.112945676, %v2250_v56  ;;  %v2187_v6 = vand.u32 2147483648, %v7043_v52  ;;  %v2240_v31 = vadd.f32 0.05243302, %v2239_v49  ;;  %vm2182_vm14 = vweird.f32 %v4822_v5 }
 0x315   : > { %v2379_v50 = vadd.f32 1.0, %v4492_v30  ;;  %v2178_v12 = vsub.f32 1.0, %v2177_v39  ;;  %v7079_v48 = vadd.f32 1.0, %v2214_v28  ;;  %v2275_v45 = vmul.f32 2.1237322e-06, %v7076_v33 }
 0x316   : > { %v2252_v2 = vmul.f32 %v2251_v61, %v7009_v10  ;;  %v2286_v29 = vmul.f32 3.8918573e-05, %v7076_v33  ;;  %v2313_v32 = vmul.f32 %v7072_v26, %v7072_v26  ;;  %v2202_v3 = vadd.f32 0.18741608, %v2201_v9 }
 0x317   : > { %v2411_v4 = vmul.f32 %v2379_v50, %v1035_v57  ;;  %v2179_v0 = vmul.f32 %v4822_v5, %v2178_v12  ;;  %4823 = vrcp.f32 %v7079_v48  ;;  %v2165_v13 = vmul.f32 %v2164_v42, %v6923_v51 }
 0x318   : > { %vm2181_vm15 = vweird.f32 %v7043_v52  ;;  %v2253_v20 = vadd.f32 0.4994258, %v2252_v2  ;;  %vm2186_vm1 = vcmp.eq.f32.partialorder %v2185_v58, 8.507059e+37  ;;  %v2188_v34 = vor.u32 1.1754944e-38, %v2187_v6 }
 0x319   : > { %2508 = vmatmul.f32.gmra.mxu2 %v2411_v4  ;;  %v2180_v7 = vadd.f32 %v4822_v5, %v2179_v0  ;;  %vm2183_vm0 = vmor %vm2181_vm15, %vm2182_vm14  ;;  %v2276_v59 = vadd.f32 0.00028619796, %v2275_v45  ;;  %v2287_v18 = vadd.f32 0.001143296, %v2286_v29  ;;  %v2241_v60 = vmul.f32 %v2240_v31, %v7009_v10 }
 0x31a   : > { %v2254_v43 = vmul.f32 %v2253_v20, %v7009_v10  ;;  %v7092_v53 = vmin.f32 %v2313_v32, 16.0  ;;  %v2203_v51 = vmul.f32 %v2202_v3, %v7006_v38  ;;  %v1036_v22 = vmul.f32 0.5, %v6906_v63 }
 0x31b   : > { %v2184_v44 = vsel %vm2183_vm0, %v4822_v5, %v2180_v7  ;;  %v2277_v1 = vmul.f32 %v2276_v59, %v7076_v33  ;;  %v2288_v52 = vmul.f32 %v2287_v18, %v7076_v33  ;;  %v2225_v42 = vand.u32 2147483647, %v7079_v48 }
 0x31c   : > { %v2189_v14 = vsel %vm2186_vm1, %v2188_v34, %v2184_v44  ;;  %v7097_v36 = vadd.f32 1.0, %v2254_v43  ;;  %v2315_v27 = vmul.f32 2.1237322e-06, %v7092_v53  ;;  %v2326_v49 = vmul.f32 3.8918573e-05, %v7092_v53 }
 0x31d   : > { %v2190_v21 = vmul.f32 %v2189_v14, %v2165_v13  ;;  %v4824_v46 = vpop.eup %4823  ;;  %v2278_v17 = vadd.f32 0.0036580483, %v2277_v1  ;;  %v2289_v8 = vadd.f32 0.014752088, %v2288_v52  ;;  %v2204_v38 = vadd.f32 1.1283791, %v2203_v51 }
 0x31e   : > { %v2217_v57 = vmul.f32 %v4824_v46, %v7079_v48  ;;  %4825 = vrcp.f32 %v7097_v36  ;;  %v2242_v56 = vadd.f32 0.18741608, %v2241_v60  ;;  %v2316_v9 = vadd.f32 0.00028619796, %v2315_v27 }
 0x31f   : > { %v4493_v5 = vclamps-f32 %v2190_v21, 1.0  ;;  %v2290_v58 = vmul.f32 %v2289_v8, %v7076_v33  ;;  %vm2222_vm2 = vweird.f32 %v4824_v46  ;;  %v2227_v28 = vand.u32 2147483648, %v7079_v48 }
 0x320   : > { %v2218_v39 = vsub.f32 1.0, %v2217_v57  ;;  %v2279_v61 = vmul.f32 %v2278_v17, %v7076_v33  ;;  %v2327_v63 = vadd.f32 0.001143296, %v2326_v49  ;;  %v2317_v31 = vmul.f32 %v2316_v9, %v7092_v53 }
 0x321   : > { %v2380_v30 = vadd.f32 1.0, %v4493_v5  ;;  %v2291_v6 = vadd.f32 0.112945676, %v2290_v58  ;;  %v2243_v2 = vmul.f32 %v2242_v56, %v7009_v10  ;;  %v2205_v0 = vmul.f32 %v2204_v38, %v6982_v62 }
 0x322   : > { %v2219_v12 = vmul.f32 %v4824_v46, %v2218_v39  ;;  %v2328_v45 = vmul.f32 %v2327_v63, %v7092_v53  ;;  %vm2221_vm3 = vweird.f32 %v7079_v48  ;;  %v2228_v3 = vor.u32 1.1754944e-38, %v2227_v28 }
 0x323   : > { %v2412_v50 = vmul.f32 %v2380_v30, %v1036_v22  ;;  %v2292_v32 = vmul.f32 %v2291_v6, %v7076_v33  ;;  %vm2223_vm4 = vmor %vm2221_vm3, %vm2222_vm2  ;;  %v2280_v7 = vadd.f32 0.05243302, %v2279_v61  ;;  %vm2226_vm5 = vcmp.eq.f32.partialorder %v2225_v42, 8.507059e+37 }
 0x324   : > { %v4826_v4 = vpop.eup %4825  ;;  %v2220_v29 = vadd.f32 %v4824_v46, %v2219_v12  ;;  %v2329_v20 = vadd.f32 0.014752088, %v2328_v45  ;;  %v2318_v59 = vadd.f32 0.0036580483, %v2317_v31  ;;  %v2244_v44 = vadd.f32 1.1283791, %v2243_v2  ;;  %v7132_v45 = vpop.f32.mrf.mxu2 }
 0x325   : > { %2573 = vmatmul.f32.gmra.mxu3 %v2412_v50  ;;  %v2257_v13 = vmul.f32 %v4826_v4, %v7097_v36  ;;  %v2293_v10 = vadd.f32 0.4994258, %v2292_v32  ;;  %v2265_v48 = vand.u32 2147483647, %v7097_v36  ;;  %v2267_v14 = vand.u32 2147483648, %v7097_v36 }
 0x326   : > { %v2224_v34 = vsel %vm2223_vm4, %v4824_v46, %v2220_v29  ;;  %v2330_v62 = vmul.f32 %v2329_v20, %v7092_v53  ;;  %vm2262_vm6 = vweird.f32 %v4826_v4  ;;  %v2281_v52 = vmul.f32 %v2280_v7, %v7076_v33 }
 0x327   : > { %v2229_v18 = vsel %vm2226_vm5, %v2228_v3, %v2224_v34  ;;  %v2258_v60 = vsub.f32 1.0, %v2257_v13  ;;  %v2294_v51 = vmul.f32 %v2293_v10, %v7076_v33  ;;  %v2319_v17 = vmul.f32 %v2318_v59, %v7092_v53  ;;  %v2556_v59 = vpop.f32.mrf.mxu3 }
 0x328   : > { %v2230_v43 = vmul.f32 %v2229_v18, %v2205_v0  ;;  %v2331_v21 = vadd.f32 0.112945676, %v2330_v62  ;;  %v1037_v8 = vmul.f32 0.5, %v6969_v16  ;;  %vm2261_vm7 = vweird.f32 %v7097_v36 }
 0x329   : > { %v2259_v1 = vmul.f32 %v4826_v4, %v2258_v60  ;;  %v2295_v46 = vadd.f32 1.0, %v2294_v51  ;;  %v2245_v57 = vmul.f32 %v2244_v44, %v6985_v40  ;;  %vm2263_vm8 = vmor %vm2261_vm7, %vm2262_vm6  ;;  %v2268_v38 = vor.u32 1.1754944e-38, %v2267_v14  ;;  %v2584_v51 = vpop.xlane.xlu2 %2583 }
 0x32a   : > { %v4494_v27 = vclamps-f32 %v2230_v43, 1.0  ;;  %v2332_v22 = vmul.f32 %v2331_v21, %v7092_v53  ;;  %vm2266_vm9 = vcmp.eq.f32.partialorder %v2265_v48, 8.507059e+37  ;;  %v2282_v56 = vadd.f32 0.18741608, %v2281_v52 }
 0x32b   : > { %v2260_v49 = vadd.f32 %v4826_v4, %v2259_v1  ;;  %4827 = vrcp.f32 %v2295_v46  ;;  %v2320_v9 = vadd.f32 0.05243302, %v2319_v17  ;;  %v5117_v36 = vmov 128.0   ;;  %v2588_v17 = vpop.xlane.xlu1 %2587 }
 0x32c   : > { %v2381_v5 = vadd.f32 1.0, %v4494_v27  ;;  %v2333_v30 = vadd.f32 0.4994258, %v2332_v22  ;;  %4829 = vrcp.f32 %v5117_v36  ;;  %v2283_v50 = vmul.f32 %v2282_v56, %v7076_v33 }
 0x32d   : > { %v2264_v42 = vsel %vm2263_vm8, %v4826_v4, %v2260_v49  ;;  %v2321_v12 = vmul.f32 %v2320_v9, %v7092_v53  ;;  %v1038_v6 = vmul.f32 0.5, %v6972_v23  ;;  %v2307_v3 = vand.u32 2147483648, %v2295_v46 }
 0x32e   : > { %v2413_v39 = vmul.f32 %v2381_v5, %v1037_v8  ;;  %v2269_v58 = vsel %vm2266_vm9, %v2268_v38, %v2264_v42  ;;  %v2334_v16 = vmul.f32 %v2333_v30, %v7092_v53  ;;  %v2284_v32 = vadd.f32 1.1283791, %v2283_v50 }
 0x32f   : > { %v2270_v28 = vmul.f32 %v2269_v58, %v2245_v57  ;;  %v2322_v13 = vadd.f32 0.18741608, %v2321_v12  ;;  %v2305_v33 = vand.u32 2147483647, %v2295_v46  ;;  %vm2301_vm11 = vweird.f32 %v2295_v46 }
 0x330   : > { %2511 = vmatmul.f32.gmra.mxu2 %v2413_v39  ;;  %v7127_v63 = vadd.f32 1.0, %v2334_v16  ;;  %v2285_v18 = vmul.f32 %v2284_v32, %v7059_v55  ;;  %v2308_v44 = vor.u32 1.1754944e-38, %v2307_v3  ;;  %v1039_v56 = vmul.f32 0.5, %v7048_v25 }
 0x331   : > { %v4495_v61 = vclamps-f32 %v2270_v28, 1.0  ;;  %v4828_v40 = vpop.eup %4827  ;;  %v2323_v60 = vmul.f32 %v2322_v13, %v7092_v53  ;;  %vm2306_vm13 = vcmp.eq.f32.partialorder %v2305_v33, 8.507059e+37 }
 0x332   : > { %v2297_v2 = vmul.f32 %v4828_v40, %v2295_v46  ;;  %4831 = vrcp.f32 %v7127_v63  ;;  %v4830_v29 = vpop.eup %4829  ;;  %vm2302_vm10 = vweird.f32 %v4828_v40  ;;  %v2586_v46 = vpop.xlane.xlu0 %2585  ;;  %v2345_v55 = vand.u32 2147483647, %v7127_v63 }
 0x333   : > { %v2382_v31 = vadd.f32 1.0, %v4495_v61  ;;  %v2616_v20 = vmul.f32 128.0, %v4830_v29  ;;  %vm2303_vm12 = vmor %vm2301_vm11, %vm2302_vm10  ;;  %vm2620_vm14 = vweird.f32 %v4830_v29  ;;  %v2324_v8 = vadd.f32 1.1283791, %v2323_v60 }
 0x334   : > { %v2298_v0 = vsub.f32 1.0, %v2297_v2  ;;  %v2347_v49 = vand.u32 2147483648, %v7127_v63  ;;  %vm2341_vm0 = vweird.f32 %v7127_v63  ;;  %vm2346_vm2 = vcmp.eq.f32.partialorder %v2345_v55, 8.507059e+37 }
 0x335   : > { %v2414_v4 = vmul.f32 %v2382_v31, %v1038_v6  ;;  %v2617_v23 = vsub.f32 1.0, %v2616_v20  ;;  %v2494_v1 = vpop.f32.mrf.mxu2  ;;  %v2492_v31 = vadd.f32 %v6943_v37, %v7132_v45 }
 0x336   : > { %v2299_v7 = vmul.f32 %v4828_v40, %v2298_v0  ;;  %v2348_v58 = vor.u32 1.1754944e-38, %v2347_v49  ;;  %v2495_v2 = vadd.f32 %v6943_v37, %v2494_v1 }
 0x337   : > { %2576 = vmatmul.f32.gmra.mxu3 %v2414_v4  ;;  %v2618_v48 = vmul.f32 %v4830_v29, %v2617_v23  ;;  %v1040_v4 = vmul.f32 0.5, %v7062_v15  ;;  %v2557_v13 = vadd.f32 %v2556_v59, %v2492_v31 }
 0x338   : > { %v2300_v34 = vadd.f32 %v4828_v40, %v2299_v7  ;;  %v4832_v10 = vpop.eup %4831  ;;  %v2559_v16 = vpop.f32.mrf.mxu3 }
 0x339   : > { %v2337_v43 = vmul.f32 %v4832_v10, %v7127_v63  ;;  %v2619_v27 = vadd.f32 %v4830_v29, %v2618_v48  ;;  %vm2342_vm15 = vweird.f32 %v4832_v10  ;;  %v2560_v7 = vadd.f32 %v2559_v16, %v2495_v2 }
 0x33a   : > { %v2304_v62 = vsel %vm2303_vm12, %v4828_v40, %v2300_v34  ;;  %vm2343_vm1 = vmor %vm2341_vm0, %vm2342_vm15  ;;  %v2325_v40 = vmul.f32 %v2324_v8, %v7072_v26  ;;  %v2590_v26 = vpop.xlane.xlu2 %2589 }
 0x33b   : > { %v2309_v14 = vsel %vm2306_vm13, %v2308_v44, %v2304_v62  ;;  %v2338_v21 = vsub.f32 1.0, %v2337_v43  ;;  %v7140_v5 = vsel %vm2620_vm14, %v4830_v29, %v2619_v27 }
 0x33c   : > { %v2310_v52 = vmul.f32 %v2309_v14, %v2285_v18  ;;  %v2622_v57 = vmul.f32 %v7140_v5, %v2584_v51  ;;  %v2623_v38 = vmul.f32 %v7140_v5, %v2586_v46  ;;  %v2624_v42 = vmul.f32 %v7140_v5, %v2588_v17 }
 0x33d   : > { %v2339_v22 = vmul.f32 %v4832_v10, %v2338_v21  ;;  %v2625_v32 = vmul.f32 %v7140_v5, %v2590_v26 }
 0x33e   : > { %v4496_v53 = vclamps-f32 %v2310_v52, 1.0  ;;  %v7148_v9 = vsub.f32 %v6427_v11, %v2622_v57  ;;  %v7151_v28 = vsub.f32 %v6559_v24, %v2623_v38  ;;  %v7154_v36 = vsub.f32 %v6655_v41, %v2624_v42  ;;  %v2497_v41 = vpop.f32.mrf.mxu2 }
 0x33f   : > { %v2340_v39 = vadd.f32 %v4832_v10, %v2339_v22  ;;  %v2498_v29 = vadd.f32 %v6943_v37, %v2497_v41  ;;  %v7170_v34 = vsub.f32 %v6781_v54, %v2625_v32 }
 0x340   : > { %v2383_v30 = vadd.f32 1.0, %v4496_v53  ;;  %v2654_v63 = vmul.f32 %v7148_v9, %v7148_v9  ;;  %v2655_v11 = vmul.f32 %v7151_v28, %v7151_v28  ;;  %v2656_v24 = vmul.f32 %v7154_v36, %v7154_v36 }
 0x341   : > { %v2344_v25 = vsel %vm2343_vm1, %v4832_v10, %v2340_v39  ;;  %v2657_v15 = vmul.f32 %v7170_v34, %v7170_v34 }
 0x342   : > { %v2415_v61 = vmul.f32 %v2383_v30, %v1039_v56  ;;  %v2349_v50 = vsel %vm2346_vm2, %v2348_v58, %v2344_v25  ;;  %2670 = vadd.xlane.f32.xlu2 %v2654_v63  ;;  %2672 = vadd.xlane.f32.xlu1 %v2655_v11 }
 0x343   : > { %v2350_v12 = vmul.f32 %v2349_v50, %v2325_v40  ;;  %2674 = vadd.xlane.f32.xlu0 %v2656_v24 }
 0x344   : > { %2514 = vmatmul.f32.gmra.mxu2 %v2415_v61 }
 0x345   : > { %v4497_v6 = vclamps-f32 %v2350_v12, 1.0 }
 0x347   : > { %v2384_v0 = vadd.f32 1.0, %v4497_v6 }
 0x349   : > { %v2416_v3 = vmul.f32 %v2384_v0, %v1040_v4  ;;  %v2562_v33 = vpop.f32.mrf.mxu3 }
 0x34a   : > { %v2563_v20 = vadd.f32 %v2562_v33, %v2498_v29  ;;  %2597 = vadd.xlane.f32.xlu2 %v2557_v13  ;;  %2599 = vadd.xlane.f32.xlu1 %v2560_v7  ;;  %v3629_v33 = vld [vmem:[%s8389_s5 + $0x78] sm:$0xff] }
 0x34b   : > { %2579 = vmatmul.f32.gmra.mxu3 %v2416_v3  ;;  %3634 = vmatpush.msrb.mxu0 %v3629_v33 }
 0x34c   : > { %2601 = vadd.xlane.f32.xlu0 %v2563_v20  ;;  %4560 = vmatpush.msra.mxu2 %v3629_v33 }
 0x34e   : > { %v2592_v45 = vpop.xlane.xlu0 %2591 }
 0x34f   : > { %v2626_v23 = vmul.f32 %v7140_v5, %v2592_v45 }
 0x351   : > { %v7176_v10 = vsub.f32 %v6862_v35, %v2626_v23 }
 0x352   : > { %2676 = vadd.xlane.f32.xlu2 %v2657_v15  ;;  %v3713_v15 = vld [vmem:[%s8391_s7 + $0x70] sm:$0xff] }
 0x353   : > { %v2658_v59 = vmul.f32 %v7176_v10, %v7176_v10 }
 0x355   : > { %2678 = vadd.xlane.f32.xlu1 %v2658_v59 }
 0x359   : > { %v2500_v18 = vpop.f32.mrf.mxu2 }
 0x35a   : > { %v2501_v44 = vadd.f32 %v6943_v37, %v2500_v18 }
 0x366   : > { %v2565_v54 = vpop.f32.mrf.mxu3 }
 0x367   : > { %v7181_v60 = vadd.f32 %v2565_v54, %v2501_v44  ;;  %v2594_v62 = vpop.xlane.xlu1 %2593 }
 0x368   : > { %v2627_v43 = vmul.f32 %v7140_v5, %v2594_v62 }
 0x369   : > { %2603 = vadd.xlane.f32.xlu2 %v7181_v60 }
 0x36a   : > { %v7186_v48 = vsub.f32 %v6951_v47, %v2627_v43 }
 0x36c   : > { %v2659_v35 = vmul.f32 %v7186_v48, %v7186_v48 }
 0x36e   : > { %v2503_v14 = vpop.f32.mrf.mxu2  ;;  %2680 = vadd.xlane.f32.xlu0 %v2659_v35 }
 0x36f   : > { %v2504_v51 = vadd.f32 %v6943_v37, %v2503_v14 }
 0x37a   : > { %v2568_v1 = vpop.f32.mrf.mxu3 }
 0x37b   : > { %v7191_v52 = vadd.f32 %v2568_v1, %v2504_v51 }
 0x37d   : > { %2605 = vadd.xlane.f32.xlu1 %v7191_v52  ;;  %v2596_v21 = vpop.xlane.xlu0 %2595 }
 0x37e   : > { %v2628_v27 = vmul.f32 %v7140_v5, %v2596_v21 }
 0x380   : > { %v7196_v46 = vsub.f32 %v7039_v19, %v2628_v27 }
 0x382   : > { %v2660_v47 = vmul.f32 %v7196_v46, %v7196_v46 }
 0x384   : > { %2682 = vadd.xlane.f32.xlu2 %v2660_v47  ;;  %v2506_v17 = vpop.f32.mrf.mxu2 }
 0x385   : > { %v2507_v8 = vadd.f32 %v6943_v37, %v2506_v17 }
 0x392   : > { %v2571_v55 = vpop.f32.mrf.mxu3 }
 0x393   : > { %v7201_v49 = vadd.f32 %v2571_v55, %v2507_v8  ;;  %v3627_v8 = vld [vmem:[%s8389_s5 + $0x68] sm:$0xff] }
 0x394   : > { %v3712_v55 = vld [vmem:[%s8391_s7 + $0x68] sm:$0xff] }
 0x395   : > { %2607 = vadd.xlane.f32.xlu0 %v7201_v49 }
 0x39c   : > { %v2509_v53 = vpop.f32.mrf.mxu2 }
 0x39d   : > { %v2510_v22 = vadd.f32 %v6943_v37, %v2509_v53  ;;  %v3626_v53 = vld [vmem:[%s8389_s5 + $0x60] sm:$0xff] }
 0x3a8   : > { %v2574_v57 = vpop.f32.mrf.mxu3 }
 0x3a9   : > { %v7205_v38 = vadd.f32 %v2574_v57, %v2510_v22 }
 0x3ab   : > { %2609 = vadd.xlane.f32.xlu2 %v7205_v38 }
 0x3b3   : > { %v2512_v30 = vpop.f32.mrf.mxu2 }
 0x3b4   : > { %v2513_v26 = vadd.f32 %v6943_v37, %v2512_v30 }
 0x3b5   : > { %v2671_v19 = vpop.xlane.xlu2 %2670  ;;  %v2673_v42 = vpop.xlane.xlu1 %2672 }
 0x3b6   : > { %v2675_v56 = vpop.xlane.xlu0 %2674  ;;  %v2702_v3 = vmul.f32 %v2671_v19, %v7140_v5  ;;  %v2703_v59 = vmul.f32 %v2673_v42, %v7140_v5  ;;  %v3711_v42 = vld [vmem:[%s8391_s7 + $0x60] sm:$0xff] }
 0x3b8   : > { %v7254_v54 = vadd.f32 1e-05, %v2703_v59  ;;  %v3622_v59 = vld [vmem:[%s8389_s5 + $0x40] sm:$0xff] }
 0x3ba   : > { %v2577_v24 = vpop.f32.mrf.mxu3  ;;  %vm2750_vm7 = vweird.f32 %v7254_v54 }
 0x3bb   : > { %v7225_v4 = vadd.f32 %v2577_v24, %v2513_v26 }
 0x3bd   : > { %v2598_v39 = vpop.xlane.xlu2 %2597  ;;  %v2600_v58 = vpop.xlane.xlu1 %2599 }
 0x3be   : > { %v2629_v16 = vmul.f32 %v7140_v5, %v2598_v39  ;;  %v2630_v61 = vmul.f32 %v7140_v5, %v2600_v58 }
 0x3bf   : > { %v2602_v40 = vpop.xlane.xlu0 %2601 }
 0x3c0   : > { %v2631_v25 = vmul.f32 %v7140_v5, %v2602_v40  ;;  %v7211_v50 = vsub.f32 %v2557_v13, %v2629_v16  ;;  %v7213_v63 = vsub.f32 %v2560_v7, %v2630_v61  ;;  %v7232_v13 = vadd.f32 1e-05, %v2702_v3  ;;  %v3624_v61 = vld [vmem:[%s8389_s5 + $0x50] sm:$0xff] }
 0x3c2   : > { %v7215_v11 = vsub.f32 %v2563_v20, %v2631_v25  ;;  %v2661_v12 = vmul.f32 %v7211_v50, %v7211_v50  ;;  %v2662_v41 = vmul.f32 %v7213_v63, %v7213_v63  ;;  %v3628_v20 = vld [vmem:[%s8389_s5 + $0x70] sm:$0xff]  ;;  %4833 = vrsqrt.f32 %v7232_v13 }
 0x3c3   : > { %3635 = vmatpush.msrb.mxu0 %v3628_v20  ;;  %4561 = vmatpush.msra.mxu2 %v3628_v20  ;;  %4835 = vrsqrt.f32 %v7254_v54  ;;  %v3709_v25 = vld [vmem:[%s8391_s7 + $0x50] sm:$0xff]  ;;  %vm2740_vm4 = vweird.f32 %v7232_v13 }
 0x3c4   : > { %v2663_v6 = vmul.f32 %v7215_v11, %v7215_v11  ;;  %2684 = vadd.xlane.f32.xlu1 %v2661_v12  ;;  %2686 = vadd.xlane.f32.xlu0 %v2662_v41 }
 0x3c5   : > { %v2677_v32 = vpop.xlane.xlu2 %2676  ;;  %3636 = vmatpush.msrb.mxu0 %v3627_v8  ;;  %4562 = vmatpush.msra.mxu2 %v3627_v8 }
 0x3c6   : > { %2688 = vadd.xlane.f32.xlu2 %v2663_v6  ;;  %v2705_v21 = vmul.f32 %v2677_v32, %v7140_v5 }
 0x3c7   : > { %v2515_v31 = vpop.f32.mrf.mxu2  ;;  %3637 = vmatpush.msrb.mxu0 %v3626_v53  ;;  %4563 = vmatpush.msra.mxu2 %v3626_v53 }
 0x3c8   : > { %v2516_v2 = vadd.f32 %v6943_v37, %v2515_v31  ;;  %v3714_v37 = vld [vmem:[%s8391_s7 + $0x78] sm:$0xff]  ;;  %v4834_v44 = vpop.eup %4833  ;;  %v2679_v62 = vpop.xlane.xlu1 %2678  ;;  %v7277_v57 = vadd.f32 1e-05, %v2705_v21 }
 0x3c9   : > { %3719 = vmatpush.msrb.mxu1 %v3714_v37  ;;  %v2735_v43 = vmul.f32 %v4834_v44, %v7232_v13  ;;  %v7261_v51 = vpop.eup %4835  ;;  %v2706_v39 = vmul.f32 %v2679_v62, %v7140_v5  ;;  %vm2741_vm3 = vweird.f32 %v4834_v44 }
 0x3ca   : > { %v2745_v47 = vmul.f32 %v7261_v51, %v7254_v54  ;;  %vm2742_vm5 = vmor %vm2740_vm4, %vm2741_vm3  ;;  %vm2751_vm6 = vweird.f32 %v7261_v51  ;;  %vm2770_vm13 = vweird.f32 %v7277_v57 }
 0x3cb   : > { %3720 = vmatpush.msrb.mxu1 %v3713_v15  ;;  %v2736_v35 = vmul.f32 %v4834_v44, %v2735_v43  ;;  %v7307_v41 = vadd.f32 1e-05, %v2706_v39  ;;  %v3623_v15 = vld [vmem:[%s8389_s5 + $0x48] sm:$0xff]  ;;  %vm7352_vm8 = vmor %vm2750_vm7, %vm2751_vm6 }
 0x3cc   : > { %2611 = vadd.xlane.f32.xlu1 %v7225_v4  ;;  %v2746_v30 = vmul.f32 %v7261_v51, %v2745_v47  ;;  %v3620_v47 = vld [vmem:[%s8389_s5 + $0x30] sm:$0xff] }
 0x3cd   : > { %v2737_v1 = vmul.f32 0.5, %v2736_v35  ;;  %3721 = vmatpush.msrb.mxu1 %v3712_v55  ;;  %v3706_v35 = vld [vmem:[%s8391_s7 + $0x38] sm:$0xff]  ;;  %vm2780_vm0 = vweird.f32 %v7307_v41 }
 0x3ce   : > { %v2580_v0 = vpop.f32.mrf.mxu3  ;;  %v2747_v24 = vmul.f32 0.5, %v2746_v30 }
 0x3cf   : > { %v7228_v29 = vadd.f32 %v2580_v0, %v2516_v2  ;;  %v2738_v22 = vsub.f32 1.5, %v2737_v1  ;;  %3722 = vmatpush.msrb.mxu1 %v3711_v42 }
 0x3d0   : > { %v2748_v2 = vsub.f32 1.5, %v2747_v24 }
 0x3d1   : > { %2613 = vadd.xlane.f32.xlu0 %v7228_v29  ;;  %v2739_v40 = vmul.f32 %v4834_v44, %v2738_v22 }
 0x3d2   : > { %v2749_v37 = vmul.f32 %v7261_v51, %v2748_v2 }
 0x3d3   : > { %v2743_v26 = vsel %vm2742_vm5, %v4834_v44, %v2739_v40  ;;  %v3707_v44 = vld [vmem:[%s8391_s7 + $0x40] sm:$0xff] }
 0x3d4   : > { %v7315_v3 = vmul.f32 %v2743_v26, %v7148_v9  ;;  %v3708_v9 = vld [vmem:[%s8391_s7 + $0x48] sm:$0xff]  ;;  %v2753_v8 = vsel %vm7352_vm8, %v7261_v51, %v2749_v37  ;;  %v3618_v40 = vld [vmem:[%s8389_s5 + $0x20] sm:$0xff] }
 0x3d5   : > { %v7375_v42 = vmul.f32 %v2753_v8, %v7151_v28  ;;  %v3704_v51 = vld [vmem:[%s8391_s7 + $0x28] sm:$0xff] }
 0x3d6   : > { %v7320_v33 = vmul.f32 0.70710677, %v7315_v3 }
 0x3d8   : > { %v2942_v62 = vmul.f32 %v7320_v33, %v7320_v33 }
 0x3da   : > { %v7357_v54 = vmin.f32 %v2942_v62, 16.0 }
 0x3dc   : > { %v2604_v7 = vpop.xlane.xlu2 %2603  ;;  %v2944_v22 = vmul.f32 2.1237322e-06, %v7357_v54  ;;  %v2955_v30 = vmul.f32 3.8918573e-05, %v7357_v54 }
 0x3dd   : > { %v2632_v45 = vmul.f32 %v7140_v5, %v2604_v7 }
 0x3de   : > { %v2956_v24 = vadd.f32 0.001143296, %v2955_v30 }
 0x3df   : > { %v7249_v23 = vsub.f32 %v7181_v60, %v2632_v45  ;;  %v2704_v60 = vmul.f32 %v2675_v56, %v7140_v5  ;;  %v3625_v56 = vld [vmem:[%s8389_s5 + $0x58] sm:$0xff] }
 0x3e0   : > { %3638 = vmatpush.msrb.mxu0 %v3625_v56  ;;  %4564 = vmatpush.msra.mxu2 %v3625_v56  ;;  %v3619_v56 = vld [vmem:[%s8389_s5 + $0x28] sm:$0xff] }
 0x3e1   : > { %v2664_v18 = vmul.f32 %v7249_v23, %v7249_v23  ;;  %v7259_v14 = vadd.f32 1e-05, %v2704_v60  ;;  %v2681_v6 = vpop.xlane.xlu0 %2680  ;;  %v3621_v60 = vld [vmem:[%s8389_s5 + $0x38] sm:$0xff] }
 0x3e2   : > { %3639 = vmatpush.msrb.mxu0 %v3624_v61  ;;  %4565 = vmatpush.msra.mxu2 %v3624_v61  ;;  %v2707_v32 = vmul.f32 %v2681_v6, %v7140_v5 }
 0x3e3   : > { %2690 = vadd.xlane.f32.xlu1 %v2664_v18  ;;  %4837 = vrsqrt.f32 %v7259_v14  ;;  %vm2760_vm10 = vweird.f32 %v7259_v14 }
 0x3e4   : > { %4839 = vrsqrt.f32 %v7277_v57  ;;  %v7324_v45 = vadd.f32 1e-05, %v2707_v32  ;;  %3640 = vmatpush.msrb.mxu0 %v3623_v15  ;;  %4566 = vmatpush.msra.mxu2 %v3623_v15  ;;  %v3617_v32 = vld [vmem:[%s8389_s5 + $0x18] sm:$0xff] }
 0x3e5   : > { %4841 = vrsqrt.f32 %v7307_v41 }
 0x3e6   : > { %3641 = vmatpush.msrb.mxu0 %v3622_v59  ;;  %4843 = vrsqrt.f32 %v7324_v45  ;;  %4567 = vmatpush.msra.mxu2 %v3622_v59  ;;  %v3701_v59 = vld [vmem:[%s8391_s7 + $0x10] sm:$0xff]  ;;  %vm2790_vm3 = vweird.f32 %v7324_v45 }
 0x3e8   : > { %3642 = vmatpush.msrb.mxu0 %v3621_v60  ;;  %4568 = vmatpush.msra.mxu2 %v3621_v60 }
 0x3e9   : > { %v7295_v16 = vpop.eup %4837 }
 0x3ea   : > { %v2755_v12 = vmul.f32 %v7295_v16, %v7259_v14  ;;  %v7309_v31 = vpop.eup %4839  ;;  %vm2761_vm9 = vweird.f32 %v7295_v16  ;;  %3643 = vmatpush.msrb.mxu0 %v3620_v47  ;;  %4569 = vmatpush.msra.mxu2 %v3620_v47 }
 0x3eb   : > { %v2765_v7 = vmul.f32 %v7309_v31, %v7277_v57  ;;  %v7341_v43 = vpop.eup %4841  ;;  %vm7416_vm11 = vmor %vm2760_vm10, %vm2761_vm9  ;;  %vm2771_vm12 = vweird.f32 %v7309_v31 }
 0x3ec   : > { %v2756_v0 = vmul.f32 %v7295_v16, %v2755_v12  ;;  %v2775_v55 = vmul.f32 %v7341_v43, %v7307_v41  ;;  %v7394_v12 = vmul.f32 0.70710677, %v7375_v42  ;;  %3644 = vmatpush.msrb.mxu0 %v3619_v56  ;;  %v7399_v2 = vpop.eup %4843  ;;  %4570 = vmatpush.msra.mxu2 %v3619_v56  ;;  %vm2772_vm14 = vmor %vm2770_vm13, %vm2771_vm12  ;;  %vm2781_vm15 = vweird.f32 %v7341_v43 }
 0x3ed   : > { %v2766_v21 = vmul.f32 %v7309_v31, %v2765_v7  ;;  %v2957_v7 = vmul.f32 %v2956_v24, %v7357_v54  ;;  %vm7504_vm1 = vmor %vm2780_vm0, %vm2781_vm15  ;;  %vm2791_vm2 = vweird.f32 %v7399_v2 }
 0x3ee   : > { %v2757_v20 = vmul.f32 0.5, %v2756_v0  ;;  %v2776_v6 = vmul.f32 %v7341_v43, %v2775_v55  ;;  %v2982_v37 = vmul.f32 %v7394_v12, %v7394_v12  ;;  %3645 = vmatpush.msrb.mxu0 %v3618_v40  ;;  %4571 = vmatpush.msra.mxu2 %v3618_v40 }
 0x3ef   : > { %v2767_v39 = vmul.f32 0.5, %v2766_v21 }
 0x3f0   : > { %v2606_v27 = vpop.xlane.xlu1 %2605  ;;  %v7433_v60 = vmul.f32 0.5, %v2776_v6  ;;  %3646 = vmatpush.msrb.mxu0 %v3617_v32  ;;  %4572 = vmatpush.msra.mxu2 %v3617_v32 }
 0x3f1   : > { %v2633_v17 = vmul.f32 %v7140_v5, %v2606_v27  ;;  %v2758_v27 = vsub.f32 1.5, %v2757_v20 }
 0x3f2   : > { %v2778_v57 = vsub.f32 1.5, %v7433_v60 }
 0x3f3   : > { %v7280_v19 = vsub.f32 %v7191_v52, %v2633_v17  ;;  %v3710_v52 = vld [vmem:[%s8391_s7 + $0x58] sm:$0xff]  ;;  %v3705_v17 = vld [vmem:[%s8391_s7 + $0x30] sm:$0xff]  ;;  %v2759_v28 = vmul.f32 %v7295_v16, %v2758_v27  ;;  %v3615_v27 = vld [vmem:[%s8389_s5 + $0x8] sm:$0xff] }
 0x3f4   : > { %3723 = vmatpush.msrb.mxu1 %v3710_v52  ;;  %v2945_v52 = vadd.f32 0.00028619796, %v2944_v22  ;;  %v3699_v22 = vld [vmem:[%s8391_s7] sm:$0xff] }
 0x3f5   : > { %v2665_v58 = vmul.f32 %v7280_v19, %v7280_v19  ;;  %v2763_v62 = vsel %vm7416_vm11, %v7295_v16, %v2759_v28  ;;  %v3700_v16 = vld [vmem:[%s8391_s7 + $0x8] sm:$0xff]  ;;  %vm7577_vm11 = vmor %vm2790_vm3, %vm2791_vm2 }
 0x3f6   : > { %3724 = vmatpush.msrb.mxu1 %v3709_v25  ;;  %v3703_v25 = vld [vmem:[%s8391_s7 + $0x20] sm:$0xff]  ;;  %v2946_v26 = vmul.f32 %v2945_v52, %v7357_v54  ;;  %v7439_v21 = vmul.f32 %v2763_v62, %v7154_v36 }
 0x3f7   : > { %2692 = vadd.xlane.f32.xlu2 %v2665_v58  ;;  %v2683_v13 = vpop.xlane.xlu2 %2682  ;;  %v3614_v36 = vld [vmem:[%s8389_s5] sm:$0xff] }
 0x3f8   : > { %v2708_v18 = vmul.f32 %v2683_v13, %v7140_v5  ;;  %3725 = vmatpush.msrb.mxu1 %v3708_v9  ;;  %v3702_v13 = vld [vmem:[%s8391_s7 + $0x18] sm:$0xff]  ;;  %v2947_v20 = vadd.f32 0.0036580483, %v2946_v26  ;;  %v3616_v9 = vld [vmem:[%s8389_s5 + $0x10] sm:$0xff] }
 0x3f9   : > { %3647 = vmatpush.msrb.mxu0 %v3616_v9  ;;  %4573 = vmatpush.msra.mxu2 %v3616_v9 }
 0x3fa   : > { %3726 = vmatpush.msrb.mxu1 %v3707_v44  ;;  %v7371_v53 = vadd.f32 1e-05, %v2708_v18  ;;  %v2958_v18 = vadd.f32 0.014752088, %v2957_v7  ;;  %v7428_v44 = vmin.f32 %v2982_v37, 16.0  ;;  %v2948_v1 = vmul.f32 %v2947_v20, %v7357_v54 }
 0x3fb   : > { %3648 = vmatpush.msrb.mxu0 %v3615_v27  ;;  %4574 = vmatpush.msra.mxu2 %v3615_v27 }
 0x3fc   : > { %3727 = vmatpush.msrb.mxu1 %v3706_v35  ;;  %4845 = vrsqrt.f32 %v7371_v53  ;;  %v2785_v35 = vmul.f32 %v7399_v2, %v7324_v45  ;;  %v2959_v47 = vmul.f32 %v2958_v18, %v7357_v54  ;;  %v2995_v8 = vmul.f32 3.8918573e-05, %v7428_v44 }
 0x3fd   : > { %v2949_v56 = vadd.f32 0.05243302, %v2948_v1  ;;  %3649 = vmatpush.msrb.mxu0 %v3614_v36  ;;  %4575 = vmatpush.msra.mxu2 %v3614_v36  ;;  %vm2800_vm7 = vweird.f32 %v7371_v53 }
 0x3fe   : > { %3728 = vmatpush.msrb.mxu1 %v3705_v17  ;;  %v2984_v17 = vmul.f32 2.1237322e-06, %v7428_v44  ;;  %v2996_v52 = vadd.f32 0.001143296, %v2995_v8  ;;  %v2786_v28 = vmul.f32 %v7399_v2, %v2785_v35 }
 0x3ff   : > { %v2950_v26 = vmul.f32 %v2949_v56, %v7357_v54 }
 0x400   : > { %3729 = vmatpush.msrb.mxu1 %v3704_v51  ;;  %v7460_v51 = vmul.f32 0.70710677, %v7439_v21  ;;  %v2997_v6 = vmul.f32 %v2996_v52, %v7428_v44 }
 0x401   : > { %v2951_v35 = vadd.f32 0.18741608, %v2950_v26 }
 0x402   : > { %3730 = vmatpush.msrb.mxu1 %v3703_v25  ;;  %v7450_v55 = vpop.eup %4845  ;;  %v2998_v37 = vadd.f32 0.014752088, %v2997_v6 }
 0x403   : > { %v2795_v40 = vmul.f32 %v7450_v55, %v7371_v53  ;;  %vm2801_vm5 = vweird.f32 %v7450_v55 }
 0x404   : > { %3731 = vmatpush.msrb.mxu1 %v3702_v13  ;;  %v2999_v60 = vmul.f32 %v2998_v37, %v7428_v44 }
 0x406   : > { %3732 = vmatpush.msrb.mxu1 %v3701_v59  ;;  %v2796_v59 = vmul.f32 %v7450_v55, %v2795_v40 }
 0x408   : > { %v2608_v58 = vpop.xlane.xlu0 %2607  ;;  %3733 = vmatpush.msrb.mxu1 %v3700_v16  ;;  %v2797_v56 = vmul.f32 0.5, %v2796_v59 }
 0x409   : > { %v2634_v61 = vmul.f32 %v7140_v5, %v2608_v58  ;;  %v2985_v58 = vadd.f32 0.00028619796, %v2984_v17 }
 0x40a   : > { %3734 = vmatpush.msrb.mxu1 %v3699_v22  ;;  %v2779_v22 = vmul.f32 %v7341_v43, %v2778_v57  ;;  %v2798_v37 = vsub.f32 1.5, %v2797_v56 }
 0x40b   : > { %v7403_v0 = vsub.f32 %v7201_v49, %v2634_v61  ;;  %v2768_v49 = vsub.f32 1.5, %v2767_v39  ;;  %v2960_v39 = vadd.f32 0.112945676, %v2959_v47  ;;  %v3022_v61 = vmul.f32 %v7460_v51, %v7460_v51 }
 0x40c   : > { %v2986_v24 = vmul.f32 %v2985_v58, %v7428_v44  ;;  %v3000_v47 = vadd.f32 0.112945676, %v2999_v60 }
 0x40d   : > { %v2666_v15 = vmul.f32 %v7403_v0, %v7403_v0  ;;  %v2769_v30 = vmul.f32 %v7309_v31, %v2768_v49  ;;  %v2961_v25 = vmul.f32 %v2960_v39, %v7357_v54  ;;  %v7476_v32 = vmin.f32 %v3022_v61, 16.0 }
 0x40e   : > { %v2987_v7 = vadd.f32 0.0036580483, %v2986_v24  ;;  %v2787_v49 = vmul.f32 0.5, %v2786_v28  ;;  %v3001_v39 = vmul.f32 %v3000_v47, %v7428_v44  ;;  %v2952_v28 = vmul.f32 %v2951_v35, %v7357_v54 }
 0x40f   : > { %2694 = vadd.xlane.f32.xlu0 %v2666_v15  ;;  %v2962_v13 = vadd.f32 0.4994258, %v2961_v25  ;;  %v2773_v14 = vsel %vm2772_vm14, %v7309_v31, %v2769_v30  ;;  %v3024_v20 = vmul.f32 2.1237322e-06, %v7476_v32  ;;  %v3035_v15 = vmul.f32 3.8918573e-05, %v7476_v32  ;;  %vm7598_vm14 = vmor %vm2800_vm7, %vm2801_vm5 }
 0x410   : > { %v7482_v9 = vmul.f32 %v2773_v14, %v7170_v34  ;;  %v2988_v62 = vmul.f32 %v2987_v7, %v7428_v44  ;;  %v2788_v17 = vsub.f32 1.5, %v2787_v49  ;;  %v3002_v6 = vadd.f32 0.4994258, %v3001_v39 }
 0x411   : > { %v2963_v18 = vmul.f32 %v2962_v13, %v7357_v54  ;;  %v3025_v1 = vadd.f32 0.00028619796, %v3024_v20  ;;  %v3036_v31 = vadd.f32 0.001143296, %v3035_v15  ;;  %v2783_v7 = vsel %vm7504_vm1, %v7341_v43, %v2779_v22 }
 0x412   : > { %v2989_v16 = vadd.f32 0.05243302, %v2988_v62  ;;  %v7493_v36 = vmul.f32 0.70710677, %v7482_v9  ;;  %v7509_v25 = vmul.f32 %v7399_v2, %v2788_v17  ;;  %v7520_v14 = vmul.f32 0.5, %v7315_v3 }
 0x413   : > { %v7488_v27 = vadd.f32 1.0, %v2963_v18  ;;  %v3026_v8 = vmul.f32 %v3025_v1, %v7476_v32  ;;  %v3037_v34 = vmul.f32 %v3036_v31, %v7476_v32  ;;  %v3003_v49 = vmul.f32 %v3002_v6, %v7428_v44 }
 0x414   : > { %v2990_v30 = vmul.f32 %v2989_v16, %v7428_v44  ;;  %v3062_v61 = vmul.f32 %v7493_v36, %v7493_v36  ;;  %v2953_v18 = vadd.f32 1.1283791, %v2952_v28  ;;  %v7533_v1 = vmul.f32 %v2783_v7, %v7176_v10 }
 0x415   : > { %4847 = vrcp.f32 %v7488_v27  ;;  %v3027_v58 = vadd.f32 0.0036580483, %v3026_v8  ;;  %v3038_v52 = vadd.f32 0.014752088, %v3037_v34  ;;  %v7529_v43 = vadd.f32 1.0, %v3003_v49 }
 0x416   : > { %v2991_v13 = vadd.f32 0.18741608, %v2990_v30  ;;  %v7514_v54 = vmin.f32 %v3062_v61, 16.0  ;;  %v2974_v8 = vand.u32 2147483647, %v7488_v27  ;;  %v7542_v34 = vmul.f32 0.5, %v7375_v42 }
 0x417   : > { %v3028_v57 = vmul.f32 %v3027_v58, %v7476_v32  ;;  %v3039_v26 = vmul.f32 %v3038_v52, %v7476_v32  ;;  %4849 = vrcp.f32 %v7529_v43  ;;  %v2976_v10 = vand.u32 2147483648, %v7488_v27 }
 0x418   : > { %v3064_v60 = vmul.f32 2.1237322e-06, %v7514_v54  ;;  %v3075_v3 = vmul.f32 3.8918573e-05, %v7514_v54  ;;  %v7550_v58 = vmul.f32 0.70710677, %v7533_v1  ;;  %v7553_v42 = vmul.f32 %v7450_v55, %v2798_v37 }
 0x419   : > { %v3040_v20 = vadd.f32 0.112945676, %v3039_v26  ;;  %v3029_v62 = vadd.f32 0.05243302, %v3028_v57  ;;  %v2954_v52 = vmul.f32 %v2953_v18, %v7320_v33  ;;  %vm2970_vm6 = vweird.f32 %v7488_v27 }
 0x41a   : > { %v3065_v47 = vadd.f32 0.00028619796, %v3064_v60  ;;  %v3076_v39 = vadd.f32 0.001143296, %v3075_v3  ;;  %v3102_v6 = vmul.f32 %v7550_v58, %v7550_v58  ;;  %vm2975_vm9 = vcmp.eq.f32.partialorder %v2974_v8, 8.507059e+37 }
 0x41b   : > { %v4848_v15 = vpop.eup %4847  ;;  %v3041_v16 = vmul.f32 %v3040_v20, %v7476_v32  ;;  %v3030_v22 = vmul.f32 %v3029_v62, %v7476_v32  ;;  %v2977_v57 = vor.u32 1.1754944e-38, %v2976_v10  ;;  %v3014_v62 = vand.u32 2147483647, %v7529_v43 }
 0x41c   : > { %v2966_v35 = vmul.f32 %v4848_v15, %v7488_v27  ;;  %vm2971_vm4 = vweird.f32 %v4848_v15  ;;  %v7565_v37 = vmin.f32 %v3102_v6, 16.0  ;;  %vm3010_vm10 = vweird.f32 %v7529_v43 }
 0x41d   : > { %v3042_v30 = vadd.f32 0.4994258, %v3041_v16  ;;  %vm2972_vm8 = vmor %vm2970_vm6, %vm2971_vm4  ;;  %v3031_v26 = vadd.f32 0.18741608, %v3030_v22  ;;  %v4850_v33 = vpop.eup %4849  ;;  %v2793_v45 = vsel %vm7577_vm11, %v7399_v2, %v7509_v25  ;;  %vm7590_vm13 = vcmp.eq.f32.partialorder %v3014_v62, 8.507059e+37 }
 0x41e   : > { %v2610_v24 = vpop.xlane.xlu2 %2609  ;;  %v2967_v17 = vsub.f32 1.0, %v2966_v35  ;;  %v3006_v18 = vmul.f32 %v4850_v33, %v7529_v43  ;;  %v3016_v35 = vand.u32 2147483648, %v7529_v43  ;;  %vm3011_vm12 = vweird.f32 %v4850_v33 }
 0x41f   : > { %v2635_v41 = vmul.f32 %v7140_v5, %v2610_v24  ;;  %v3043_v40 = vmul.f32 %v3042_v30, %v7476_v32  ;;  %v3077_v24 = vmul.f32 %v3076_v39, %v7514_v54  ;;  %v3032_v3 = vmul.f32 %v3031_v26, %v7476_v32  ;;  %vm3012_vm15 = vmor %vm3010_vm10, %vm3011_vm12 }
 0x420   : > { %v2968_v56 = vmul.f32 %v4848_v15, %v2967_v17  ;;  %v3115_v17 = vmul.f32 3.8918573e-05, %v7565_v37 }
 0x421   : > { %v7524_v59 = vsub.f32 %v7205_v38, %v2635_v41  ;;  %v2992_v38 = vmul.f32 %v2991_v13, %v7428_v44  ;;  %v3066_v44 = vmul.f32 %v3065_v47, %v7514_v54  ;;  %v7563_v27 = vadd.f32 1.0, %v3043_v40 }
 0x422   : > { %v2969_v61 = vadd.f32 %v4848_v15, %v2968_v56  ;;  %v3078_v7 = vadd.f32 0.014752088, %v3077_v24  ;;  %v3104_v47 = vmul.f32 2.1237322e-06, %v7565_v37  ;;  %v3116_v30 = vadd.f32 0.001143296, %v3115_v17 }
 0x423   : > { %v2667_v31 = vmul.f32 %v7524_v59, %v7524_v59  ;;  %v2993_v28 = vadd.f32 1.1283791, %v2992_v38  ;;  %v3067_v41 = vadd.f32 0.0036580483, %v3066_v44  ;;  %4851 = vrcp.f32 %v7563_v27 }
 0x424   : > { %v2973_v13 = vsel %vm2972_vm8, %v4848_v15, %v2969_v61  ;;  %v3079_v38 = vmul.f32 %v3078_v7, %v7514_v54  ;;  %v3017_v44 = vor.u32 1.1754944e-38, %v3016_v35  ;;  %v3105_v56 = vadd.f32 0.00028619796, %v3104_v47 }
 0x425   : > { %2696 = vadd.xlane.f32.xlu1 %v2667_v31  ;;  %v2978_v49 = vsel %vm2975_vm9, %v2977_v57, %v2973_v13  ;;  %v2994_v20 = vmul.f32 %v2993_v28, %v7394_v12  ;;  %v3007_v12 = vsub.f32 1.0, %v3006_v18  ;;  %v3068_v31 = vmul.f32 %v3067_v41, %v7514_v54 }
 0x426   : > { %v2979_v60 = vmul.f32 %v2978_v49, %v2954_v52  ;;  %v3080_v32 = vadd.f32 0.112945676, %v3079_v38  ;;  %v3033_v25 = vadd.f32 1.1283791, %v3032_v3  ;;  %v7604_v28 = vmul.f32 %v2793_v45, %v7186_v48 }
 0x427   : > { %v3008_v8 = vmul.f32 %v4850_v33, %v3007_v12  ;;  %v3069_v24 = vadd.f32 0.05243302, %v3068_v31  ;;  %v3106_v53 = vmul.f32 %v3105_v56, %v7565_v37  ;;  %v3117_v6 = vmul.f32 %v3116_v30, %v7565_v37 }
 0x428   : > { %v4498_v16 = vclamps-f32 %v2979_v60, 1.0  ;;  %v3081_v52 = vmul.f32 %v3080_v32, %v7514_v54  ;;  %v3054_v41 = vand.u32 2147483647, %v7563_v27  ;;  %v2803_v48 = vsel %vm7598_vm14, %v7450_v55, %v7553_v42 }
 0x429   : > { %v3009_v2 = vadd.f32 %v4850_v33, %v3008_v8  ;;  %v4852_v61 = vpop.eup %4851  ;;  %v3107_v13 = vadd.f32 0.0036580483, %v3106_v53  ;;  %v3118_v7 = vadd.f32 0.014752088, %v3117_v6  ;;  %v7621_v62 = vmul.f32 0.70710677, %v7604_v28 }
 0x42a   : > { %v3582_v22 = vadd.f32 1.0, %v4498_v16  ;;  %v3046_v26 = vmul.f32 %v4852_v61, %v7563_v27  ;;  %v3082_v43 = vadd.f32 0.4994258, %v3081_v52  ;;  %v3070_v60 = vmul.f32 %v3069_v24, %v7514_v54 }
 0x42b   : > { %v3013_v57 = vsel %vm3012_vm15, %v4850_v33, %v3009_v2  ;;  %v3056_v33 = vand.u32 2147483648, %v7563_v27  ;;  %v3119_v55 = vmul.f32 %v3118_v7, %v7565_v37  ;;  %v7627_v42 = vmul.f32 %v2803_v48, %v7196_v46 }
 0x42c   : > { %v3598_v40 = vmul.f32 %v3582_v22, %v7520_v14  ;;  %v3018_v14 = vsel %vm7590_vm13, %v3017_v44, %v3013_v57  ;;  %v3047_v18 = vsub.f32 1.0, %v3046_v26  ;;  %v3083_v35 = vmul.f32 %v3082_v43, %v7514_v54 }
 0x42d   : > { %v3019_v49 = vmul.f32 %v3018_v14, %v2994_v20  ;;  %vm3051_vm0 = vweird.f32 %v4852_v61  ;;  %v3142_v20 = vmul.f32 %v7621_v62, %v7621_v62  ;;  %v3034_v3 = vmul.f32 %v3033_v25, %v7460_v51 }
 0x42e   : > { %3650 = vmatmul.f32.vlgmr.msrb.gmra.mxu0 %v3598_v40  ;;  %3735 = vmatmul.f32.vlgmr.msrb.gmra.mxu1 %v3598_v40  ;;  %v3048_v12 = vmul.f32 %v4852_v61, %v3047_v18  ;;  %v7632_v31 = vadd.f32 1.0, %v3083_v35  ;;  %v3108_v38 = vmul.f32 %v3107_v13, %v7565_v37  ;;  %v3120_v16 = vadd.f32 0.112945676, %v3119_v55 }
 0x42f   : > { %v4499_v15 = vclamps-f32 %v3019_v49, 1.0  ;;  %vm3050_vm1 = vweird.f32 %v7563_v27  ;;  %v7636_v45 = vmin.f32 %v3142_v20, 16.0  ;;  %v3057_v46 = vor.u32 1.1754944e-38, %v3056_v33 }
 0x430   : > { %v3049_v17 = vadd.f32 %v4852_v61, %v3048_v12  ;;  %vm3052_vm2 = vmor %vm3050_vm1, %vm3051_vm0  ;;  %v3071_v8 = vadd.f32 0.18741608, %v3070_v60  ;;  %4853 = vrcp.f32 %v7632_v31  ;;  %v7640_v10 = vmul.f32 0.70710677, %v7627_v42 }
 0x431   : > { %v3583_v47 = vadd.f32 1.0, %v4499_v15  ;;  %vm3055_vm3 = vcmp.eq.f32.partialorder %v3054_v41, 8.507059e+37  ;;  %v3121_v22 = vmul.f32 %v3120_v16, %v7565_v37  ;;  %v3109_v56 = vadd.f32 0.05243302, %v3108_v38 }
 0x432   : > { %v3053_v32 = vsel %vm3052_vm2, %v4852_v61, %v3049_v17  ;;  %v3144_v27 = vmul.f32 2.1237322e-06, %v7636_v45  ;;  %v3155_v2 = vmul.f32 3.8918573e-05, %v7636_v45  ;;  %v3072_v25 = vmul.f32 %v3071_v8, %v7514_v54 }
 0x433   : > { %v3599_v51 = vmul.f32 %v3583_v47, %v7542_v34  ;;  %v3058_v44 = vsel %vm3055_vm3, %v3057_v46, %v3053_v32  ;;  %v3122_v39 = vadd.f32 0.4994258, %v3121_v22  ;;  %v3182_v34 = vmul.f32 %v7640_v10, %v7640_v10 }
 0x434   : > { %v3059_v30 = vmul.f32 %v3058_v44, %v3034_v3  ;;  %v3145_v52 = vadd.f32 0.00028619796, %v3144_v27  ;;  %v3156_v24 = vadd.f32 0.001143296, %v3155_v2  ;;  %v3110_v6 = vmul.f32 %v3109_v56, %v7565_v37 }
 0x435   : > { %v3123_v40 = vmul.f32 %v3122_v39, %v7565_v37  ;;  %v7652_v26 = vmin.f32 %v3182_v34, 16.0  ;;  %v2912_v41 = vmul.f32 0.5, %v7439_v21  ;;  %v3073_v14 = vadd.f32 1.1283791, %v3072_v25 }
 0x436   : > { %3653 = vmatmul.f32.gmra.mxu0 %v3599_v51  ;;  %3738 = vmatmul.f32.gmra.mxu1 %v3599_v51  ;;  %v4500_v61 = vclamps-f32 %v3059_v30, 1.0  ;;  %v4854_v53 = vpop.eup %4853  ;;  %v3146_v57 = vmul.f32 %v3145_v52, %v7636_v45  ;;  %v3157_v13 = vmul.f32 %v3156_v24, %v7636_v45  ;;  %v3094_v33 = vand.u32 2147483647, %v7632_v31 }
 0x437   : > { %v3086_v54 = vmul.f32 %v4854_v53, %v7632_v31  ;;  %v7656_v43 = vadd.f32 1.0, %v3123_v40  ;;  %v3184_v7 = vmul.f32 2.1237322e-06, %v7652_v26  ;;  %v3195_v60 = vmul.f32 3.8918573e-05, %v7652_v26 }
 0x438   : > { %v3584_v48 = vadd.f32 1.0, %v4500_v61  ;;  %v3096_v35 = vand.u32 2147483648, %v7632_v31  ;;  %v3111_v55 = vadd.f32 0.18741608, %v3110_v6  ;;  %v3147_v21 = vadd.f32 0.0036580483, %v3146_v57 }
 0x439   : > { %v3087_v18 = vsub.f32 1.0, %v3086_v54  ;;  %4855 = vrcp.f32 %v7656_v43  ;;  %vm3091_vm4 = vweird.f32 %v4854_v53  ;;  %v3158_v12 = vadd.f32 0.014752088, %v3157_v13 }
 0x43a   : > { %v3600_v49 = vmul.f32 %v3584_v48, %v2912_v41  ;;  %v3185_v20 = vadd.f32 0.00028619796, %v3184_v7  ;;  %v3196_v3 = vadd.f32 0.001143296, %v3195_v60  ;;  %vm3090_vm5 = vweird.f32 %v7632_v31 }
 0x43b   : > { %v3088_v15 = vmul.f32 %v4854_v53, %v3087_v18  ;;  %v3159_v16 = vmul.f32 %v3158_v12, %v7636_v45  ;;  %v3074_v17 = vmul.f32 %v3073_v14, %v7493_v36  ;;  %vm3092_vm6 = vmor %vm3090_vm5, %vm3091_vm4  ;;  %v3097_v46 = vor.u32 1.1754944e-38, %v3096_v35 }
 0x43c   : > { %v3186_v47 = vmul.f32 %v3185_v20, %v7652_v26  ;;  %v3148_v8 = vmul.f32 %v3147_v21, %v7636_v45  ;;  %v3197_v51 = vmul.f32 %v3196_v3, %v7652_v26  ;;  %vm3095_vm7 = vcmp.eq.f32.partialorder %v3094_v33, 8.507059e+37 }
 0x43d   : > { %v3089_v38 = vadd.f32 %v4854_v53, %v3088_v15  ;;  %v3112_v22 = vmul.f32 %v3111_v55, %v7565_v37  ;;  %v3160_v44 = vadd.f32 0.112945676, %v3159_v16  ;;  %v3134_v24 = vand.u32 2147483647, %v7656_v43  ;;  %v2687_v16 = vpop.xlane.xlu0 %2686 }
 0x43e   : > { %3656 = vmatmul.f32.gmra.mxu0 %v3600_v49  ;;  %3741 = vmatmul.f32.gmra.mxu1 %v3600_v49  ;;  %v3198_v31 = vadd.f32 0.014752088, %v3197_v51  ;;  %v3187_v2 = vadd.f32 0.0036580483, %v3186_v47  ;;  %v3149_v25 = vadd.f32 0.05243302, %v3148_v8  ;;  %vm3130_vm9 = vweird.f32 %v7656_v43 }
 0x43f   : > { %v3093_v32 = vsel %vm3092_vm6, %v4854_v53, %v3089_v38  ;;  %v4856_v56 = vpop.eup %4855  ;;  %v3161_v36 = vmul.f32 %v3160_v44, %v7636_v45  ;;  %v3113_v61 = vadd.f32 1.1283791, %v3112_v22  ;;  %v2913_v37 = vmul.f32 0.5, %v7482_v9  ;;  %v2685_v38 = vpop.xlane.xlu1 %2684 }
 0x440   : > { %v3098_v27 = vsel %vm3095_vm7, %v3097_v46, %v3093_v32  ;;  %v3126_v39 = vmul.f32 %v4856_v56, %v7656_v43  ;;  %v3199_v52 = vmul.f32 %v3198_v31, %v7652_v26  ;;  %v3136_v53 = vand.u32 2147483648, %v7656_v43 }
 0x441   : > { %v3099_v30 = vmul.f32 %v3098_v27, %v3074_v17  ;;  %v3162_v6 = vadd.f32 0.4994258, %v3161_v36  ;;  %vm3131_vm8 = vweird.f32 %v4856_v56  ;;  %v3188_v54 = vmul.f32 %v3187_v2, %v7652_v26 }
 0x442   : > { %v3127_v40 = vsub.f32 1.0, %v3126_v39  ;;  %v3200_v57 = vadd.f32 0.112945676, %v3199_v52  ;;  %v3150_v14 = vmul.f32 %v3149_v25, %v7636_v45  ;;  %vm3132_vm10 = vmor %vm3130_vm9, %vm3131_vm8  ;;  %v3137_v9 = vor.u32 1.1754944e-38, %v3136_v53 }
 0x443   : > { %v4501_v34 = vclamps-f32 %v3099_v30, 1.0  ;;  %v3163_v13 = vmul.f32 %v3162_v6, %v7636_v45  ;;  %v3114_v35 = vmul.f32 %v3113_v61, %v7550_v58  ;;  %vm3135_vm11 = vcmp.eq.f32.partialorder %v3134_v24, 8.507059e+37 }
 0x444   : > { %v3128_v48 = vmul.f32 %v4856_v56, %v3127_v40  ;;  %v3201_v7 = vmul.f32 %v3200_v57, %v7652_v26  ;;  %v3189_v21 = vadd.f32 0.05243302, %v3188_v54  ;;  %v3151_v12 = vadd.f32 0.18741608, %v3150_v14 }
 0x445   : > { %v3585_v41 = vadd.f32 1.0, %v4501_v34  ;;  %v3164_v33 = vadd.f32 1.0, %v3163_v13  ;;  %v2914_v8 = vmul.f32 0.5, %v7533_v1  ;;  %v2709_v32 = vmul.f32 %v2685_v38, %v7140_v5  ;;  %v2614_v2 = vpop.xlane.xlu0 %2613 }
 0x446   : > { %v3129_v18 = vadd.f32 %v4856_v56, %v3128_v48  ;;  %v3202_v60 = vadd.f32 0.4994258, %v3201_v7  ;;  %v3190_v47 = vmul.f32 %v3189_v21, %v7652_v26  ;;  %v3152_v46 = vmul.f32 %v3151_v12, %v7636_v45 }
 0x447   : > { %v3601_v49 = vmul.f32 %v3585_v41, %v2913_v37  ;;  %4857 = vrcp.f32 %v3164_v33  ;;  %v3174_v30 = vand.u32 2147483647, %v3164_v33  ;;  %v2612_v39 = vpop.xlane.xlu1 %2611  ;;  %v3176_v25 = vand.u32 2147483648, %v3164_v33 }
 0x448   : > { %v3133_v55 = vsel %vm3132_vm10, %v4856_v56, %v3129_v18  ;;  %v3203_v3 = vmul.f32 %v3202_v60, %v7652_v26  ;;  %v3191_v56 = vadd.f32 0.18741608, %v3190_v47  ;;  %v3153_v27 = vadd.f32 1.1283791, %v3152_v46 }
 0x449   : > { %3659 = vmatmul.f32.gmra.mxu0 %v3601_v49  ;;  %3744 = vmatmul.f32.gmra.mxu1 %v3601_v49  ;;  %v3138_v15 = vsel %vm3135_vm11, %v3137_v9, %v3133_v55  ;;  %v7688_v36 = vadd.f32 1e-05, %v2709_v32  ;;  %v2636_v1 = vmul.f32 %v7140_v5, %v2612_v39  ;;  %v2637_v45 = vmul.f32 %v7140_v5, %v2614_v2 }
 0x44a   : > { %v3139_v20 = vmul.f32 %v3138_v15, %v3114_v35  ;;  %v3204_v17 = vadd.f32 1.0, %v3203_v3  ;;  %v3192_v61 = vmul.f32 %v3191_v56, %v7652_v26  ;;  %v3154_v40 = vmul.f32 %v3153_v27, %v7621_v62  ;;  %v2689_v35 = vpop.xlane.xlu2 %2688 }
 0x44b   : > { %v7695_v37 = vsub.f32 %v7225_v4, %v2636_v1  ;;  %v7698_v53 = vsub.f32 %v7228_v29, %v2637_v45  ;;  %vm3170_vm13 = vweird.f32 %v3164_v33  ;;  %vm3175_vm14 = vcmp.eq.f32.partialorder %v3174_v30, 8.507059e+37 }
 0x44c   : > { %v4502_v43 = vclamps-f32 %v3139_v20, 1.0  ;;  %4859 = vrcp.f32 %v3204_v17  ;;  %v2710_v57 = vmul.f32 %v2687_v16, %v7140_v5  ;;  %v3177_v41 = vor.u32 1.1754944e-38, %v3176_v25 }
 0x44d   : > { %v4858_v51 = vpop.eup %4857  ;;  %4861 = vrsqrt.f32 %v7688_v36  ;;  %v2668_v62 = vmul.f32 %v7695_v37, %v7695_v37  ;;  %v3193_v54 = vadd.f32 1.1283791, %v3192_v61  ;;  %v3216_v4 = vand.u32 2147483648, %v3204_v17 }
 0x44e   : > { %v3586_v58 = vadd.f32 1.0, %v4502_v43  ;;  %v3166_v44 = vmul.f32 %v4858_v51, %v3164_v33  ;;  %vm3171_vm12 = vweird.f32 %v4858_v51  ;;  %v2669_v29 = vmul.f32 %v7698_v53, %v7698_v53 }
 0x44f   : > { %vm3172_vm15 = vmor %vm3170_vm13, %vm3171_vm12  ;;  %v3214_v7 = vand.u32 2147483647, %v3204_v17  ;;  %2698 = vadd.xlane.f32.xlu2 %v2668_v62  ;;  %vm3210_vm1 = vweird.f32 %v3204_v17  ;;  %v2726_v9 = vadd.f32 1e-05, %v2710_v57  ;;  %v3217_v60 = vor.u32 1.1754944e-38, %v3216_v4 }
 0x450   : > { %v3602_v22 = vmul.f32 %v3586_v58, %v2914_v8  ;;  %v3167_v31 = vsub.f32 1.0, %v3166_v44  ;;  %2700 = vadd.xlane.f32.xlu0 %v2669_v29  ;;  %v3194_v21 = vmul.f32 %v3193_v54, %v7640_v10  ;;  %v2915_v12 = vmul.f32 0.5, %v7604_v28 }
 0x451   : > { %vm3215_vm3 = vcmp.eq.f32.partialorder %v3214_v7, 8.507059e+37  ;;  %4863 = vrsqrt.f32 %v2726_v9  ;;  %v2711_v16 = vmul.f32 %v2689_v35, %v7140_v5  ;;  %v2916_v10 = vmul.f32 0.5, %v7627_v42 }
 0x452   : > { %3662 = vmatmul.f32.gmra.mxu0 %v3602_v22  ;;  %3747 = vmatmul.f32.gmra.mxu1 %v3602_v22  ;;  %v4860_v52 = vpop.eup %4859  ;;  %v3168_v34 = vmul.f32 %v4858_v51, %v3167_v31  ;;  %vm2810_vm5 = vweird.f32 %v7688_v36  ;;  %vm2820_vm8 = vweird.f32 %v2726_v9 }
 0x453   : > { %v3206_v24 = vmul.f32 %v4860_v52, %v3204_v17  ;;  %vm3211_vm0 = vweird.f32 %v4860_v52  ;;  %v4862_v55 = vpop.eup %4861  ;;  %v7710_v8 = vadd.f32 1e-05, %v2711_v16 }
 0x454   : > { %v3169_v6 = vadd.f32 %v4858_v51, %v3168_v34  ;;  %vm3212_vm2 = vmor %vm3210_vm1, %vm3211_vm0  ;;  %v2805_v47 = vmul.f32 %v4862_v55, %v7688_v36  ;;  %vm2811_vm4 = vweird.f32 %v4862_v55 }
 0x455   : > { %v3207_v48 = vsub.f32 1.0, %v3206_v24  ;;  %4865 = vrsqrt.f32 %v7710_v8  ;;  %vm2812_vm6 = vmor %vm2810_vm5, %vm2811_vm4  ;;  %vm2830_vm11 = vweird.f32 %v7710_v8 }
 0x456   : > { %v3173_v26 = vsel %vm3172_vm15, %v4858_v51, %v3169_v6  ;;  %v2806_v58 = vmul.f32 %v4862_v55, %v2805_v47  ;;  %v2691_v51 = vpop.xlane.xlu1 %2690 }
 0x457   : > { %v3178_v14 = vsel %vm3175_vm14, %v3177_v41, %v3173_v26  ;;  %v3208_v13 = vmul.f32 %v4860_v52, %v3207_v48  ;;  %v4864_v28 = vpop.eup %4863  ;;  %v2712_v22 = vmul.f32 %v2691_v51, %v7140_v5 }
 0x458   : > { %v3179_v49 = vmul.f32 %v3178_v14, %v3154_v40  ;;  %v2807_v44 = vmul.f32 0.5, %v2806_v58  ;;  %v2815_v56 = vmul.f32 %v4864_v28, %v2726_v9  ;;  %vm2821_vm7 = vweird.f32 %v4864_v28 }
 0x459   : > { %v3209_v18 = vadd.f32 %v4860_v52, %v3208_v13  ;;  %v7715_v27 = vadd.f32 1e-05, %v2712_v22  ;;  %vm2822_vm9 = vmor %vm2820_vm8, %vm2821_vm7 }
 0x45a   : > { %v4503_v33 = vclamps-f32 %v3179_v49, 1.0  ;;  %v2808_v31 = vsub.f32 1.5, %v2807_v44  ;;  %v2816_v30 = vmul.f32 %v4864_v28, %v2815_v56 }
 0x45b   : > { %v3213_v15 = vsel %vm3212_vm2, %v4860_v52, %v3209_v18  ;;  %v4866_v39 = vpop.eup %4865  ;;  %4867 = vrsqrt.f32 %v7715_v27  ;;  %vm2840_vm14 = vweird.f32 %v7715_v27 }
 0x45c   : > { %v3587_v20 = vadd.f32 1.0, %v4503_v33  ;;  %v3218_v3 = vsel %vm3215_vm3, %v3217_v60, %v3213_v15  ;;  %v2809_v42 = vmul.f32 %v4862_v55, %v2808_v31  ;;  %v2817_v25 = vmul.f32 0.5, %v2816_v30 }
 0x45d   : > { %v3219_v38 = vmul.f32 %v3218_v3, %v3194_v21  ;;  %v2825_v1 = vmul.f32 %v4866_v39, %v7710_v8  ;;  %vm2831_vm10 = vweird.f32 %v4866_v39 }
 0x45e   : > { %v3603_v43 = vmul.f32 %v3587_v20, %v2915_v12  ;;  %v2818_v52 = vsub.f32 1.5, %v2817_v25  ;;  %v2813_v40 = vsel %vm2812_vm6, %v4862_v55, %v2809_v42  ;;  %vm2832_vm12 = vmor %vm2830_vm11, %vm2831_vm10  ;;  %vm3800_vm10 = vcmask 64512  }
 0x45f   : > { %v4504_v17 = vclamps-f32 %v3219_v38, 1.0  ;;  %v2826_v34 = vmul.f32 %v4866_v39, %v2825_v1  ;;  %v7726_v6 = vmul.f32 %v2813_v40, %v7211_v50 }
 0x460   : > { %3665 = vmatmul.f32.gmra.mxu0 %v3603_v43  ;;  %3750 = vmatmul.f32.gmra.mxu1 %v3603_v43  ;;  %v2819_v48 = vmul.f32 %v4864_v28, %v2818_v52 }
 0x461   : > { %v3588_v46 = vadd.f32 1.0, %v4504_v17  ;;  %v7723_v24 = vpop.eup %4867  ;;  %v7729_v41 = vmul.f32 0.70710677, %v7726_v6  ;;  %v2827_v62 = vmul.f32 0.5, %v2826_v34 }
 0x462   : > { %v2835_v36 = vmul.f32 %v7723_v24, %v7715_v27  ;;  %v2823_v14 = vsel %vm2822_vm9, %v4864_v28, %v2819_v48  ;;  %vm2841_vm13 = vweird.f32 %v7723_v24 }
 0x463   : > { %v3604_v32 = vmul.f32 %v3588_v46, %v2916_v10  ;;  %v3222_v54 = vmul.f32 %v7729_v41, %v7729_v41  ;;  %v2828_v4 = vsub.f32 1.5, %v2827_v62  ;;  %v7745_v18 = vmul.f32 %v2823_v14, %v7213_v63  ;;  %vm7788_vm15 = vmor %vm2840_vm14, %vm2841_vm13 }
 0x464   : > { %v2836_v29 = vmul.f32 %v7723_v24, %v2835_v36 }
 0x465   : > { %v7737_v50 = vmin.f32 %v3222_v54, 16.0  ;;  %v2829_v35 = vmul.f32 %v4866_v39, %v2828_v4  ;;  %v7750_v21 = vmul.f32 0.70710677, %v7745_v18 }
 0x466   : > { %v2837_v55 = vmul.f32 0.5, %v2836_v29 }
 0x467   : > { %v3224_v7 = vmul.f32 2.1237322e-06, %v7737_v50  ;;  %v3235_v49 = vmul.f32 3.8918573e-05, %v7737_v50  ;;  %v3262_v20 = vmul.f32 %v7750_v21, %v7750_v21  ;;  %v2833_v47 = vsel %vm2832_vm12, %v4866_v39, %v2829_v35 }
 0x468   : > { %3668 = vmatmul.f32.gmra.mxu0 %v3604_v32  ;;  %3753 = vmatmul.f32.gmra.mxu1 %v3604_v32  ;;  %v2838_v16 = vsub.f32 1.5, %v2837_v55  ;;  %v7766_v58 = vmul.f32 %v2833_v47, %v7215_v11 }
 0x469   : > { %v3225_v60 = vadd.f32 0.00028619796, %v3224_v7  ;;  %v3236_v9 = vadd.f32 0.001143296, %v3235_v49  ;;  %v7760_v43 = vmin.f32 %v3262_v20, 16.0 }
 0x46a   : > { %v2693_v2 = vpop.xlane.xlu2 %2692  ;;  %v7773_v31 = vmul.f32 0.70710677, %v7766_v58  ;;  %v2839_v30 = vmul.f32 %v7723_v24, %v2838_v16  ;;  %v7817_v16 = vmul.f32 0.5, %v7726_v6 }
 0x46b   : > { %v2713_v45 = vmul.f32 %v2693_v2, %v7140_v5  ;;  %v3226_v12 = vmul.f32 %v3225_v60, %v7737_v50  ;;  %v3237_v63 = vmul.f32 %v3236_v9, %v7737_v50  ;;  %v3264_v8 = vmul.f32 2.1237322e-06, %v7760_v43 }
 0x46c   : > { %v3275_v51 = vmul.f32 3.8918573e-05, %v7760_v43  ;;  %v3302_v1 = vmul.f32 %v7773_v31, %v7773_v31  ;;  %v2843_v27 = vsel %vm7788_vm15, %v7723_v24, %v2839_v30 }
 0x46d   : > { %v7721_v61 = vadd.f32 1e-05, %v2713_v45  ;;  %v3227_v3 = vadd.f32 0.0036580483, %v3226_v12  ;;  %v3238_v38 = vadd.f32 0.014752088, %v3237_v63 }
 0x46e   : > { %v3265_v44 = vadd.f32 0.00028619796, %v3264_v8  ;;  %v3276_v56 = vadd.f32 0.001143296, %v3275_v51 }
 0x46f   : > { %4869 = vrsqrt.f32 %v7721_v61  ;;  %v3228_v46 = vmul.f32 %v3227_v3, %v7737_v50  ;;  %v3239_v10 = vmul.f32 %v3238_v38, %v7737_v50  ;;  %vm2850_vm1 = vweird.f32 %v7721_v61 }
 0x470   : > { %v3266_v42 = vmul.f32 %v3265_v44, %v7760_v43  ;;  %v3277_v25 = vmul.f32 %v3276_v56, %v7760_v43 }
 0x471   : > { %v3229_v32 = vadd.f32 0.05243302, %v3228_v46  ;;  %v3240_v22 = vadd.f32 0.112945676, %v3239_v10 }
 0x472   : > { %v3267_v34 = vadd.f32 0.0036580483, %v3266_v42  ;;  %v3278_v40 = vadd.f32 0.014752088, %v3277_v25 }
 0x473   : > { %v3241_v11 = vmul.f32 %v3240_v22, %v7737_v50  ;;  %v3230_v45 = vmul.f32 %v3229_v32, %v7737_v50 }
 0x474   : > { %v3268_v29 = vmul.f32 %v3267_v34, %v7760_v43  ;;  %v3279_v49 = vmul.f32 %v3278_v40, %v7760_v43 }
 0x475   : > { %v7747_v33 = vpop.eup %4869  ;;  %v3242_v52 = vadd.f32 0.4994258, %v3241_v11  ;;  %v3231_v14 = vadd.f32 0.18741608, %v3230_v45 }
 0x476   : > { %v2845_v15 = vmul.f32 %v7747_v33, %v7721_v61  ;;  %v3269_v35 = vadd.f32 0.05243302, %v3268_v29  ;;  %vm2851_vm0 = vweird.f32 %v7747_v33  ;;  %v3280_v3 = vadd.f32 0.112945676, %v3279_v49 }
 0x477   : > { %v3232_v20 = vmul.f32 %v3231_v14, %v7737_v50  ;;  %vm7819_vm2 = vmor %vm2850_vm1, %vm2851_vm0 }
 0x478   : > { %v2846_v17 = vmul.f32 %v7747_v33, %v2845_v15  ;;  %v7809_v15 = vmul.f32 %v2843_v27, %v7249_v23  ;;  %v3270_v63 = vmul.f32 %v3269_v35, %v7760_v43  ;;  %v3281_v46 = vmul.f32 %v3280_v3, %v7760_v43 }
 0x479   : > { %v3233_v22 = vadd.f32 1.1283791, %v3232_v20 }
 0x47a   : > { %v2847_v39 = vmul.f32 0.5, %v2846_v17  ;;  %v7824_v17 = vmul.f32 0.5, %v7745_v18  ;;  %v3271_v61 = vadd.f32 0.18741608, %v3270_v63  ;;  %v3282_v44 = vadd.f32 0.4994258, %v3281_v46 }
 0x47c   : > { %v2848_v62 = vsub.f32 1.5, %v2847_v39  ;;  %v3272_v34 = vmul.f32 %v3271_v61, %v7760_v43 }
 0x47e   : > { %v2849_v24 = vmul.f32 %v7747_v33, %v2848_v62 }
 0x480   : > { %v2853_v51 = vsel %vm7819_vm2, %v7747_v33, %v2849_v24  ;;  %v3283_v33 = vmul.f32 %v3282_v44, %v7760_v43  ;;  %v3273_v24 = vadd.f32 1.1283791, %v3272_v34 }
 0x481   : > { %v7847_v45 = vmul.f32 %v2853_v51, %v7280_v19 }
 0x482   : > { %v2695_v57 = vpop.xlane.xlu0 %2694 }
 0x483   : > { %v2714_v26 = vmul.f32 %v2695_v57, %v7140_v5  ;;  %v7786_v57 = vmin.f32 %v3302_v1, 16.0  ;;  %v7868_v35 = vmul.f32 0.70710677, %v7847_v45 }
 0x485   : > { %v7740_v13 = vadd.f32 1e-05, %v2714_v26  ;;  %v3243_v26 = vmul.f32 %v3242_v52, %v7737_v50  ;;  %v3304_v60 = vmul.f32 2.1237322e-06, %v7786_v57  ;;  %v3315_v55 = vmul.f32 3.8918573e-05, %v7786_v57 }
 0x486   : > { %v7829_v50 = vmul.f32 0.70710677, %v7809_v15 }
 0x487   : > { %4871 = vrsqrt.f32 %v7740_v13  ;;  %v7799_v7 = vadd.f32 1.0, %v3243_v26  ;;  %v3305_v38 = vadd.f32 0.00028619796, %v3304_v60  ;;  %v3316_v47 = vadd.f32 0.001143296, %v3315_v55 }
 0x488   : > { %v3342_v56 = vmul.f32 %v7829_v50, %v7829_v50  ;;  %vm2860_vm5 = vweird.f32 %v7740_v13  ;;  %v3234_v55 = vmul.f32 %v3233_v22, %v7729_v41  ;;  %v7880_v41 = vld [vmem:[%s8390_s6] ss:$0 sm:$0xff]  ;;  %v3274_v22 = vmul.f32 %v3273_v24, %v7750_v21 }
 0x489   : > { %4873 = vrcp.f32 %v7799_v7  ;;  %v3306_v10 = vmul.f32 %v3305_v38, %v7786_v57  ;;  %v3317_v6 = vmul.f32 %v3316_v47, %v7786_v57  ;;  %v3254_v11 = vand.u32 2147483647, %v7799_v7 }
 0x48a   : > { %v7851_v48 = vmin.f32 %v3342_v56, 16.0  ;;  %vm3250_vm6 = vweird.f32 %v7799_v7 }
 0x48b   : > { %v3307_v18 = vadd.f32 0.0036580483, %v3306_v10  ;;  %v3318_v42 = vadd.f32 0.014752088, %v3317_v6  ;;  %vm3255_vm8 = vcmp.eq.f32.partialorder %v3254_v11, 8.507059e+37  ;;  %v3382_v6 = vmul.f32 %v7868_v35, %v7868_v35 }
 0x48c   : > { %v3344_v19 = vmul.f32 2.1237322e-06, %v7851_v48  ;;  %v3355_v29 = vmul.f32 3.8918573e-05, %v7851_v48 }
 0x48d   : > { %v7770_v28 = vpop.eup %4871  ;;  %v3308_v1 = vmul.f32 %v3307_v18, %v7786_v57  ;;  %v3319_v40 = vmul.f32 %v3318_v42, %v7786_v57 }
 0x48e   : > { %v2855_v2 = vmul.f32 %v7770_v28, %v7740_v13  ;;  %vm2861_vm3 = vweird.f32 %v7770_v28  ;;  %v3356_v63 = vadd.f32 0.001143296, %v3355_v29 }
 0x48f   : > { %v4874_v32 = vpop.eup %4873  ;;  %v3309_v26 = vadd.f32 0.05243302, %v3308_v1  ;;  %vm7907_vm12 = vmor %vm2860_vm5, %vm2861_vm3 }
 0x490   : > { %v2856_v54 = vmul.f32 %v7770_v28, %v2855_v2  ;;  %v3246_v39 = vmul.f32 %v4874_v32, %v7799_v7  ;;  %v3256_v2 = vand.u32 2147483648, %v7799_v7  ;;  %vm3251_vm4 = vweird.f32 %v4874_v32 }
 0x491   : > { %v3310_v49 = vmul.f32 %v3309_v26, %v7786_v57  ;;  %vm3252_vm7 = vmor %vm3250_vm6, %vm3251_vm4  ;;  %v3357_v46 = vmul.f32 %v3356_v63, %v7851_v48 }
 0x492   : > { %v2857_v12 = vmul.f32 0.5, %v2856_v54  ;;  %v3247_v52 = vsub.f32 1.0, %v3246_v39  ;;  %v3257_v27 = vor.u32 1.1754944e-38, %v3256_v2 }
 0x493   : > { %v3358_v18 = vadd.f32 0.014752088, %v3357_v46 }
 0x494   : > { %v2858_v8 = vsub.f32 1.5, %v2857_v12  ;;  %v3248_v54 = vmul.f32 %v4874_v32, %v3247_v52  ;;  %v3345_v12 = vadd.f32 0.00028619796, %v3344_v19 }
 0x496   : > { %v7860_v43 = vmul.f32 %v7770_v28, %v2858_v8  ;;  %v3249_v14 = vadd.f32 %v4874_v32, %v3248_v54  ;;  %v3346_v23 = vmul.f32 %v3345_v12, %v7851_v48  ;;  %v3311_v8 = vadd.f32 0.18741608, %v3310_v49 }
 0x497   : > { %v7913_v54 = vmin.f32 %v3382_v6, 16.0 }
 0x498   : > { %v2697_v36 = vpop.xlane.xlu1 %2696  ;;  %v3253_v7 = vsel %vm3252_vm7, %v4874_v32, %v3249_v14  ;;  %v7888_v32 = vld [vmem:[%s8392_s8] ss:$0 sm:$0xff]  ;;  %v3347_v44 = vadd.f32 0.0036580483, %v3346_v23  ;;  %v3312_v26 = vmul.f32 %v3311_v8, %v7786_v57  ;;  %v2863_v13 = vsel %vm7907_vm12, %v7770_v28, %v7860_v43 }
 0x499   : > { %v2715_v4 = vmul.f32 %v2697_v36, %v7140_v5  ;;  %v7855_v36 = vadd.f32 1.0, %v3283_v33  ;;  %v3258_v38 = vsel %vm3255_vm8, %v3257_v27, %v3253_v7  ;;  %v3359_v33 = vmul.f32 %v3358_v18, %v7851_v48 }
 0x49a   : > { %v3259_v10 = vmul.f32 %v3258_v38, %v3234_v55  ;;  %v3348_v21 = vmul.f32 %v3347_v44, %v7851_v48  ;;  %v3313_v24 = vadd.f32 1.1283791, %v3312_v26  ;;  %v3384_v12 = vmul.f32 2.1237322e-06, %v7913_v54 }
 0x49b   : > { %v7803_v9 = vadd.f32 1e-05, %v2715_v4  ;;  %v3320_v4 = vadd.f32 0.112945676, %v3319_v40  ;;  %v3294_v47 = vand.u32 2147483647, %v7855_v36  ;;  %vm3290_vm9 = vweird.f32 %v7855_v36 }
 0x49c   : > { %v4505_v39 = vclamps-f32 %v3259_v10, 1.0  ;;  %v3296_v2 = vand.u32 2147483648, %v7855_v36  ;;  %v3349_v49 = vadd.f32 0.05243302, %v3348_v21  ;;  %v7927_v63 = vmul.f32 %v2863_v13, %v7403_v0 }
 0x49d   : > { %4875 = vrsqrt.f32 %v7803_v9  ;;  %v3321_v60 = vmul.f32 %v3320_v4, %v7786_v57  ;;  %vm7895_vm11 = vcmp.eq.f32.partialorder %v3294_v47, 8.507059e+37  ;;  %v3395_v7 = vmul.f32 3.8918573e-05, %v7913_v54 }
 0x49e   : > { %4877 = vrcp.f32 %v7855_v36  ;;  %v3589_v40 = vadd.f32 1.0, %v4505_v39  ;;  %v3297_v14 = vor.u32 1.1754944e-38, %v3296_v2  ;;  %v3385_v23 = vadd.f32 0.00028619796, %v3384_v12 }
 0x49f   : > { %v3322_v3 = vadd.f32 0.4994258, %v3321_v60  ;;  %v3360_v60 = vadd.f32 0.112945676, %v3359_v33  ;;  %vm2870_vm15 = vweird.f32 %v7803_v9  ;;  %v7942_v44 = vmul.f32 0.70710677, %v7927_v63 }
 0x4a0   : > { %v3605_v29 = vmul.f32 %v3589_v40, %v7817_v16  ;;  %v3350_v16 = vmul.f32 %v3349_v49, %v7851_v48  ;;  %v3396_v21 = vadd.f32 0.001143296, %v3395_v7 }
 0x4a1   : > { %v3323_v61 = vmul.f32 %v3322_v3, %v7786_v57  ;;  %v3361_v43 = vmul.f32 %v3360_v60, %v7851_v48 }
 0x4a2   : > { %3671 = vmatmul.f32.gmra.mxu0 %v3605_v29  ;;  %3756 = vmatmul.f32.gmra.mxu1 %v3605_v29  ;;  %v3351_v10 = vadd.f32 0.18741608, %v3350_v16  ;;  %v3314_v29 = vmul.f32 %v3313_v24, %v7773_v31  ;;  %v3422_v31 = vmul.f32 %v7942_v44, %v7942_v44 }
 0x4a3   : > { %v7837_v30 = vpop.eup %4875  ;;  %v3362_v8 = vadd.f32 0.4994258, %v3361_v43 }
 0x4a4   : > { %v2865_v25 = vmul.f32 %v7837_v30, %v7803_v9  ;;  %v4878_v51 = vpop.eup %4877  ;;  %vm2871_vm1 = vweird.f32 %v7837_v30  ;;  %v7986_v43 = vmin.f32 %v3422_v31, 16.0 }
 0x4a5   : > { %v3286_v11 = vmul.f32 %v4878_v51, %v7855_v36  ;;  %vm3291_vm13 = vweird.f32 %v4878_v51  ;;  %v3363_v2 = vmul.f32 %v3362_v8, %v7851_v48  ;;  %vm7973_vm5 = vmor %vm2870_vm15, %vm2871_vm1 }
 0x4a6   : > { %v2866_v62 = vmul.f32 %v7837_v30, %v2865_v25  ;;  %v7899_v25 = vadd.f32 1.0, %v3323_v61  ;;  %vm3292_vm14 = vmor %vm3290_vm9, %vm3291_vm13 }
 0x4a8   : > { %v7872_v20 = vmul.f32 0.5, %v2866_v62  ;;  %v3287_v62 = vsub.f32 1.0, %v3286_v11  ;;  %4879 = vrcp.f32 %v7899_v25  ;;  %v3334_v38 = vand.u32 2147483647, %v7899_v25 }
 0x4a9   : > { %v3336_v47 = vand.u32 2147483648, %v7899_v25  ;;  %vm3330_vm2 = vweird.f32 %v7899_v25 }
 0x4aa   : > { %v2868_v56 = vsub.f32 1.5, %v7872_v20  ;;  %v3288_v27 = vmul.f32 %v4878_v51, %v3287_v62  ;;  %v3397_v62 = vmul.f32 %v3396_v21, %v7913_v54  ;;  %vm3335_vm4 = vcmp.eq.f32.partialorder %v3334_v38, 8.507059e+37 }
 0x4ab   : > { %v3651_v52 = vpop.f32.mrf.mxu0  ;;  %v3736_v34 = vpop.f32.mrf.mxu1  ;;  %v3337_v20 = vor.u32 1.1754944e-38, %v3336_v47 }
 0x4ac   : > { %v3652_v4 = vadd.f32 %v7880_v41, %v3651_v52  ;;  %v3737_v19 = vadd.f32 %v7888_v32, %v3736_v34  ;;  %v3289_v55 = vadd.f32 %v4878_v51, %v3288_v27  ;;  %v3352_v52 = vmul.f32 %v3351_v10, %v7851_v48 }
 0x4ad   : > { %v7953_v34 = vadd.f32 1.0, %v3363_v2  ;;  %v2869_v13 = vmul.f32 %v7837_v30, %v2868_v56  ;;  %v3398_v56 = vadd.f32 0.014752088, %v3397_v62  ;;  %v3424_v10 = vmul.f32 2.1237322e-06, %v7986_v43 }
 0x4ae   : > { %4881 = vtanh.f32 %v3652_v4  ;;  %v3817_v57 = vmax.f32 %v3737_v19, -20.0  ;;  %v3293_v3 = vsel %vm3292_vm14, %v4878_v51, %v3289_v55  ;;  %v4880_v46 = vpop.eup %4879  ;;  %v3386_v51 = vmul.f32 %v3385_v23, %v7913_v54 }
 0x4af   : > { %v3298_v36 = vsel %vm7895_vm11, %v3297_v14, %v3293_v3  ;;  %v3326_v6 = vmul.f32 %v4880_v46, %v7899_v25  ;;  %vm3331_vm0 = vweird.f32 %v4880_v46  ;;  %v3353_v55 = vadd.f32 1.1283791, %v3352_v52 }
 0x4b0   : > { %v3833_v28 = vmin.f32 %v3817_v57, 2.0  ;;  %v3299_v61 = vmul.f32 %v3298_v36, %v3274_v22  ;;  %v3387_v40 = vadd.f32 0.0036580483, %v3386_v51  ;;  %vm7965_vm3 = vmor %vm3330_vm2, %vm3331_vm0  ;;  %v3399_v16 = vmul.f32 %v3398_v56, %v7913_v54 }
 0x4b1   : > { %v3327_v1 = vsub.f32 1.0, %v3326_v6  ;;  %v2873_v7 = vsel %vm7973_vm5, %v7837_v30, %v2869_v13  ;;  %vm3370_vm7 = vweird.f32 %v7953_v34 }
 0x4b2   : > { %v3849_v0 = vmul.f32 1.442695, %v3833_v28  ;;  %v4506_v33 = vclamps-f32 %v3299_v61, 1.0  ;;  %v3388_v24 = vmul.f32 %v3387_v40, %v7913_v54  ;;  %v3400_v36 = vadd.f32 0.112945676, %v3399_v16 }
 0x4b3   : > { %v3654_v39 = vpop.f32.mrf.mxu0  ;;  %v3739_v11 = vpop.f32.mrf.mxu1  ;;  %v3328_v19 = vmul.f32 %v4880_v46, %v3327_v1 }
 0x4b4   : > { %v4882_v18 = vpop.eup %4881  ;;  %4883 = vpow2.f32 %v3849_v0  ;;  %v3655_v22 = vadd.f32 %v7880_v41, %v3654_v39  ;;  %v3740_v42 = vadd.f32 %v7888_v32, %v3739_v11  ;;  %v3590_v4 = vadd.f32 1.0, %v4506_v33 }
 0x4b5   : > { %3801 = vst.msk [vmem:[%s7946_s26] sm:$0xff] %vm3800_vm10, %v4882_v18  ;;  %v3329_v14 = vadd.f32 %v4880_v46, %v3328_v19  ;;  %v2919_v0 = vmul.f32 0.5, %v7766_v58  ;;  %v3389_v6 = vadd.f32 0.05243302, %v3388_v24  ;;  %v3401_v51 = vmul.f32 %v3400_v36, %v7913_v54 }
 0x4b6   : > { %4885 = vtanh.f32 %v3655_v22  ;;  %v3818_v26 = vmax.f32 %v3740_v42, -20.0  ;;  %v3606_v27 = vmul.f32 %v3590_v4, %v7824_v17  ;;  %v3425_v18 = vadd.f32 0.00028619796, %v3424_v10 }
 0x4b7   : > { %4887 = vrcp.f32 %v7953_v34  ;;  %v3333_v25 = vsel %vm7965_vm3, %v4880_v46, %v3329_v14  ;;  %v8000_v39 = vmul.f32 %v2873_v7, %v7524_v59  ;;  %v3435_v58 = vmul.f32 3.8918573e-05, %v7986_v43 }
 0x4b8   : > { %v3834_v48 = vmin.f32 %v3818_v26, 2.0  ;;  %3674 = vmatmul.f32.gmra.mxu0 %v3606_v27  ;;  %3759 = vmatmul.f32.gmra.mxu1 %v3606_v27  ;;  %v3338_v28 = vsel %vm3335_vm4, %v3337_v20, %v3333_v25  ;;  %v3374_v22 = vand.u32 2147483647, %v7953_v34  ;;  %v3376_v42 = vand.u32 2147483648, %v7953_v34 }
 0x4b9   : > { %v3339_v23 = vmul.f32 %v3338_v28, %v3314_v29  ;;  %v3402_v33 = vadd.f32 0.4994258, %v3401_v51  ;;  %v3436_v26 = vadd.f32 0.001143296, %v3435_v58  ;;  %v3390_v59 = vmul.f32 %v3389_v6, %v7913_v54 }
 0x4ba   : > { %v4884_v57 = vpop.eup %4883  ;;  %v3851_v17 = vmul.f32 1.442695, %v3834_v48  ;;  %v3426_v19 = vmul.f32 %v3425_v18, %v7986_v43  ;;  %v8013_v27 = vmul.f32 0.70710677, %v8000_v39  ;;  %v3377_v14 = vor.u32 1.1754944e-38, %v3376_v42 }
 0x4bb   : > { %3881 = vst.msk [vmem:[%s7978_s27] sm:$0xff] %vm3800_vm10, %v4884_v57  ;;  %v3657_v9 = vpop.f32.mrf.mxu0  ;;  %v3742_v12 = vpop.f32.mrf.mxu1  ;;  %v4507_v61 = vclamps-f32 %v3339_v23, 1.0  ;;  %v3403_v4 = vmul.f32 %v3402_v33, %v7913_v54  ;;  %v3437_v48 = vmul.f32 %v3436_v26, %v7986_v43  ;;  %vm3375_vm9 = vcmp.eq.f32.partialorder %v3374_v22, 8.507059e+37 }
 0x4bc   : > { %v4886_v3 = vpop.eup %4885  ;;  %4889 = vpow2.f32 %v3851_v17  ;;  %v3658_v38 = vadd.f32 %v7880_v41, %v3657_v9  ;;  %v3743_v47 = vadd.f32 %v7888_v32, %v3742_v12  ;;  %v3462_v56 = vmul.f32 %v8013_v27, %v8013_v27 }
 0x4bd   : > { %v4888_v46 = vpop.eup %4887  ;;  %3802 = vst.msk [vmem:[%s7946_s26 + $0x8] sm:$0xff] %vm3800_vm10, %v4886_v3  ;;  %v3591_v2 = vadd.f32 1.0, %v4507_v61  ;;  %v8019_v57 = vadd.f32 1.0, %v3403_v4  ;;  %v3438_v20 = vadd.f32 0.014752088, %v3437_v48  ;;  %v2920_v7 = vmul.f32 0.5, %v7809_v15 }
 0x4be   : > { %4891 = vtanh.f32 %v3658_v38  ;;  %v3819_v8 = vmax.f32 %v3743_v47, -20.0  ;;  %v3366_v30 = vmul.f32 %v4888_v46, %v7953_v34  ;;  %vm3371_vm6 = vweird.f32 %v4888_v46 }
 0x4bf   : > { %v3607_v40 = vmul.f32 %v3591_v2, %v2919_v0  ;;  %v3354_v34 = vmul.f32 %v3353_v55, %v7829_v50  ;;  %vm3372_vm8 = vmor %vm3370_vm7, %vm3371_vm6  ;;  %v3391_v60 = vadd.f32 0.18741608, %v3390_v59  ;;  %v3427_v17 = vadd.f32 0.0036580483, %v3426_v19 }
 0x4c0   : > { %v3835_v11 = vmin.f32 %v3819_v8, 2.0  ;;  %v3367_v21 = vsub.f32 1.0, %v3366_v30  ;;  %v3439_v50 = vmul.f32 %v3438_v20, %v7986_v43  ;;  %v8025_v9 = vmin.f32 %v3462_v56, 16.0 }
 0x4c1   : > { %3677 = vmatmul.f32.gmra.mxu0 %v3607_v40  ;;  %3762 = vmatmul.f32.gmra.mxu1 %v3607_v40  ;;  %v3392_v38 = vmul.f32 %v3391_v60, %v7913_v54  ;;  %v3428_v47 = vmul.f32 %v3427_v17, %v7986_v43  ;;  %v3416_v22 = vand.u32 2147483648, %v8019_v57  ;;  %vm3410_vm12 = vweird.f32 %v8019_v57 }
 0x4c2   : > { %v4890_v1 = vpop.eup %4889  ;;  %v3853_v52 = vmul.f32 1.442695, %v3835_v11  ;;  %v3368_v62 = vmul.f32 %v4888_v46, %v3367_v21  ;;  %v3440_v23 = vadd.f32 0.112945676, %v3439_v50  ;;  %v3475_v10 = vmul.f32 3.8918573e-05, %v8025_v9 }
 0x4c3   : > { %3882 = vst.msk [vmem:[%s7978_s27 + $0x8] sm:$0xff] %vm3800_vm10, %v4890_v1  ;;  %v3429_v18 = vadd.f32 0.05243302, %v3428_v47  ;;  %v3393_v21 = vadd.f32 1.1283791, %v3392_v38  ;;  %v2921_v47 = vmul.f32 0.5, %v7847_v45 }
 0x4c4   : > { %v4892_v13 = vpop.eup %4891  ;;  %4893 = vpow2.f32 %v3853_v52  ;;  %v3369_v29 = vadd.f32 %v4888_v46, %v3368_v62  ;;  %v3441_v61 = vmul.f32 %v3440_v23, %v7986_v43  ;;  %v3476_v11 = vadd.f32 0.001143296, %v3475_v10  ;;  %v2699_v10 = vpop.xlane.xlu2 %2698 }
 0x4c5   : > { %3803 = vst.msk [vmem:[%s7946_s26 + $0x10] sm:$0xff] %vm3800_vm10, %v4892_v13  ;;  %4895 = vrcp.f32 %v8019_v57  ;;  %v3414_v62 = vand.u32 2147483647, %v8019_v57  ;;  %v3430_v4 = vmul.f32 %v3429_v18, %v7986_v43 }
 0x4c6   : > { %v3373_v49 = vsel %vm3372_vm8, %v4888_v46, %v3369_v29  ;;  %v3660_v55 = vpop.f32.mrf.mxu0  ;;  %v3745_v24 = vpop.f32.mrf.mxu1  ;;  %v3464_v46 = vmul.f32 2.1237322e-06, %v8025_v9  ;;  %v3442_v54 = vadd.f32 0.4994258, %v3441_v61  ;;  %v3477_v1 = vmul.f32 %v3476_v11, %v8025_v9 }
 0x4c7   : > { %v3378_v31 = vsel %vm3375_vm9, %v3377_v14, %v3373_v49  ;;  %v3661_v28 = vadd.f32 %v7880_v41, %v3660_v55  ;;  %v3746_v16 = vadd.f32 %v7888_v32, %v3745_v24  ;;  %v3394_v14 = vmul.f32 %v3393_v21, %v7868_v35 }
 0x4c8   : > { %v3379_v25 = vmul.f32 %v3378_v31, %v3354_v34  ;;  %v3465_v30 = vadd.f32 0.00028619796, %v3464_v46  ;;  %v3443_v42 = vmul.f32 %v3442_v54, %v7986_v43  ;;  %v3478_v13 = vadd.f32 0.014752088, %v3477_v1 }
 0x4c9   : > { %4897 = vtanh.f32 %v3661_v28  ;;  %v3820_v0 = vmax.f32 %v3746_v16, -20.0  ;;  %v3417_v49 = vor.u32 1.1754944e-38, %v3416_v22  ;;  %vm3415_vm14 = vcmp.eq.f32.partialorder %v3414_v62, 8.507059e+37 }
 0x4ca   : > { %v4894_v12 = vpop.eup %4893  ;;  %v4508_v3 = vclamps-f32 %v3379_v25, 1.0  ;;  %v3466_v33 = vmul.f32 %v3465_v30, %v8025_v9  ;;  %v8046_v19 = vadd.f32 1.0, %v3443_v42  ;;  %v3431_v17 = vadd.f32 0.18741608, %v3430_v4 }
 0x4cb   : > { %3883 = vst.msk [vmem:[%s7978_s27 + $0x10] sm:$0xff] %vm3800_vm10, %v4894_v12  ;;  %v4896_v8 = vpop.eup %4895  ;;  %v3836_v15 = vmin.f32 %v3820_v0, 2.0  ;;  %v3479_v25 = vmul.f32 %v3478_v13, %v8025_v9 }
 0x4cc   : > { %v3592_v36 = vadd.f32 1.0, %v4508_v3  ;;  %v3406_v51 = vmul.f32 %v4896_v8, %v8019_v57  ;;  %vm3411_vm11 = vweird.f32 %v4896_v8  ;;  %v3467_v20 = vadd.f32 0.0036580483, %v3466_v33 }
 0x4cd   : > { %v3855_v2 = vmul.f32 1.442695, %v3836_v15  ;;  %vm3412_vm13 = vmor %vm3410_vm12, %vm3411_vm11  ;;  %v3480_v24 = vadd.f32 0.112945676, %v3479_v25  ;;  %v2716_v15 = vmul.f32 %v2699_v10, %v7140_v5  ;;  %v3456_v45 = vand.u32 2147483648, %v8046_v19 }
 0x4ce   : > { %v3608_v6 = vmul.f32 %v3592_v36, %v2920_v7  ;;  %v3407_v58 = vsub.f32 1.0, %v3406_v51  ;;  %v3468_v35 = vmul.f32 %v3467_v20, %v8025_v9  ;;  %v3432_v7 = vmul.f32 %v3431_v17, %v7986_v43 }
 0x4cf   : > { %v4898_v52 = vpop.eup %4897  ;;  %4899 = vpow2.f32 %v3855_v2  ;;  %v3663_v26 = vpop.f32.mrf.mxu0  ;;  %v3481_v3 = vmul.f32 %v3480_v24, %v8025_v9  ;;  %v3454_v51 = vand.u32 2147483647, %v8046_v19  ;;  %v8068_v11 = vadd.f32 1e-05, %v2716_v15 }
 0x4d0   : > { %3680 = vmatmul.f32.gmra.mxu0 %v3608_v6  ;;  %3765 = vmatmul.f32.gmra.mxu1 %v3608_v6  ;;  %v3408_v40 = vmul.f32 %v4896_v8, %v3407_v58  ;;  %3804 = vst.msk [vmem:[%s7946_s26 + $0x18] sm:$0xff] %vm3800_vm10, %v4898_v52  ;;  %v3748_v59 = vpop.f32.mrf.mxu1  ;;  %v3664_v29 = vadd.f32 %v7880_v41, %v3663_v26  ;;  %4901 = vrcp.f32 %v8046_v19  ;;  %v3469_v0 = vadd.f32 0.05243302, %v3468_v35 }
 0x4d1   : > { %v3749_v48 = vadd.f32 %v7888_v32, %v3748_v59  ;;  %v3482_v36 = vadd.f32 0.4994258, %v3481_v3  ;;  %v3433_v6 = vadd.f32 1.1283791, %v3432_v7  ;;  %vm3450_vm0 = vweird.f32 %v8046_v19 }
 0x4d2   : > { %v3409_v34 = vadd.f32 %v4896_v8, %v3408_v40  ;;  %4903 = vtanh.f32 %v3664_v29  ;;  %v3470_v21 = vmul.f32 %v3469_v0, %v8025_v9  ;;  %vm3455_vm2 = vcmp.eq.f32.partialorder %v3454_v51, 8.507059e+37 }
 0x4d3   : > { %v3821_v56 = vmax.f32 %v3749_v48, -20.0  ;;  %v3483_v18 = vmul.f32 %v3482_v36, %v8025_v9  ;;  %v3434_v1 = vmul.f32 %v3433_v6, %v7942_v44  ;;  %v3457_v52 = vor.u32 1.1754944e-38, %v3456_v45 }
 0x4d4   : > { %v3413_v31 = vsel %vm3412_vm13, %v4896_v8, %v3409_v34  ;;  %v2701_v8 = vpop.xlane.xlu0 %2700  ;;  %v3471_v4 = vadd.f32 0.18741608, %v3470_v21  ;;  %vm2880_vm12 = vweird.f32 %v8068_v11 }
 0x4d5   : > { %v3418_v60 = vsel %vm3415_vm14, %v3417_v49, %v3413_v31  ;;  %v4900_v50 = vpop.eup %4899  ;;  %v3837_v55 = vmin.f32 %v3821_v56, 2.0  ;;  %v2717_v43 = vmul.f32 %v2701_v8, %v7140_v5  ;;  %v8073_v58 = vadd.f32 1.0, %v3483_v18 }
 0x4d6   : > { %v3419_v57 = vmul.f32 %v3418_v60, %v3394_v14  ;;  %3884 = vst.msk [vmem:[%s7978_s27 + $0x18] sm:$0xff] %vm3800_vm10, %v4900_v50  ;;  %v4902_v16 = vpop.eup %4901  ;;  %v3472_v14 = vmul.f32 %v3471_v4, %v8025_v9  ;;  %v2922_v31 = vmul.f32 0.5, %v7927_v63 }
 0x4d7   : > { %v3857_v12 = vmul.f32 1.442695, %v3837_v55  ;;  %v3446_v46 = vmul.f32 %v4902_v16, %v8046_v19  ;;  %vm3451_vm15 = vweird.f32 %v4902_v16  ;;  %v8070_v2 = vadd.f32 1e-05, %v2717_v43 }
 0x4d8   : > { %v4509_v28 = vclamps-f32 %v3419_v57, 1.0  ;;  %v4904_v38 = vpop.eup %4903  ;;  %vm3452_vm1 = vmor %vm3450_vm0, %vm3451_vm15  ;;  %v3473_v63 = vadd.f32 1.1283791, %v3472_v14  ;;  %v3496_v3 = vand.u32 2147483648, %v8073_v58  ;;  %vm3490_vm4 = vweird.f32 %v8073_v58 }
 0x4d9   : > { %4905 = vpow2.f32 %v3857_v12  ;;  %3805 = vst.msk [vmem:[%s7946_s26 + $0x20] sm:$0xff] %vm3800_vm10, %v4904_v38  ;;  %v3447_v30 = vsub.f32 1.0, %v3446_v46  ;;  %vm2890_vm9 = vweird.f32 %v8070_v2 }
 0x4da   : > { %v3593_v23 = vadd.f32 1.0, %v4509_v28  ;;  %4907 = vrsqrt.f32 %v8068_v11  ;;  %v3474_v43 = vmul.f32 %v3473_v63, %v8013_v27 }
 0x4db   : > { %v3448_v54 = vmul.f32 %v4902_v16, %v3447_v30  ;;  %4909 = vrcp.f32 %v8073_v58  ;;  %v3497_v30 = vor.u32 1.1754944e-38, %v3496_v3 }
 0x4dc   : > { %v3609_v61 = vmul.f32 %v3593_v23, %v2921_v47  ;;  %4911 = vrsqrt.f32 %v8070_v2  ;;  %v3494_v23 = vand.u32 2147483647, %v8073_v58 }
 0x4dd   : > { %v3449_v22 = vadd.f32 %v4902_v16, %v3448_v54  ;;  %v3666_v42 = vpop.f32.mrf.mxu0  ;;  %v3751_v33 = vpop.f32.mrf.mxu1 }
 0x4de   : > { %3683 = vmatmul.f32.gmra.mxu0 %v3609_v61  ;;  %3768 = vmatmul.f32.gmra.mxu1 %v3609_v61  ;;  %v3667_v40 = vadd.f32 %v7880_v41, %v3666_v42  ;;  %v3752_v62 = vadd.f32 %v7888_v32, %v3751_v33  ;;  %vm3495_vm6 = vcmp.eq.f32.partialorder %v3494_v23, 8.507059e+37 }
 0x4df   : > { %v4906_v5 = vpop.eup %4905  ;;  %v3453_v26 = vsel %vm3452_vm1, %v4902_v16, %v3449_v22 }
 0x4e0   : > { %3885 = vst.msk [vmem:[%s7978_s27 + $0x20] sm:$0xff] %vm3800_vm10, %v4906_v5  ;;  %v3458_v59 = vsel %vm3455_vm2, %v3457_v52, %v3453_v26  ;;  %4913 = vtanh.f32 %v3667_v40  ;;  %v3822_v19 = vmax.f32 %v3752_v62, -20.0  ;;  %v8084_v29 = vpop.eup %4907  ;;  %v2923_v5 = vmul.f32 0.5, %v8000_v39 }
 0x4e1   : > { %v3459_v13 = vmul.f32 %v3458_v59, %v3434_v1  ;;  %v4910_v34 = vpop.eup %4909  ;;  %v2875_v49 = vmul.f32 %v8084_v29, %v8068_v11  ;;  %vm2881_vm8 = vweird.f32 %v8084_v29 }
 0x4e2   : > { %v3838_v44 = vmin.f32 %v3822_v19, 2.0  ;;  %v8089_v20 = vpop.eup %4911  ;;  %v3486_v17 = vmul.f32 %v4910_v34, %v8073_v58  ;;  %vm3491_vm3 = vweird.f32 %v4910_v34  ;;  %vm2882_vm13 = vmor %vm2880_vm12, %vm2881_vm8 }
 0x4e3   : > { %v4510_v48 = vclamps-f32 %v3459_v13, 1.0  ;;  %v2876_v55 = vmul.f32 %v8084_v29, %v2875_v49  ;;  %v2885_v57 = vmul.f32 %v8089_v20, %v8070_v2  ;;  %vm3492_vm5 = vmor %vm3490_vm4, %vm3491_vm3  ;;  %vm2891_vm7 = vweird.f32 %v8089_v20 }
 0x4e4   : > { %v3859_v56 = vmul.f32 1.442695, %v3838_v44  ;;  %v3487_v28 = vsub.f32 1.0, %v3486_v17  ;;  %vm2892_vm11 = vmor %vm2890_vm9, %vm2891_vm7 }
 0x4e5   : > { %v3594_v60 = vadd.f32 1.0, %v4510_v48  ;;  %v3669_v25 = vpop.f32.mrf.mxu0  ;;  %v3754_v50 = vpop.f32.mrf.mxu1  ;;  %v2886_v16 = vmul.f32 %v8089_v20, %v2885_v57  ;;  %v2877_v38 = vmul.f32 0.5, %v2876_v55 }
 0x4e6   : > { %v4914_v9 = vpop.eup %4913  ;;  %4915 = vpow2.f32 %v3859_v56  ;;  %v3670_v24 = vadd.f32 %v7880_v41, %v3669_v25  ;;  %v3755_v12 = vadd.f32 %v7888_v32, %v3754_v50  ;;  %v3488_v47 = vmul.f32 %v4910_v34, %v3487_v28 }
 0x4e7   : > { %v3610_v35 = vmul.f32 %v3594_v60, %v2922_v31  ;;  %3806 = vst.msk [vmem:[%s7946_s26 + $0x28] sm:$0xff] %vm3800_vm10, %v4914_v9  ;;  %v2887_v46 = vmul.f32 0.5, %v2886_v16  ;;  %v2878_v15 = vsub.f32 1.5, %v2877_v38 }
 0x4e8   : > { %4917 = vtanh.f32 %v3670_v24  ;;  %v3823_v7 = vmax.f32 %v3755_v12, -20.0  ;;  %v3489_v36 = vadd.f32 %v4910_v34, %v3488_v47 }
 0x4e9   : > { %3686 = vmatmul.f32.gmra.mxu0 %v3610_v35  ;;  %3771 = vmatmul.f32.gmra.mxu1 %v3610_v35  ;;  %v2888_v10 = vsub.f32 1.5, %v2887_v46  ;;  %v2879_v21 = vmul.f32 %v8084_v29, %v2878_v15 }
 0x4ea   : > { %v3839_v0 = vmin.f32 %v3823_v7, 2.0  ;;  %v3493_v6 = vsel %vm3492_vm5, %v4910_v34, %v3489_v36 }
 0x4eb   : > { %v3498_v45 = vsel %vm3495_vm6, %v3497_v30, %v3493_v6  ;;  %v2889_v18 = vmul.f32 %v8089_v20, %v2888_v10  ;;  %v2883_v33 = vsel %vm2882_vm13, %v8084_v29, %v2879_v21 }
 0x4ec   : > { %v4916_v8 = vpop.eup %4915  ;;  %v3861_v61 = vmul.f32 1.442695, %v3839_v0  ;;  %v3499_v54 = vmul.f32 %v3498_v45, %v3474_v43  ;;  %v8124_v2 = vmul.f32 %v2883_v33, %v7695_v37 }
 0x4ed   : > { %3886 = vst.msk [vmem:[%s7978_s27 + $0x28] sm:$0xff] %vm3800_vm10, %v4916_v8  ;;  %v2893_v58 = vsel %vm2892_vm11, %v8089_v20, %v2889_v18 }
 0x4ee   : > { %v4918_v51 = vpop.eup %4917  ;;  %4919 = vpow2.f32 %v3861_v61  ;;  %v4511_v27 = vclamps-f32 %v3499_v54, 1.0  ;;  %v8121_v52 = vmul.f32 %v2893_v58, %v7698_v53  ;;  %v2940_v11 = vmul.f32 0.70710677, %v8124_v2 }
 0x4ef   : > { %3807 = vst.msk [vmem:[%s7946_s26 + $0x30] sm:$0xff] %vm3800_vm10, %v4918_v51 }
 0x4f0   : > { %v3595_v22 = vadd.f32 1.0, %v4511_v27  ;;  %v8128_v39 = vmul.f32 0.70710677, %v8121_v52  ;;  %v3502_v40 = vmul.f32 %v2940_v11, %v2940_v11 }
 0x4f2   : > { %v3611_v1 = vmul.f32 %v3595_v22, %v2923_v5  ;;  %v3503_v62 = vmin.f32 %v3502_v40, 16.0  ;;  %v3542_v26 = vmul.f32 %v8128_v39, %v8128_v39 }
 0x4f4   : > { %v4920_v42 = vpop.eup %4919  ;;  %3689 = vmatmul.f32.gmra.mxu0 %v3611_v1  ;;  %3774 = vmatmul.f32.gmra.mxu1 %v3611_v1  ;;  %v3504_v59 = vmul.f32 2.1237322e-06, %v3503_v62  ;;  %v3515_v4 = vmul.f32 3.8918573e-05, %v3503_v62  ;;  %v3543_v13 = vmin.f32 %v3542_v26, 16.0 }
 0x4f5   : > { %3887 = vst.msk [vmem:[%s7978_s27 + $0x30] sm:$0xff] %vm3800_vm10, %v4920_v42 }
 0x4f6   : > { %v3505_v19 = vadd.f32 0.00028619796, %v3504_v59  ;;  %v3516_v53 = vadd.f32 0.001143296, %v3515_v4  ;;  %v3544_v14 = vmul.f32 2.1237322e-06, %v3543_v13 }
 0x4f7   : > { %v3555_v49 = vmul.f32 3.8918573e-05, %v3543_v13 }
 0x4f8   : > { %v3506_v29 = vmul.f32 %v3505_v19, %v3503_v62  ;;  %v3517_v37 = vmul.f32 %v3516_v53, %v3503_v62  ;;  %v3545_v56 = vadd.f32 0.00028619796, %v3544_v14 }
 0x4f9   : > { %v3556_v60 = vadd.f32 0.001143296, %v3555_v49 }
 0x4fa   : > { %v3518_v44 = vadd.f32 0.014752088, %v3517_v37  ;;  %v3507_v48 = vadd.f32 0.0036580483, %v3506_v29  ;;  %v3546_v25 = vmul.f32 %v3545_v56, %v3543_v13 }
 0x4fb   : > { %v3557_v50 = vmul.f32 %v3556_v60, %v3543_v13 }
 0x4fc   : > { %v3519_v34 = vmul.f32 %v3518_v44, %v3503_v62  ;;  %v3508_v31 = vmul.f32 %v3507_v48, %v3503_v62  ;;  %v3547_v24 = vadd.f32 0.0036580483, %v3546_v25 }
 0x4fd   : > { %v3558_v9 = vadd.f32 0.014752088, %v3557_v50  ;;  %v2925_v50 = vmul.f32 0.5, %v8121_v52 }
 0x4fe   : > { %v3520_v20 = vadd.f32 0.112945676, %v3519_v34  ;;  %v3509_v57 = vadd.f32 0.05243302, %v3508_v31  ;;  %v3548_v7 = vmul.f32 %v3547_v24, %v3543_v13 }
 0x4ff   : > { %v3559_v12 = vmul.f32 %v3558_v9, %v3543_v13 }
 0x500   : > { %v3521_v17 = vmul.f32 %v3520_v20, %v3503_v62  ;;  %v3510_v28 = vmul.f32 %v3509_v57, %v3503_v62  ;;  %v3549_v23 = vadd.f32 0.05243302, %v3548_v7 }
 0x501   : > { %v3560_v16 = vadd.f32 0.112945676, %v3559_v12 }
 0x502   : > { %v3522_v55 = vadd.f32 0.4994258, %v3521_v17  ;;  %v3511_v38 = vadd.f32 0.18741608, %v3510_v28  ;;  %v3550_v61 = vmul.f32 %v3549_v23, %v3543_v13 }
 0x503   : > { %v3561_v3 = vmul.f32 %v3560_v16, %v3543_v13 }
 0x504   : > { %v3523_v35 = vmul.f32 %v3522_v55, %v3503_v62  ;;  %v3512_v36 = vmul.f32 %v3511_v38, %v3503_v62  ;;  %v3551_v45 = vadd.f32 0.18741608, %v3550_v61 }
 0x505   : > { %v3562_v47 = vadd.f32 0.4994258, %v3561_v3 }
 0x506   : > { %v3524_v63 = vadd.f32 1.0, %v3523_v35  ;;  %v3513_v43 = vadd.f32 1.1283791, %v3512_v36  ;;  %v3552_v22 = vmul.f32 %v3551_v45, %v3543_v13 }
 0x507   : > { %v3563_v46 = vmul.f32 %v3562_v47, %v3543_v13 }
 0x508   : > { %4921 = vrcp.f32 %v3524_v63  ;;  %v3536_v15 = vand.u32 2147483648, %v3524_v63  ;;  %v3534_v51 = vand.u32 2147483647, %v3524_v63  ;;  %vm3530_vm15 = vweird.f32 %v3524_v63 }
 0x509   : > { %v3564_v8 = vadd.f32 1.0, %v3563_v46  ;;  %v3514_v27 = vmul.f32 %v3513_v43, %v2940_v11  ;;  %v3553_v4 = vadd.f32 1.1283791, %v3552_v22  ;;  %v2924_v11 = vmul.f32 0.5, %v8124_v2 }
 0x50a   : > { %v3537_v54 = vor.u32 1.1754944e-38, %v3536_v15  ;;  %vm3535_vm1 = vcmp.eq.f32.partialorder %v3534_v51, 8.507059e+37 }
 0x50b   : > { %4923 = vrcp.f32 %v3564_v8  ;;  %v3576_v62 = vand.u32 2147483648, %v3564_v8  ;;  %v3574_v53 = vand.u32 2147483647, %v3564_v8  ;;  %vm3570_vm3 = vweird.f32 %v3564_v8 }
 0x50c   : > { %v3554_v49 = vmul.f32 %v3553_v4, %v8128_v39  ;;  %v4963_v4 = vld [vmem:[%s8392_s8] ss:$0 sm:$0xff] }
 0x50d   : > { %v3577_v14 = vor.u32 1.1754944e-38, %v3576_v62  ;;  %vm3575_vm5 = vcmp.eq.f32.partialorder %v3574_v53, 8.507059e+37 }
 0x50e   : > { %v4922_v0 = vpop.eup %4921 }
 0x50f   : > { %v3526_v10 = vmul.f32 %v4922_v0, %v3524_v63  ;;  %vm3531_vm14 = vweird.f32 %v4922_v0 }
 0x510   : > { %vm3532_vm0 = vmor %vm3530_vm15, %vm3531_vm14 }
 0x511   : > { %v3527_v30 = vsub.f32 1.0, %v3526_v10  ;;  %v4924_v21 = vpop.eup %4923 }
 0x512   : > { %v3566_v42 = vmul.f32 %v4924_v21, %v3564_v8  ;;  %vm3571_vm2 = vweird.f32 %v4924_v21 }
 0x513   : > { %v3528_v6 = vmul.f32 %v4922_v0, %v3527_v30  ;;  %vm3572_vm4 = vmor %vm3570_vm3, %vm3571_vm2 }
 0x514   : > { %v3567_v1 = vsub.f32 1.0, %v3566_v42 }
 0x515   : > { %v3529_v18 = vadd.f32 %v4922_v0, %v3528_v6 }
 0x516   : > { %v3568_v19 = vmul.f32 %v4924_v21, %v3567_v1 }
 0x517   : > { %v3533_v58 = vsel %vm3532_vm0, %v4922_v0, %v3529_v18 }
 0x518   : > { %v3538_v5 = vsel %vm3535_vm1, %v3537_v54, %v3533_v58  ;;  %v3569_v48 = vadd.f32 %v4924_v21, %v3568_v19 }
 0x519   : > { %v3539_v33 = vmul.f32 %v3538_v5, %v3514_v27 }
 0x51a   : > { %v3573_v20 = vsel %vm3572_vm4, %v4924_v21, %v3569_v48 }
 0x51b   : > { %v4512_v40 = vclamps-f32 %v3539_v33, 1.0  ;;  %v3578_v31 = vsel %vm3575_vm5, %v3577_v14, %v3573_v20 }
 0x51c   : > { %v3579_v60 = vmul.f32 %v3578_v31, %v3554_v49 }
 0x51d   : > { %v3596_v44 = vadd.f32 1.0, %v4512_v40 }
 0x51e   : > { %v4513_v2 = vclamps-f32 %v3579_v60, 1.0 }
 0x51f   : > { %v3672_v26 = vpop.f32.mrf.mxu0  ;;  %v3757_v59 = vpop.f32.mrf.mxu1  ;;  %v3612_v34 = vmul.f32 %v3596_v44, %v2924_v11 }
 0x520   : > { %v3673_v29 = vadd.f32 %v7880_v41, %v3672_v26  ;;  %v3758_v37 = vadd.f32 %v7888_v32, %v3757_v59  ;;  %v3597_v55 = vadd.f32 1.0, %v4513_v2 }
 0x521   : > { %3692 = vmatmul.f32.gmra.mxu0 %v3612_v34  ;;  %3777 = vmatmul.f32.gmra.mxu1 %v3612_v34 }
 0x522   : > { %4925 = vtanh.f32 %v3673_v29  ;;  %v3824_v13 = vmax.f32 %v3758_v37, -20.0  ;;  %v3613_v9 = vmul.f32 %v3597_v55, %v2925_v50 }
 0x524   : > { %v3840_v56 = vmin.f32 %v3824_v13, 2.0  ;;  %3695 = vmatmul.f32.vlgmr.msra.gmra.mxu2 %v3613_v9 }
 0x526   : > { %v3863_v17 = vmul.f32 1.442695, %v3840_v56 }
 0x528   : > { %v4926_v25 = vpop.eup %4925  ;;  %4927 = vpow2.f32 %v3863_v17 }
 0x529   : > { %3808 = vst.msk [vmem:[%s7946_s26 + $0x38] sm:$0xff] %vm3800_vm10, %v4926_v25  ;;  %3780 = vmatmul.f32.gmra.mxu1 %v3613_v9 }
 0x52e   : > { %v4928_v12 = vpop.eup %4927 }
 0x52f   : > { %3888 = vst.msk [vmem:[%s7978_s27 + $0x38] sm:$0xff] %vm3800_vm10, %v4928_v12 }
 0x535   : > { %v3675_v57 = vpop.f32.mrf.mxu0  ;;  %v3760_v39 = vpop.f32.mrf.mxu1 }
 0x536   : > { %v3676_v35 = vadd.f32 %v7880_v41, %v3675_v57  ;;  %v3761_v24 = vadd.f32 %v7888_v32, %v3760_v39 }
 0x538   : > { %4929 = vtanh.f32 %v3676_v35  ;;  %v3825_v63 = vmax.f32 %v3761_v24, -20.0 }
 0x53a   : > { %v3841_v28 = vmin.f32 %v3825_v63, 2.0 }
 0x53c   : > { %v3865_v16 = vmul.f32 1.442695, %v3841_v28 }
 0x53e   : > { %v4930_v52 = vpop.eup %4929  ;;  %4931 = vpow2.f32 %v3865_v16  ;;  %v3678_v7 = vpop.f32.mrf.mxu0 }
 0x53f   : > { %3809 = vst.msk [vmem:[%s7946_s26 + $0x40] sm:$0xff] %vm3800_vm10, %v4930_v52  ;;  %v3763_v3 = vpop.f32.mrf.mxu1  ;;  %v3679_v38 = vadd.f32 %v7880_v41, %v3678_v7 }
 0x540   : > { %v3764_v47 = vadd.f32 %v7888_v32, %v3763_v3 }
 0x541   : > { %4933 = vtanh.f32 %v3679_v38 }
 0x542   : > { %v3826_v23 = vmax.f32 %v3764_v47, -20.0 }
 0x544   : > { %v4932_v46 = vpop.eup %4931  ;;  %v3842_v0 = vmin.f32 %v3826_v23, 2.0 }
 0x545   : > { %3889 = vst.msk [vmem:[%s7978_s27 + $0x40] sm:$0xff] %vm3800_vm10, %v4932_v46 }
 0x546   : > { %v3867_v36 = vmul.f32 1.442695, %v3842_v0 }
 0x547   : > { %v4934_v10 = vpop.eup %4933 }
 0x548   : > { %4935 = vpow2.f32 %v3867_v36  ;;  %3810 = vst.msk [vmem:[%s7946_s26 + $0x48] sm:$0xff] %vm3800_vm10, %v4934_v10 }
 0x54d   : > { %v3681_v8 = vpop.f32.mrf.mxu0  ;;  %v3766_v61 = vpop.f32.mrf.mxu1 }
 0x54e   : > { %v3682_v30 = vadd.f32 %v7880_v41, %v3681_v8  ;;  %v3767_v15 = vadd.f32 %v7888_v32, %v3766_v61  ;;  %v4936_v43 = vpop.eup %4935  ;;  %v4962_v41 = vld [vmem:[%s8390_s6] ss:$0 sm:$0xff] }
 0x54f   : > { %3890 = vst.msk [vmem:[%s7978_s27 + $0x48] sm:$0xff] %vm3800_vm10, %v4936_v43 }
 0x550   : > { %4937 = vtanh.f32 %v3682_v30  ;;  %v3827_v6 = vmax.f32 %v3767_v15, -20.0 }
 0x552   : > { %v3843_v51 = vmin.f32 %v3827_v6, 2.0 }
 0x554   : > { %v3869_v45 = vmul.f32 1.442695, %v3843_v51 }
 0x556   : > { %v4938_v18 = vpop.eup %4937  ;;  %4939 = vpow2.f32 %v3869_v45 }
 0x557   : > { %3811 = vst.msk [vmem:[%s7946_s26 + $0x50] sm:$0xff] %vm3800_vm10, %v4938_v18 }
 0x55b   : > { %v3684_v21 = vpop.f32.mrf.mxu0  ;;  %v3769_v27 = vpop.f32.mrf.mxu1 }
 0x55c   : > { %v4940_v54 = vpop.eup %4939  ;;  %v3685_v58 = vadd.f32 %v4962_v41, %v3684_v21  ;;  %v3770_v5 = vadd.f32 %v7888_v32, %v3769_v27 }
 0x55d   : > { %3891 = vst.msk [vmem:[%s7978_s27 + $0x50] sm:$0xff] %vm3800_vm10, %v4940_v54 }
 0x55e   : > { %4941 = vtanh.f32 %v3685_v58  ;;  %v3828_v22 = vmax.f32 %v3770_v5, -20.0 }
 0x560   : > { %v3844_v42 = vmin.f32 %v3828_v22, 2.0 }
 0x562   : > { %v3871_v33 = vmul.f32 1.442695, %v3844_v42 }
 0x564   : > { %v4942_v1 = vpop.eup %4941  ;;  %4943 = vpow2.f32 %v3871_v33 }
 0x565   : > { %3812 = vst.msk [vmem:[%s7946_s26 + $0x58] sm:$0xff] %vm3800_vm10, %v4942_v1 }
 0x566   : > { %v3687_v40 = vpop.f32.mrf.mxu0  ;;  %v3772_v62 = vpop.f32.mrf.mxu1 }
 0x567   : > { %v3688_v59 = vadd.f32 %v4962_v41, %v3687_v40  ;;  %v3773_v19 = vadd.f32 %v4963_v4, %v3772_v62 }
 0x569   : > { %4945 = vtanh.f32 %v3688_v59  ;;  %v3829_v32 = vmax.f32 %v3773_v19, -20.0 }
 0x56a   : > { %v4944_v26 = vpop.eup %4943 }
 0x56b   : > { %3892 = vst.msk [vmem:[%s7978_s27 + $0x58] sm:$0xff] %vm3800_vm10, %v4944_v26  ;;  %v3845_v53 = vmin.f32 %v3829_v32, 2.0 }
 0x56d   : > { %v3873_v29 = vmul.f32 1.442695, %v3845_v53 }
 0x56f   : > { %v4946_v37 = vpop.eup %4945  ;;  %4947 = vpow2.f32 %v3873_v29 }
 0x570   : > { %3813 = vst.msk [vmem:[%s7946_s26 + $0x60] sm:$0xff] %vm3800_vm10, %v4946_v37 }
 0x571   : > { %v3690_v44 = vpop.f32.mrf.mxu0  ;;  %v3775_v48 = vpop.f32.mrf.mxu1 }
 0x572   : > { %v3691_v13 = vadd.f32 %v4962_v41, %v3690_v44  ;;  %v3776_v34 = vadd.f32 %v4963_v4, %v3775_v48 }
 0x574   : > { %4949 = vtanh.f32 %v3691_v13  ;;  %v3830_v14 = vmax.f32 %v3776_v34, -20.0 }
 0x575   : > { %v4948_v11 = vpop.eup %4947 }
 0x576   : > { %3893 = vst.msk [vmem:[%s7978_s27 + $0x60] sm:$0xff] %vm3800_vm10, %v4948_v11  ;;  %v3846_v49 = vmin.f32 %v3830_v14, 2.0 }
 0x578   : > { %v3875_v20 = vmul.f32 1.442695, %v3846_v49 }
 0x57a   : > { %v4950_v56 = vpop.eup %4949  ;;  %4951 = vpow2.f32 %v3875_v20 }
 0x57b   : > { %3814 = vst.msk [vmem:[%s7946_s26 + $0x68] sm:$0xff] %vm3800_vm10, %v4950_v56 }
 0x580   : > { %v4952_v31 = vpop.eup %4951 }
 0x581   : > { %3894 = vst.msk [vmem:[%s7978_s27 + $0x68] sm:$0xff] %vm3800_vm10, %v4952_v31 }
 0x59e   : > { %v3693_v60 = vpop.f32.mrf.mxu0  ;;  %v3778_v17 = vpop.f32.mrf.mxu1 }
 0x59f   : > { %v3694_v2 = vadd.f32 %v4962_v41, %v3693_v60  ;;  %v3779_v25 = vadd.f32 %v4963_v4, %v3778_v17 }
 0x5a1   : > { %4953 = vtanh.f32 %v3694_v2  ;;  %v3831_v50 = vmax.f32 %v3779_v25, -20.0 }
 0x5a3   : > { %v3847_v55 = vmin.f32 %v3831_v50, 2.0 }
 0x5a5   : > { %v3877_v57 = vmul.f32 1.442695, %v3847_v55 }
 0x5a6   : > { %v3781_v9 = vpop.f32.mrf.mxu1 }
 0x5a7   : > { %v4954_v39 = vpop.eup %4953  ;;  %4955 = vpow2.f32 %v3877_v57  ;;  %v3782_v35 = vadd.f32 %v4963_v4, %v3781_v9  ;;  %v3696_v28 = vpop.f32.mrf.mxu2 }
 0x5a8   : > { %3815 = vst.msk [vmem:[%s7946_s26 + $0x70] sm:$0xff] %vm3800_vm10, %v4954_v39  ;;  %v3697_v52 = vadd.f32 %v4962_v41, %v3696_v28 }
 0x5a9   : > { %v3832_v24 = vmax.f32 %v3782_v35, -20.0 }
 0x5ab   : > { %v3848_v12 = vmin.f32 %v3832_v24, 2.0 }
 0x5ad   : > { %v4956_v63 = vpop.eup %4955  ;;  %v3879_v16 = vmul.f32 1.442695, %v3848_v12 }
 0x5ae   : > { %3895 = vst.msk [vmem:[%s7978_s27 + $0x70] sm:$0xff] %vm3800_vm10, %v4956_v63 }
 0x5af   : > { %4957 = vpow2.f32 %v3879_v16 }
 0x5b0   : > { %4959 = vtanh.f32 %v3697_v52 }
 0x5b3   : > { %3907 = sbr.rel (!%p5198_p4) target bundleno = 1512 (0x5e8), region = 60 }
 0x5b5   : > { %v4958_v7 = vpop.eup %4957 }
 0x5b6   : > { %v4960_v3 = vpop.eup %4959  ;;  %3896 = vst.msk [vmem:[%s7978_s27 + $0x78] sm:$0xff] %vm3800_vm10, %v4958_v7 }
 0x5b7   : > { %3816 = vst.msk [vmem:[%s7946_s26 + $0x78] sm:$0xff] %vm3800_vm10, %v4960_v3 }
 0x5b8   : > { %s8514_s15 = smov (!%p3910_p8, %s3909_s15), 16 }
 0x5b9   : > { %s4517_s24 = sshll.u32 %s8514_s15, 3 }
 0x5ba   : > { %p4520_p9 = scmp.eq.s32.totalorder %s4517_s24, 0 }
 0x5bb   : > { %s8199_s25 = sshrl.u32 (!%p4520_p9), %s8514_s15, 4 }
 0x5bc   : > { %3918 = sbr.rel (%p4520_p9) target bundleno = 1512 (0x5e8), region = 64  ;;  %p4521_p10 = scmp.le.s32.totalorder (!%p4520_p9), %s8199_s25, 0 }
 0x5c1   : > { %4345 = sbr.rel (%p4521_p10) target bundleno = 1495 (0x5d7), region = 212  ;;  %s8500_s13 = smov (!%p4521_p10), %s8193_s23 }
 0x5c2   : > { %s8501_s29 = smov (!%p4521_p10), %s7946_s26  ;;  %s8208_s30 = smov (!%p4521_p10), 0  }
 0x5c3   : > { %s8210_s11 = smov (!%p4521_p10), 0  }
 0x5c6 LB: >> { %v4011_v38 = vld [vmem:[%s5058_s29] sm:$0xff]  ;;  %v4013_v47 = vld [vmem:[%s5058_s29 + $0x8] sm:$0xff]  ;;  %v4015_v23 = vld [vmem:[%s5058_s29 + $0x10] sm:$0xff]  ;;  %s4043_s12 = sadd.s32 1, %s5062_s30  ;;  %s4005_s11 = sadd.s32 1, %s5066_s11   ;;  %s5066_s11 = sphi %s8210_s11, %s4005_s11   ;;  %s5062_s30 = sphi %s8208_s30, %s8504_s30   ;;  %s5058_s29 = sphi %s8501_s29, %s8503_s29   ;;  %s5054_s13 = sphi %s8500_s13, %s8502_s13  }
 0x5c7   : >> { %4012 = vst [vmem:[%s5054_s13] sm:$0xff] %v4011_v38  ;;  %v4017_v46 = vld [vmem:[%s5058_s29 + $0x18] sm:$0xff]  ;;  %p4044_p11 = scmp.ge.s32.totalorder %s4043_s12, %s8199_s25  ;;  %v4019_v0 = vld [vmem:[%s5058_s29 + $0x20] sm:$0xff]  ;;  %v4021_v36 = vld [vmem:[%s5058_s29 + $0x28] sm:$0xff]  ;;  %p4004_p12 = scmp.ge.s32.totalorder %s4005_s11, %s8199_s25 }
 0x5c8   : >> { %4014 = vst [vmem:[%s5054_s13 + $0x8] sm:$0xff] %v4013_v47  ;;  %v4023_v10 = vld [vmem:[%s5058_s29 + $0x30] sm:$0xff]  ;;  %v4025_v8 = vld [vmem:[%s5058_s29 + $0x38] sm:$0xff]  ;;  %v4027_v61 = vld [vmem:[%s5058_s29 + $0x40] sm:$0xff] }
 0x5c9   : >> { %4016 = vst [vmem:[%s5054_s13 + $0x10] sm:$0xff] %v4015_v23  ;;  %s8516_s12 = smov (%p4044_p11, %s4043_s12), 0  ;;  %v4029_v30 = vld [vmem:[%s5058_s29 + $0x48] sm:$0xff]  ;;  %v4031_v15 = vld [vmem:[%s5058_s29 + $0x50] sm:$0xff]  ;;  %v4033_v43 = vld [vmem:[%s5058_s29 + $0x58] sm:$0xff] }
 0x5ca   : >> { %4018 = vst [vmem:[%s5054_s13 + $0x18] sm:$0xff] %v4017_v46  ;;  %s4522_s18 = sshll.u32 %s8516_s12, 7  ;;  %v4035_v6 = vld [vmem:[%s5058_s29 + $0x60] sm:$0xff]  ;;  %v4037_v51 = vld [vmem:[%s5058_s29 + $0x68] sm:$0xff]  ;;  %v4039_v45 = vld [vmem:[%s5058_s29 + $0x70] sm:$0xff]  ;;  %s8504_s30 = smov %s8516_s12 }
 0x5cb   : >> { %4020 = vst [vmem:[%s5054_s13 + $0x20] sm:$0xff] %v4019_v0  ;;  %s4048_s19 = scalar_lea.vmem %s7946_s26, %s4522_s18 [#allocation2]   ;;  %s4049_s22 = scalar_lea.vmem %s8193_s23, %s4522_s18   ;;  %v4041_v18 = vld [vmem:[%s5058_s29 + $0x78] sm:$0xff] }
 0x5cc   : >> { %4022 = vst [vmem:[%s5054_s13 + $0x28] sm:$0xff] %v4021_v36  ;;  %s8503_s29 = smov %s4048_s19 }
 0x5cd   : >> { %4024 = vst [vmem:[%s5054_s13 + $0x30] sm:$0xff] %v4023_v10 }
 0x5ce   : >> { %4026 = vst [vmem:[%s5054_s13 + $0x38] sm:$0xff] %v4025_v8 }
 0x5cf   : >> { %4028 = vst [vmem:[%s5054_s13 + $0x40] sm:$0xff] %v4027_v61 }
 0x5d0   : >> { %4030 = vst [vmem:[%s5054_s13 + $0x48] sm:$0xff] %v4029_v30 }
 0x5d1   : >> { %4032 = vst [vmem:[%s5054_s13 + $0x50] sm:$0xff] %v4031_v15 }
 0x5d2   : >> { %4034 = vst [vmem:[%s5054_s13 + $0x58] sm:$0xff] %v4033_v43  ;;  %4007 = sbr.rel (!%p4004_p12) target bundleno = 1478 (0x5c6), region = 218 }
 0x5d3   : >> { %4036 = vst [vmem:[%s5054_s13 + $0x60] sm:$0xff] %v4035_v6 }
 0x5d4   : >> { %4038 = vst [vmem:[%s5054_s13 + $0x68] sm:$0xff] %v4037_v51 }
 0x5d5   : >> { %4040 = vst [vmem:[%s5054_s13 + $0x70] sm:$0xff] %v4039_v45 }
 0x5d6   : >> { %4042 = vst [vmem:[%s5054_s13 + $0x78] sm:$0xff] %v4041_v18  ;;  %s8502_s13 = smov %s4049_s22 }
 0x5d7 PF: > { %s8272_s24 = sand.u32 15, %s8514_s15   ;;  %s4547_s18 = sshll.u32 %s8199_s25, 7 }
 0x5d8   : > { %s4054_s0 = scalar_lea.vmem %s7946_s26, %s4547_s18 [#allocation2]   ;;  %s4056_s1 = scalar_lea.vmem %s8193_s23, %s4547_s18  }
 0x5d9   : > { %p4527_p13 = scmp.le.s32.totalorder %s8272_s24, 0 }
 0x5da   : > { %s5068_s22 = smov (!%p4527_p13), %s4056_s1   ;;  %s5072_s19 = smov (!%p4527_p13), %s4054_s0  }
 0x5db   : > { %4359 = sbr.rel (%p4527_p13) target bundleno = 1512 (0x5e8), region = 223  ;;  %s5076_s2 = smov (!%p4527_p13), 0  }
 0x5dc   : > { %s5080_s12 = smov (!%p4527_p13), 0  }
 0x5e0 LB: >> { %v4066_v54 = vld [vmem:[%s5074_s19] sm:$0xff]  ;;  %s4068_s15 = sadd.s32 1, %s5078_s2  ;;  %s4060_s12 = sadd.s32 1, %s5082_s12   ;;  %s5082_s12 = sphi %s5080_s12, %s4060_s12   ;;  %s5078_s2 = sphi %s5076_s2, %s5077_s2   ;;  %s5074_s19 = sphi %s5072_s19, %s4073_s19   ;;  %s5070_s22 = sphi %s5068_s22, %s4074_s22  }
 0x5e1   : >> { %4067 = vst [vmem:[%s5070_s22] sm:$0xff] %v4066_v54  ;;  %p4069_p0 = scmp.ge.s32.totalorder %s4068_s15, %s8272_s24  ;;  %p4059_p1 = scmp.ge.s32.totalorder %s4060_s12, %s8272_s24 }
 0x5e3   : >> { %s8518_s15 = smov (%p4069_p0, %s4068_s15), 0  ;;  %4062 = sbr.rel (!%p4059_p1) target bundleno = 1504 (0x5e0), region = 229 }
 0x5e4   : >> { %s4528_s26 = sshll.u32 %s8518_s15, 3  ;;  %s5077_s2 = smov %s8518_s15  }
 0x5e5   : >> { %s4073_s19 = scalar_lea.vmem %s4054_s0, %s4528_s26 [#allocation2]   ;;  %s4074_s22 = scalar_lea.vmem %s4056_s1, %s4528_s26  }
 0x5e8 PF: > { %4080 = sbr.rel (!%p5198_p4) target bundleno = 1565 (0x61d), region = 112  ;;  %s4082_s2 = ssub.s32 (%p5198_p4), 25, %s5212_s28 }
 0x5e9   : > { %s4549_s23 = sshll.u32 (%p5198_p4), %s5186_s16, 7  ;;  %p4083_p2 = scmp.lt.s32.totalorder (%p5198_p4), %s4082_s2, 16 }
 0x5ea   : > { %s8287_s29 = scalar_lea.vmem (%p5198_p4), %s8394_s10, %s4549_s23  }
 0x5ed   : > { %s8520_s2 = smov (!%p4083_p2, %s4082_s2), 16 }
 0x5ee   : > { %s4531_s30 = sshll.u32 %s8520_s2, 3 }
 0x5ef   : > { %p4534_p3 = scmp.eq.s32.totalorder %s4531_s30, 0 }
 0x5f0   : > { %s8293_s0 = sshrl.u32 (!%p4534_p3), %s8520_s2, 4 }
 0x5f1   : > { %4091 = sbr.rel (%p4534_p3) target bundleno = 1565 (0x61d), region = 116  ;;  %p4535_p4 = scmp.le.s32.totalorder (!%p4534_p3), %s8293_s0, 0 }
 0x5f6   : > { %4373 = sbr.rel (%p4535_p4) target bundleno = 1548 (0x60c), region = 234  ;;  %s8505_s1 = smov (!%p4535_p4), %s8287_s29 }
 0x5f7   : > { %s8506_s16 = smov (!%p4535_p4), %s7978_s27  ;;  %s8302_s21 = smov (!%p4535_p4), 0  }
 0x5f8   : > { %s8304_s28 = smov (!%p4535_p4), 0  }
 0x5fb LB: >> { %v4184_v21 = vld [vmem:[%s5090_s16] sm:$0xff]  ;;  %v4186_v27 = vld [vmem:[%s5090_s16 + $0x8] sm:$0xff]  ;;  %v4188_v41 = vld [vmem:[%s5090_s16 + $0x10] sm:$0xff]  ;;  %s4216_s11 = sadd.s32 1, %s5094_s21  ;;  %s4178_s28 = sadd.s32 1, %s5098_s28   ;;  %s5098_s28 = sphi %s8304_s28, %s4178_s28   ;;  %s5094_s21 = sphi %s8302_s21, %s8509_s21   ;;  %s5090_s16 = sphi %s8506_s16, %s8508_s16   ;;  %s5086_s1 = sphi %s8505_s1, %s8507_s1  }
 0x5fc   : >> { %4185 = vst [vmem:[%s5086_s1] sm:$0xff] %v4184_v21  ;;  %v4190_v58 = vld [vmem:[%s5090_s16 + $0x18] sm:$0xff]  ;;  %p4217_p5 = scmp.ge.s32.totalorder %s4216_s11, %s8293_s0  ;;  %v4192_v5 = vld [vmem:[%s5090_s16 + $0x20] sm:$0xff]  ;;  %v4194_v22 = vld [vmem:[%s5090_s16 + $0x28] sm:$0xff]  ;;  %p4177_p6 = scmp.ge.s32.totalorder %s4178_s28, %s8293_s0 }
 0x5fd   : >> { %4187 = vst [vmem:[%s5086_s1 + $0x8] sm:$0xff] %v4186_v27  ;;  %v4196_v42 = vld [vmem:[%s5090_s16 + $0x30] sm:$0xff]  ;;  %v4198_v33 = vld [vmem:[%s5090_s16 + $0x38] sm:$0xff]  ;;  %v4200_v1 = vld [vmem:[%s5090_s16 + $0x40] sm:$0xff] }
 0x5fe   : >> { %4189 = vst [vmem:[%s5086_s1 + $0x10] sm:$0xff] %v4188_v41  ;;  %s8522_s11 = smov (%p4217_p5, %s4216_s11), 0  ;;  %v4202_v40 = vld [vmem:[%s5090_s16 + $0x48] sm:$0xff]  ;;  %v4204_v62 = vld [vmem:[%s5090_s16 + $0x50] sm:$0xff]  ;;  %v4206_v26 = vld [vmem:[%s5090_s16 + $0x58] sm:$0xff] }
 0x5ff   : >> { %4191 = vst [vmem:[%s5086_s1 + $0x18] sm:$0xff] %v4190_v58  ;;  %s4536_s24 = sshll.u32 %s8522_s11, 7  ;;  %v4208_v59 = vld [vmem:[%s5090_s16 + $0x60] sm:$0xff]  ;;  %v4210_v4 = vld [vmem:[%s5090_s16 + $0x68] sm:$0xff]  ;;  %v4212_v19 = vld [vmem:[%s5090_s16 + $0x70] sm:$0xff]  ;;  %s8509_s21 = smov %s8522_s11 }
 0x600   : >> { %4193 = vst [vmem:[%s5086_s1 + $0x20] sm:$0xff] %v4192_v5  ;;  %s4221_s18 = scalar_lea.vmem %s7978_s27, %s4536_s24 [#allocation3]   ;;  %s4222_s22 = scalar_lea.vmem %s8287_s29, %s4536_s24   ;;  %v4214_v32 = vld [vmem:[%s5090_s16 + $0x78] sm:$0xff] }
 0x601   : >> { %4195 = vst [vmem:[%s5086_s1 + $0x28] sm:$0xff] %v4194_v22  ;;  %s8508_s16 = smov %s4221_s18 }
 0x602   : >> { %4197 = vst [vmem:[%s5086_s1 + $0x30] sm:$0xff] %v4196_v42 }
 0x603   : >> { %4199 = vst [vmem:[%s5086_s1 + $0x38] sm:$0xff] %v4198_v33 }
 0x604   : >> { %4201 = vst [vmem:[%s5086_s1 + $0x40] sm:$0xff] %v4200_v1 }
 0x605   : >> { %4203 = vst [vmem:[%s5086_s1 + $0x48] sm:$0xff] %v4202_v40 }
 0x606   : >> { %4205 = vst [vmem:[%s5086_s1 + $0x50] sm:$0xff] %v4204_v62 }
 0x607   : >> { %4207 = vst [vmem:[%s5086_s1 + $0x58] sm:$0xff] %v4206_v26  ;;  %4180 = sbr.rel (!%p4177_p6) target bundleno = 1531 (0x5fb), region = 240 }
 0x608   : >> { %4209 = vst [vmem:[%s5086_s1 + $0x60] sm:$0xff] %v4208_v59 }
 0x609   : >> { %4211 = vst [vmem:[%s5086_s1 + $0x68] sm:$0xff] %v4210_v4 }
 0x60a   : >> { %4213 = vst [vmem:[%s5086_s1 + $0x70] sm:$0xff] %v4212_v19 }
 0x60b   : >> { %4215 = vst [vmem:[%s5086_s1 + $0x78] sm:$0xff] %v4214_v32  ;;  %s8507_s1 = smov %s4222_s22 }
 0x60c PF: > { %s8366_s19 = sand.u32 15, %s8520_s2   ;;  %s4550_s12 = sshll.u32 %s8293_s0, 7 }
 0x60d   : > { %s4227_s15 = scalar_lea.vmem %s7978_s27, %s4550_s12 [#allocation3]   ;;  %s4229_s26 = scalar_lea.vmem %s8287_s29, %s4550_s12  }
 0x60e   : > { %p4541_p7 = scmp.le.s32.totalorder %s8366_s19, 0 }
 0x60f   : > { %s5100_s23 = smov (!%p4541_p7), %s4229_s26   ;;  %s5104_s25 = smov (!%p4541_p7), %s4227_s15  }
 0x610   : > { %4387 = sbr.rel (%p4541_p7) target bundleno = 1565 (0x61d), region = 245  ;;  %s5108_s13 = smov (!%p4541_p7), 0  }
 0x611   : > { %s5112_s30 = smov (!%p4541_p7), 0  }
 0x615 LB: >> { %v4239_v53 = vld [vmem:[%s5106_s25] sm:$0xff]  ;;  %s4241_s2 = sadd.s32 1, %s5110_s13  ;;  %s4233_s30 = sadd.s32 1, %s5114_s30   ;;  %s5114_s30 = sphi %s5112_s30, %s4233_s30   ;;  %s5110_s13 = sphi %s5108_s13, %s5109_s13   ;;  %s5106_s25 = sphi %s5104_s25, %s4246_s25   ;;  %s5102_s23 = sphi %s5100_s23, %s4247_s23  }
 0x616   : >> { %4240 = vst [vmem:[%s5102_s23] sm:$0xff] %v4239_v53  ;;  %p4242_p8 = scmp.ge.s32.totalorder %s4241_s2, %s8366_s19  ;;  %p4232_p9 = scmp.ge.s32.totalorder %s4233_s30, %s8366_s19 }
 0x618   : >> { %s8524_s2 = smov (%p4242_p8, %s4241_s2), 0  ;;  %4235 = sbr.rel (!%p4232_p9) target bundleno = 1557 (0x615), region = 251 }
 0x619   : >> { %s4542_s27 = sshll.u32 %s8524_s2, 3  ;;  %s5109_s13 = smov %s8524_s2  }
 0x61a   : >> { %s4246_s25 = scalar_lea.vmem %s4227_s15, %s4542_s27 [#allocation3]   ;;  %s4247_s23 = scalar_lea.vmem %s4229_s26, %s4542_s27  }
 0x61d PF: > { %p18_p10 = scmp.ge.s32.totalorder %s5188_s17, 4   ;;  %s8510_s13 = smov %s5046_s14 }
 0x61e   : > { %s8511_s14 = smov %s5196_s20  ;;  %s8512_s15 = smov %s5188_s17 }
 0x61f   :  { %20 = sbr.rel (!%p18_p10) target bundleno = 6 (0x6), region = 262 }

</bundles_post_ra>
